<compile_context>
chip_gen: v7x
topology: tpu7x:2x2x1
jax: 0.10.0
libtpu: 0.0.40
codegen_flags: <defaults>
</compile_context>

<pallas_src>
import jax
import jax.numpy as jnp
from jax.experimental import pallas as pl
from jax.experimental.pallas import tpu as pltpu


# Set to 2 on v7x (2 TensorCores/chip) to shard the node axis across cores via
# CORE_PARALLEL; keep 1 on v5e/v6e (single TC) to avoid pure split overhead.
_NUM_CORE_SPLITS = 1

_VMEM_LIMIT = 32 * 1024 * 1024          # scoped-VMEM request (safe on all gens)
_TILE_VMEM_BUDGET = 8 * 1024 * 1024     # 2 double-buffered zf tiles + weights
_RESIDENT_BUDGET = 16 * 1024 * 1024     # in-kernel bytes allowed for fused path


def _round_up(x, m):
    return ((x + m - 1) // m) * m


def _pick_tile(rows_needed, row_bytes, fixed_bytes, max_rows, align):
    """Largest node tile (multiple of `align`) whose two pipeline buffers plus
    the resident weight blocks fit the per-pass VMEM tile budget."""
    avail = max(_TILE_VMEM_BUDGET - fixed_bytes, 2 * align * row_bytes)
    cap = max(align, (avail // (2 * row_bytes)) // align * align)
    want = _round_up(max(rows_needed, 1), align)
    return max(align, min(_round_up(max_rows, align), cap, want))


# ---------------------------------------------------------------------------
# Streaming pass 1: accumulate sum_n tanh(zf @ blockdiag(W1) + tile(b1))
# into an (8, M*H) VPU accumulator; the final 8->1 reduce happens in glue.
# ---------------------------------------------------------------------------
def _score_kernel(zf_ref, w1b_ref, b1t_ref, hsum_ref, acc_ref):
    # zf_ref: (tile, MD) stream dtype; w1b_ref: (MD, MH) stream dtype;
    # b1t_ref: (1, MH) f32; hsum_ref (out): (1, 8, MH) f32 per core split;
    # acc_ref (scratch): (8, MH) f32.
    step = pl.program_id(1)

    @pl.when(step == 0)
    def _():
        acc_ref[...] = jnp.zeros_like(acc_ref)

    h = jnp.tanh(
        jnp.dot(zf_ref[...], w1b_ref[...], preferred_element_type=jnp.float32)
        + b1t_ref[...]
    )                                                     # (tile, MH) f32
    # Grouped accumulation: split the sublane dim into vreg-rows of 8 (a
    # layout-preserving reshape) and add them with plain VPU vector adds --
    # no per-step XLU cross-sublane reduce.
    h3 = h.reshape(h.shape[0] // 8, 8, h.shape[1])
    acc_ref[...] += jnp.sum(h3, axis=0)

    @pl.when(step == pl.num_programs(1) - 1)
    def _():
        hsum_ref[...] = acc_ref[...].reshape(hsum_ref.shape)


# ---------------------------------------------------------------------------
# Streaming pass 2 (G-folded, lane-dense output):
#   out_fold = zf_fold @ kron(I_G, kron(beta, I_D))
# ---------------------------------------------------------------------------
def _mix_kernel(zf_ref, bmat_ref, o_ref):
    o_ref[...] = jnp.dot(
        zf_ref[...], bmat_ref[...], preferred_element_type=jnp.float32
    ).astype(o_ref.dtype)


# ---------------------------------------------------------------------------
# Fused single-read kernel: zf resident in VMEM; scores, softmax beta and the
# beta-weighted mix computed without re-reading zf from HBM.
# ---------------------------------------------------------------------------
def _make_fused_kernel(n_valid, d_out):
    inv_n = 1.0 / float(n_valid)

    def kernel(zf_ref, w1b_ref, b1t_ref, q_ref, corr_ref, istack_ref, o_ref):
        # scores: hsum = sum_n tanh(zf @ blockdiag(W1) + b1), pad-corrected
        h = jnp.tanh(
            jnp.dot(zf_ref[...], w1b_ref[...], preferred_element_type=jnp.float32)
            + b1t_ref[...]
        )                                                 # (Np, MH) f32
        hsum = jnp.sum(h, axis=0, keepdims=True) - corr_ref[...]   # (1, MH)
        # per-metapath score, replicated over each metapath's D lanes:
        #   sf[0, m*D + d] = (1/N) * sum_h hsum[m*H + h] * w2[h]
        sf = jnp.dot(hsum, q_ref[...], preferred_element_type=jnp.float32) * inv_n
        # softmax over metapaths done on the lane-replicated row: since every
        # score appears D times, sum(exp) = D * sum_m exp  ->  scale by D.
        sf = sf - jnp.max(sf, axis=-1, keepdims=True)
        e = jnp.exp(sf)
        beta_full = e * (jnp.float32(d_out) / jnp.sum(e, axis=-1, keepdims=True))
        # mix: out[n, d] = sum_m beta_m * z[n, m, d]
        #   = (zf * beta_full) @ vstack_m(I_D)   (istack is a constant 0/1 mat)
        zb = zf_ref[...] * beta_full
        o_ref[...] = jnp.dot(
            zb, istack_ref[...], preferred_element_type=jnp.float32
        ).astype(o_ref.dtype)

    return kernel


def semantic_attention(z, w1, b1, w2, *, tn=1024, stream_dtype=jnp.bfloat16,
                       force_two_pass=False):
    """z: (N, M, D).  w1: (D, H), b1: (1, H), w2: (H, 1).  Returns (N, D) f32.

    stream_dtype: HBM streaming dtype for the two-pass path (bf16 halves HBM
    bytes; ~1e-3 relative error -- see perf review).  The fused resident path
    (small/medium N) always keeps f32 since it reads zf only once.
    """
    N, M, D = z.shape
    Dw, H = w1.shape
    assert Dw == D and b1.shape == (1, H) and w2.shape == (H, 1)
    MD, MH = M * D, M * H

    z = z.astype(jnp.float32)
    w1 = w1.astype(jnp.float32)
    b1 = b1.astype(jnp.float32)
    w2 = w2.astype(jnp.float32)

    zf = z.reshape(N, MD)                                 # free: contiguous HBM
    w1b = jnp.kron(jnp.eye(M, dtype=jnp.float32), w1)     # (MD, MH) block-diag
    b1t = jnp.tile(b1, (1, M))                            # (1, MH)

    # ------------------ fused single-HBM-read path (zf resident) -------------
    n_pad8 = _round_up(N, 8)
    fused_bytes = 4 * n_pad8 * (2 * MD + MH + D) + 4 * (2 * MD * MH + MD * D)
    if not force_two_pass and fused_bytes <= _RESIDENT_BUDGET:
        zf_p = zf if n_pad8 == N else jnp.pad(zf, ((0, n_pad8 - N), (0, 0)))
        # exact correction for the zero-padded rows: each adds tanh(b1) to hsum
        corr = jnp.float32(n_pad8 - N) * jnp.tile(jnp.tanh(b1), (1, M))  # (1,MH)
        # q[m*H + h, m*D + d] = w2[h]  (scores replicated per lane)
        q = jnp.kron(jnp.eye(M, dtype=jnp.float32),
                     jnp.dot(w2, jnp.ones((1, D), jnp.float32)))         # (MH,MD)
        # istack = vstack of M identity(D): sums the M D-chunks of zf*beta
        istack = jnp.tile(jnp.eye(D, dtype=jnp.float32), (M, 1))         # (MD,D)

        out_pad = pl.pallas_call(
            _make_fused_kernel(N, D),
            out_shape=jax.ShapeDtypeStruct((n_pad8, D), jnp.float32),
            in_specs=[pl.BlockSpec(memory_space=pltpu.MemorySpace.VMEM)] * 6,
            out_specs=pl.BlockSpec(memory_space=pltpu.MemorySpace.VMEM),
            compiler_params=pltpu.CompilerParams(vmem_limit_bytes=_VMEM_LIMIT),
        )(zf_p, w1b, b1t, q, corr, istack)
        return out_pad[:N]

    # ------------------ streaming two-pass path -------------------------------
    # Fold G node rows per pass-2 output row so its last dim is G*D (=128 when
    # 128 % D == 0) -> unmasked, lane-dense stores.
    G = 128 // D if (D < 128 and 128 % D == 0) else 1
    align = max(32, 8 * G)        # covers bf16 sublane packing and the G-fold

    stream_dtype = jnp.dtype(stream_dtype)
    zfs = zf.astype(stream_dtype)
    w1bs = w1b.astype(stream_dtype)

    row_bytes = MD * stream_dtype.itemsize
    fixed_bytes = (MD * MH * stream_dtype.itemsize            # w1b (pass 1)
                   + G * MD * G * D * stream_dtype.itemsize   # bmat (pass 2)
                   + 4 * MH)                                  # b1t
    splits = max(1, _NUM_CORE_SPLITS)
    rows_per_split = pl.cdiv(N, splits)
    tile = _pick_tile(rows_per_split, row_bytes, fixed_bytes, tn, align)
    bps = pl.cdiv(rows_per_split, tile)                  # blocks per core split
    n_pad = splits * bps * tile
    if n_pad != N:
        zfs = jnp.pad(zfs, ((0, n_pad - N), (0, 0)))     # zero rows; fixed below

    # CORE_PARALLEL actually shards the split axis across TensorCores on v7x;
    # with a single split (v5e/v6e) the axis is trivial.
    sem0 = pltpu.CORE_PARALLEL if splits > 1 else "arbitrary"

    # ---- pass 1: per-core (8, MH) partial sums of tanh(z W1 + b1) -----------
    # (If profiling shows exposed DMA at tile boundaries, add
    #  pipeline_mode=pl.Buffered(3) to the zf BlockSpec below.)
    hsum_parts = pl.pallas_call(
        _score_kernel,
        out_shape=jax.ShapeDtypeStruct((splits, 8, MH), jnp.float32),
        grid_spec=pltpu.PrefetchScalarGridSpec(
            num_scalar_prefetch=0,
            grid=(splits, bps),
            in_specs=[
                pl.BlockSpec((tile, MD), lambda c, i: (c * bps + i, 0)),
                pl.BlockSpec((MD, MH), lambda c, i: (0, 0)),
                pl.BlockSpec((1, MH), lambda c, i: (0, 0)),
            ],
            out_specs=pl.BlockSpec((1, 8, MH), lambda c, i: (c, 0, 0)),
            scratch_shapes=[pltpu.VMEM((8, MH), jnp.float32)],
        ),
        compiler_params=pltpu.CompilerParams(
            dimension_semantics=(sem0, "arbitrary"),
            vmem_limit_bytes=_VMEM_LIMIT,
        ),
    )(zfs, w1bs, b1t)

    # ---- glue: tiny M-sized math (exact f32, elementwise) --------------------
    hsum = hsum_parts.sum(axis=(0, 1)).reshape(M, H)            # (M, H)
    # remove the exact contribution of the zero-padded rows: tanh(0@W1 + b1)
    hsum = hsum - jnp.float32(n_pad - N) * jnp.tanh(b1)
    w_scores = jnp.sum(hsum * w2[:, 0][None, :], axis=1) / jnp.float32(N)  # (M,)
    beta = jax.nn.softmax(w_scores, axis=0)                     # (M,)

    # ---- pass 2: G-folded, lane-dense beta-weighted reduction ---------------
    bmat = jnp.kron(beta.reshape(M, 1), jnp.eye(D, dtype=jnp.float32))  # (MD, D)
    bmat_fold = jnp.kron(jnp.eye(G, dtype=jnp.float32), bmat).astype(stream_dtype)
    zf_fold = zfs.reshape(n_pad // G, G * MD)            # free row-major refold
    tile_g = tile // G
    out_fold = pl.pallas_call(
        _mix_kernel,
        out_shape=jax.ShapeDtypeStruct((n_pad // G, G * D), jnp.float32),
        grid_spec=pltpu.PrefetchScalarGridSpec(
            num_scalar_prefetch=0,
            grid=(splits, bps),
            in_specs=[
                pl.BlockSpec((tile_g, G * MD), lambda c, i: (c * bps + i, 0)),
                pl.BlockSpec((G * MD, G * D), lambda c, i: (0, 0)),
            ],
            out_specs=pl.BlockSpec((tile_g, G * D), lambda c, i: (c * bps + i, 0)),
        ),
        compiler_params=pltpu.CompilerParams(
            dimension_semantics=(sem0, "parallel"),
            vmem_limit_bytes=_VMEM_LIMIT,
        ),
    )(zf_fold, bmat_fold)
    return out_fold.reshape(n_pad, D)[:N]


def semantic_attention_ref(z, w1, b1, w2):
    """Pure-JAX reference mirroring the PyTorch module."""
    hp = jax.lax.Precision.HIGHEST
    s = jnp.tanh(jnp.dot(z, w1, precision=hp) + b1)             # (N, M, H)
    s = jnp.dot(s, w2, precision=hp)                            # (N, M, 1)
    w = s.mean(axis=0)                                          # (M, 1)
    beta = jax.nn.softmax(w, axis=0)                            # (M, 1)
    beta = jnp.broadcast_to(beta, (z.shape[0],) + beta.shape)   # (N, M, 1)
    return (beta * z).sum(axis=1)                               # (N, D)


if __name__ == "__main__":
    # nodes (non-multiple of the tile, exercises padding), metapaths, in, hidden
    N, M, D, H = 1000, 4, 32, 32

    key = jax.random.PRNGKey(0)
    kz, k1, kb, k2 = jax.random.split(key, 4)
    z = jax.random.normal(kz, (N, M, D), dtype=jnp.float32)
    # synthetic nn.Linear(in_size, hidden) + nn.Linear(hidden, 1, bias=False)
    w1 = jax.random.normal(k1, (D, H), dtype=jnp.float32) * 0.1
    b1 = jax.random.normal(kb, (1, H), dtype=jnp.float32) * 0.1
    w2 = jax.random.normal(k2, (H, 1), dtype=jnp.float32) * 0.1

    ref = semantic_attention_ref(z, w1, b1, w2)

    # 1) fused single-HBM-read path (f32, zf resident in VMEM)
    out_fused = jax.block_until_ready(semantic_attention(z, w1, b1, w2))
    assert out_fused.shape == (N, D)
    err = jnp.max(jnp.abs(out_fused - ref))
    assert jnp.allclose(out_fused, ref, atol=2e-3, rtol=2e-3), (
        f"fused path mismatch: max abs err = {err:.3e}")

    # 2) streaming two-pass path, f32 stream (1024-row tiles, lane-dense
    #    G-folded pass-2 output)
    out_tp32 = jax.block_until_ready(
        semantic_attention(z, w1, b1, w2, force_two_pass=True,
                           stream_dtype=jnp.float32))
    err = jnp.max(jnp.abs(out_tp32 - ref))
    assert jnp.allclose(out_tp32, ref, atol=2e-3, rtol=2e-3), (
        f"two-pass f32 mismatch: max abs err = {err:.3e}")

    # 3) streaming two-pass path, bf16 stream (halved HBM bytes), small tn to
    #    exercise the multi-step (8, MH) accumulator.  bf16 quantisation of z
    #    costs ~1e-3 relative error (flagged in the perf review) -> looser tol.
    out_tpbf = jax.block_until_ready(
        semantic_attention(z, w1, b1, w2, force_two_pass=True, tn=256))
    err = jnp.max(jnp.abs(out_tpbf - ref))
    assert jnp.allclose(out_tpbf, ref, atol=1e-2, rtol=1e-2), (
        f"two-pass bf16 mismatch: max abs err = {err:.3e}")

    print("KERNEL_OK")
</pallas_src>

<mosaic_0001>
module attributes {stable_mosaic.version = 11 : i64} {
  func.func @kernel(%arg0: memref<1000x128xf32, #tpu.memory_space<vmem>>, %arg1: memref<128x128xf32, #tpu.memory_space<vmem>>, %arg2: memref<1x128xf32, #tpu.memory_space<vmem>>, %arg3: memref<128x128xf32, #tpu.memory_space<vmem>>, %arg4: memref<1x128xf32, #tpu.memory_space<vmem>>, %arg5: memref<128x32xf32, #tpu.memory_space<vmem>>, %arg6: memref<1000x32xf32, #tpu.memory_space<vmem>>) attributes {dimension_semantics = [], scalar_prefetch = 0 : i64, scratch_operands = 0 : i64, tpu.core_type = #tpu.core_type<tc>} {
    %c0 = arith.constant 0 : index
    %c0_0 = arith.constant 0 : index
    %0 = vector.load %arg0[%c0, %c0_0] : memref<1000x128xf32, #tpu.memory_space<vmem>>, vector<1000x128xf32>
    %c0_1 = arith.constant 0 : index
    %c0_2 = arith.constant 0 : index
    %1 = vector.load %arg1[%c0_1, %c0_2] : memref<128x128xf32, #tpu.memory_space<vmem>>, vector<128x128xf32>
    %cst = arith.constant dense<0.000000e+00> : vector<1000x128xf32>
    %2 = tpu.matmul %0, %1, %cst {dimension_numbers = #tpu.dot_dimension_numbers<[1], [0], [0], [1], [0, 0, 1, 1], [], []>} : vector<1000x128xf32>, vector<128x128xf32>, vector<1000x128xf32> -> vector<1000x128xf32>
    %c0_3 = arith.constant 0 : index
    %c0_4 = arith.constant 0 : index
    %3 = vector.load %arg2[%c0_3, %c0_4] : memref<1x128xf32, #tpu.memory_space<vmem>>, vector<1x128xf32>
    %4 = vector.broadcast %3 : vector<1x128xf32> to vector<1000x128xf32>
    %5 = arith.addf %2, %4 : vector<1000x128xf32>
    %6 = math.tanh %5 : vector<1000x128xf32>
    %cst_5 = arith.constant dense<0.000000e+00> : vector<128xf32>
    %7 = vector.multi_reduction <add>, %6, %cst_5 [0] : vector<1000x128xf32> to vector<128xf32>
    %8 = vector.shape_cast %7 : vector<128xf32> to vector<1x128xf32>
    %c0_6 = arith.constant 0 : index
    %c0_7 = arith.constant 0 : index
    %9 = vector.load %arg4[%c0_6, %c0_7] : memref<1x128xf32, #tpu.memory_space<vmem>>, vector<1x128xf32>
    %10 = arith.subf %8, %9 : vector<1x128xf32>
    %c0_8 = arith.constant 0 : index
    %c0_9 = arith.constant 0 : index
    %11 = vector.load %arg3[%c0_8, %c0_9] : memref<128x128xf32, #tpu.memory_space<vmem>>, vector<128x128xf32>
    %cst_10 = arith.constant dense<0.000000e+00> : vector<1x128xf32>
    %12 = tpu.matmul %10, %11, %cst_10 {dimension_numbers = #tpu.dot_dimension_numbers<[1], [0], [0], [1], [0, 0, 1, 1], [], []>} : vector<1x128xf32>, vector<128x128xf32>, vector<1x128xf32> -> vector<1x128xf32>
    %cst_11 = arith.constant 1.000000e-03 : f32
    %13 = vector.broadcast %cst_11 : f32 to vector<1x128xf32>
    %14 = arith.mulf %12, %13 : vector<1x128xf32>
    %cst_12 = arith.constant dense<0xFF800000> : vector<1xf32>
    %15 = vector.multi_reduction <maximumf>, %14, %cst_12 [1] : vector<1x128xf32> to vector<1xf32>
    %16 = vector.shape_cast %15 : vector<1xf32> to vector<1x1xf32>
    %17 = vector.broadcast %16 : vector<1x1xf32> to vector<1x128xf32>
    %18 = arith.subf %14, %17 : vector<1x128xf32>
    %19 = math.exp %18 : vector<1x128xf32>
    %cst_13 = arith.constant dense<0.000000e+00> : vector<1xf32>
    %20 = vector.multi_reduction <add>, %19, %cst_13 [1] : vector<1x128xf32> to vector<1xf32>
    %21 = vector.shape_cast %20 : vector<1xf32> to vector<1x1xf32>
    %cst_14 = arith.constant 3.200000e+01 : f32
    %22 = vector.broadcast %cst_14 : f32 to vector<1x1xf32>
    %23 = arith.divf %22, %21 : vector<1x1xf32>
    %24 = vector.broadcast %23 : vector<1x1xf32> to vector<1x128xf32>
    %25 = arith.mulf %19, %24 : vector<1x128xf32>
    %c0_15 = arith.constant 0 : index
    %c0_16 = arith.constant 0 : index
    %26 = vector.load %arg0[%c0_15, %c0_16] : memref<1000x128xf32, #tpu.memory_space<vmem>>, vector<1000x128xf32>
    %27 = vector.broadcast %25 : vector<1x128xf32> to vector<1000x128xf32>
    %28 = arith.mulf %26, %27 : vector<1000x128xf32>
    %c0_17 = arith.constant 0 : index
    %c0_18 = arith.constant 0 : index
    %29 = vector.load %arg5[%c0_17, %c0_18] : memref<128x32xf32, #tpu.memory_space<vmem>>, vector<128x32xf32>
    %cst_19 = arith.constant dense<0.000000e+00> : vector<1000x32xf32>
    %30 = tpu.matmul %28, %29, %cst_19 {dimension_numbers = #tpu.dot_dimension_numbers<[1], [0], [0], [1], [0, 0, 1, 1], [], []>} : vector<1000x128xf32>, vector<128x32xf32>, vector<1000x32xf32> -> vector<1000x32xf32>
    %c0_20 = arith.constant 0 : index
    %c0_21 = arith.constant 0 : index
    %31 = vector.load %arg6[%c0_20, %c0_21] : memref<1000x32xf32, #tpu.memory_space<vmem>>, vector<1000x32xf32>
    tpu.vector_store %arg6[%c0_20, %c0_21], %30 {strides = array<i32>} : memref<1000x32xf32, #tpu.memory_space<vmem>>, vector<1000x32xf32>,
    return
  }
}

</mosaic_0001>

<bundles_post_ra>
// kernel: tpu_custom_call.1
= control target key start
LH: loop header
LB: loop body
LE: loop exit
PB: predicated region body
PF: predicated region fallthrough
CT: control target
= control target key end

     0   :  { %11 = vsyncpa [#allocation3], 0  ;;  %s5324_s0 = inlined_call_operand.hbm [shape: f32[1000,128], index: 0, kind: input, shape index: {}]   ;;  %s5325_s1 = inlined_call_operand.vmem [shape: f32[128,128], index: 1, kind: input, shape index: {}]   ;;  %s5326_s2 = inlined_call_operand.vmem [shape: f32[1,128], index: 2, kind: input, shape index: {}]   ;;  %s5327_s3 = inlined_call_operand.hbm [shape: f32[128,128], index: 3, kind: input, shape index: {}]   ;;  %s5328_s4 = inlined_call_operand.vmem [shape: f32[1,128], index: 4, kind: input, shape index: {}]   ;;  %s5329_s5 = inlined_call_operand.vmem [shape: f32[128,32], index: 5, kind: input, shape index: {}]   ;;  %s5330_s6 = inlined_call_operand.vmem [shape: f32[1000,32], index: 6, kind: output, shape index: {}]  }
   0x1   :  { %12 = vsyncpa [#allocation5], 0  ;;  %s3869_s21 = smov [#allocation2]   ;;  %s3821_s25 = scalar_lea.hbm %s5324_s0, 16000 }
   0x2   :  { %s18_s22 = sshll.u32 %s3869_s21, 4  ;;  %p3822_p0 = scmp.ne.s32.totalorder %s5324_s0, %s3821_s25  ;;  %s19_s22 = int_to_ptr.vmem [resolvable:$true] %s18_s22 }
   0x3   :  { %p3825_p1 = scmp.lt.u32.totalorder %s3821_s25, %s5324_s0 }
   0x5   :  { %p3827_p2 = pnand %p3825_p1, %p3822_p0 }
   0x7   :  { %3830 = shalt.err (!%p3827_p2)
}
   0x8   :  { %s3831_s30 = scalar_lea.vmem %s19_s22, 16000  ;;  %p3836_p4 = scmp.lt.s32.totalorder %s19_s22, %s19_s22 }
   0x9   :  { %p3832_p3 = scmp.ne.s32.totalorder %s19_s22, %s3831_s30  ;;  %p3837_p5 = scmp.lt.s32.totalorder %s3831_s30, %s3831_s30 }
   0xb   :  { %p3838_p6 = por %p3837_p5, %p3836_p4 }
   0xd   :  { %p3839_p7 = pnand %p3838_p6, %p3832_p3 }
   0xf   :  { %3842 = shalt.err (!%p3839_p7)
}
  0x10   :  { %s3870_s7 = smov 128   ;;  %s3871_s8 = smov 8  }
  0x11   :  { %24 = dma.hbm_to_vmem [thread:$0]  %s5324_s0, 16000, %s19_s22, [#allocation3], %s3870_s7, %s3870_s7, %s3871_s8  }
  0x12   :  { %s3872_s11 = smov [#allocation4]   ;;  %s3843_s15 = scalar_lea.hbm %s5327_s3, 2048 }
  0x13   :  { %s34_s12 = sshll.u32 %s3872_s11, 4  ;;  %p3844_p8 = scmp.ne.s32.totalorder %s5327_s3, %s3843_s15  ;;  %s35_s12 = int_to_ptr.vmem [resolvable:$true] %s34_s12 }
  0x14   :  { %p3847_p9 = scmp.lt.u32.totalorder %s3843_s15, %s5327_s3 }
  0x16   :  { %p3849_p10 = pnand %p3847_p9, %p3844_p8 }
  0x18   :  { %3852 = shalt.err (!%p3849_p10)
}
  0x19   :  { %s3853_s20 = scalar_lea.vmem %s35_s12, 2048  ;;  %p3858_p12 = scmp.lt.s32.totalorder %s35_s12, %s35_s12 }
  0x1a   :  { %p3854_p11 = scmp.ne.s32.totalorder %s35_s12, %s3853_s20  ;;  %p3859_p13 = scmp.lt.s32.totalorder %s3853_s20, %s3853_s20 }
  0x1c   :  { %p3860_p0 = por %p3859_p13, %p3858_p12 }
  0x1e   :  { %p3861_p1 = pnand %p3860_p0, %p3854_p11 }
  0x20   :  { %3864 = shalt.err (!%p3861_p1)
}
  0x21   :  { %40 = dma.hbm_to_vmem [thread:$0]  %s5327_s3, 2048, %s35_s12, [#allocation5], %s3870_s7, %s3870_s7, %s3871_s8  }
  0x22   :  { %3865 = dma.done.wait [#allocation3], 16000  }
  0x23   :  { %3866 = vsyncadd [#allocation3], 4294951296 }
  0x24   :  { %3867 = dma.done.wait [#allocation5], 2048  }
  0x25   :  { %3868 = vsyncadd [#allocation5], 4294965248  ;;  %v3873_v0 = vmov 0.0|0.0   ;;  %vm3874_vm0 = vmmov 0   ;;  %v3875_v1 = vmov 0.0   ;;  %v176_v2 = vld [vmem:[%s5325_s1] sm:$0xff] }
  0x26   :  { %3362 = vmatprep.subr.bf16.mxu0 %v3873_v0  ;;  %2545 = vmatprep.mubr.msk.f32.mxu0 %vm3874_vm0, %v3875_v1  ;;  %v177_v3 = vld [vmem:[%s5325_s1 + $0x8] sm:$0xff]  ;;  %v178_v4 = vld [vmem:[%s5325_s1 + $0x10] sm:$0xff]  ;;  %v179_v6 = vld [vmem:[%s5325_s1 + $0x18] sm:$0xff]  ;;  %vm1233_vm1 = vcmask 1040384   ;;  %vm2081_vm2 = vcmask 261120  }
  0x27   :  { %3410 = vmatprep.subr.bf16.mxu1 %v3873_v0  ;;  %2987 = vmatprep.mubr.msk.f32.mxu1 %vm3874_vm0, %v3875_v1  ;;  %v3363_v5 = vpack.c.bf16 %v177_v3, %v176_v2  ;;  %v3366_v7 = vpack.c.bf16 %v179_v6, %v178_v4  ;;  %v180_v8 = vld [vmem:[%s5325_s1 + $0x20] sm:$0xff]  ;;  %v181_v9 = vld [vmem:[%s5325_s1 + $0x28] sm:$0xff]  ;;  %v182_v11 = vld [vmem:[%s5325_s1 + $0x30] sm:$0xff] }
  0x28   :  { %v3369_v10 = vpack.c.bf16 %v181_v9, %v180_v8  ;;  %v183_v12 = vld [vmem:[%s5325_s1 + $0x38] sm:$0xff]  ;;  %v184_v14 = vld [vmem:[%s5325_s1 + $0x40] sm:$0xff]  ;;  %v185_v15 = vld [vmem:[%s5325_s1 + $0x48] sm:$0xff] }
  0x29   :  { %3364 = vmatpush3.bf16.msra.mxu0 %v3363_v5  ;;  %v3372_v13 = vpack.c.bf16 %v183_v12, %v182_v11  ;;  %v3375_v16 = vpack.c.bf16 %v185_v15, %v184_v14  ;;  %v186_v17 = vld [vmem:[%s5325_s1 + $0x50] sm:$0xff]  ;;  %v187_v18 = vld [vmem:[%s5325_s1 + $0x58] sm:$0xff]  ;;  %v188_v20 = vld [vmem:[%s5325_s1 + $0x60] sm:$0xff] }
  0x2a   :  { %3365 = vmatprep.subr.bf16.mxu0 %v3873_v0  ;;  %v3378_v19 = vpack.c.bf16 %v187_v18, %v186_v17  ;;  %v189_v21 = vld [vmem:[%s5325_s1 + $0x68] sm:$0xff]  ;;  %v190_v23 = vld [vmem:[%s5325_s1 + $0x70] sm:$0xff]  ;;  %v191_v24 = vld [vmem:[%s5325_s1 + $0x78] sm:$0xff] }
  0x2b   :  { %v3381_v22 = vpack.c.bf16 %v189_v21, %v188_v20  ;;  %v3384_v25 = vpack.c.bf16 %v191_v24, %v190_v23  ;;  %v51_v26 = vld [vmem:[#allocation2] sm:$0xff]  ;;  %v52_v27 = vld [vmem:[#allocation2 + $0x8] sm:$0xff]  ;;  %v53_v28 = vld [vmem:[#allocation2 + $0x10] sm:$0xff] }
  0x2c   :  { %v54_v29 = vld [vmem:[#allocation2 + $0x18] sm:$0xff]  ;;  %v55_v30 = vld [vmem:[#allocation2 + $0x20] sm:$0xff]  ;;  %v56_v31 = vld [vmem:[#allocation2 + $0x28] sm:$0xff] }
  0x2d   :  { %3367 = vmatpush3.bf16.msra.mxu0 %v3366_v7  ;;  %v57_v32 = vld [vmem:[#allocation2 + $0x30] sm:$0xff]  ;;  %v58_v33 = vld [vmem:[#allocation2 + $0x38] sm:$0xff]  ;;  %v59_v34 = vld [vmem:[#allocation2 + $0x40] sm:$0xff] }
  0x2e   :  { %3368 = vmatprep.subr.bf16.mxu0 %v3873_v0  ;;  %v60_v35 = vld [vmem:[#allocation2 + $0x48] sm:$0xff]  ;;  %v61_v36 = vld [vmem:[#allocation2 + $0x50] sm:$0xff]  ;;  %v62_v37 = vld [vmem:[#allocation2 + $0x58] sm:$0xff] }
  0x2f   :  { %v63_v38 = vld [vmem:[#allocation2 + $0x60] sm:$0xff]  ;;  %v64_v39 = vld [vmem:[#allocation2 + $0x68] sm:$0xff]  ;;  %v65_v40 = vld [vmem:[#allocation2 + $0x70] sm:$0xff] }
  0x30   :  { %v66_v41 = vld [vmem:[#allocation2 + $0x78] sm:$0xff]  ;;  %v67_v42 = vld [vmem:[#allocation2 + $0x80] sm:$0xff]  ;;  %v68_v43 = vld [vmem:[#allocation2 + $0x88] sm:$0xff] }
  0x31   :  { %3370 = vmatpush3.bf16.msra.mxu0 %v3369_v10  ;;  %v69_v44 = vld [vmem:[#allocation2 + $0x90] sm:$0xff]  ;;  %v70_v45 = vld [vmem:[#allocation2 + $0x98] sm:$0xff]  ;;  %v71_v46 = vld [vmem:[#allocation2 + $0xa0] sm:$0xff] }
  0x32   :  { %3371 = vmatprep.subr.bf16.mxu0 %v3873_v0  ;;  %v72_v47 = vld [vmem:[#allocation2 + $0xa8] sm:$0xff]  ;;  %v73_v48 = vld [vmem:[#allocation2 + $0xb0] sm:$0xff]  ;;  %v74_v49 = vld [vmem:[#allocation2 + $0xb8] sm:$0xff] }
  0x33   :  { %v75_v50 = vld [vmem:[#allocation2 + $0xc0] sm:$0xff]  ;;  %v76_v51 = vld [vmem:[#allocation2 + $0xc8] sm:$0xff]  ;;  %v77_v52 = vld [vmem:[#allocation2 + $0xd0] sm:$0xff] }
  0x34   :  { %v78_v53 = vld [vmem:[#allocation2 + $0xd8] sm:$0xff]  ;;  %v79_v54 = vld [vmem:[#allocation2 + $0xe0] sm:$0xff]  ;;  %v80_v55 = vld [vmem:[#allocation2 + $0xe8] sm:$0xff] }
  0x35   :  { %3373 = vmatpush3.bf16.msra.mxu0 %v3372_v13  ;;  %v81_v56 = vld [vmem:[#allocation2 + $0xf0] sm:$0xff]  ;;  %v82_v57 = vld [vmem:[#allocation2 + $0xf8] sm:$0xff]  ;;  %v1146_v58 = vld [vmem:[#allocation4] sm:$0xff] }
  0x36   :  { %3374 = vmatprep.subr.bf16.mxu0 %v3873_v0  ;;  %v1147_v59 = vld [vmem:[#allocation4 + $0x8] sm:$0xff]  ;;  %v83_v61 = vld [vmem:[#allocation2 + $0x100] sm:$0xff]  ;;  %v84_v62 = vld [vmem:[#allocation2 + $0x108] sm:$0xff] }
  0x37   :  { %v3387_v60 = vpack.c.bf16 %v1147_v59, %v1146_v58  ;;  %v85_v63 = vld [vmem:[#allocation2 + $0x110] sm:$0xff]  ;;  %v86_v2 = vld [vmem:[#allocation2 + $0x118] sm:$0xff]  ;;  %v87_v3 = vld [vmem:[#allocation2 + $0x120] sm:$0xff] }
  0x38   :  { %v88_v4 = vld [vmem:[#allocation2 + $0x128] sm:$0xff]  ;;  %v89_v5 = vld [vmem:[#allocation2 + $0x130] sm:$0xff]  ;;  %v90_v6 = vld [vmem:[#allocation2 + $0x138] sm:$0xff] }
  0x39   :  { %3376 = vmatpush3.bf16.msra.mxu0 %v3375_v16  ;;  %v91_v7 = vld [vmem:[#allocation2 + $0x140] sm:$0xff]  ;;  %v92_v8 = vld [vmem:[#allocation2 + $0x148] sm:$0xff]  ;;  %v93_v9 = vld [vmem:[#allocation2 + $0x150] sm:$0xff] }
  0x3a   :  { %3377 = vmatprep.subr.bf16.mxu0 %v3873_v0  ;;  %v94_v10 = vld [vmem:[#allocation2 + $0x158] sm:$0xff]  ;;  %v95_v11 = vld [vmem:[#allocation2 + $0x160] sm:$0xff]  ;;  %v96_v12 = vld [vmem:[#allocation2 + $0x168] sm:$0xff] }
  0x3b   :  { %v97_v13 = vld [vmem:[#allocation2 + $0x170] sm:$0xff]  ;;  %v98_v14 = vld [vmem:[#allocation2 + $0x178] sm:$0xff]  ;;  %v1149_v16 = vld [vmem:[#allocation4 + $0x18] sm:$0xff] }
  0x3c   :  { %v1148_v15 = vld [vmem:[#allocation4 + $0x10] sm:$0xff]  ;;  %v99_v18 = vld [vmem:[#allocation2 + $0x180] sm:$0xff]  ;;  %v101_v20 = vld [vmem:[#allocation2 + $0x190] sm:$0xff] }
  0x3d   :  { %3379 = vmatpush3.bf16.msra.mxu0 %v3378_v19  ;;  %v3390_v17 = vpack.c.bf16 %v1149_v16, %v1148_v15  ;;  %v100_v19 = vld [vmem:[#allocation2 + $0x188] sm:$0xff]  ;;  %v102_v21 = vld [vmem:[#allocation2 + $0x198] sm:$0xff]  ;;  %v4108_v24 = vld [vmem:[%s5326_s2] ss:$0 sm:$0xff] }
  0x3e   :  { %3380 = vmatprep.subr.bf16.mxu0 %v3873_v0  ;;  %v104_v23 = vld [vmem:[#allocation2 + $0x1a8] sm:$0xff]  ;;  %v111_v59 = vld [vmem:[#allocation2 + $0x1e0] sm:$0xff] }
  0x41   :  { %3382 = vmatpush3.bf16.msra.mxu0 %v3381_v22  ;;  %v103_v22 = vld [vmem:[#allocation2 + $0x1a0] sm:$0xff] }
  0x42   :  { %3383 = vmatprep.subr.bf16.mxu0 %v3873_v0 }
  0x45   :  { %3385 = vmatpush3.bf16.msra.mxu0 %v3384_v25 }
  0x46   :  { %3386 = vmatprep.subr.bf16.mxu0 %v3873_v0 }
  0x48   :  { %2546 = vmatmul.mubr.f32.vlgmr.msra.gmra.mrb[0].mxu0 %v51_v26 }
  0x49   :  { %2548 = vmatprep.mubr.msk.f32.mxu0 %vm3874_vm0, %v3875_v1  ;;  %3388 = vmatpush3.bf16.msra.mxu0 %v3387_v60 }
  0x4a   :  { %3389 = vmatprep.subr.bf16.mxu0 %v3873_v0 }
  0x4c   :  { %2549 = vmatmul.mubr.f32.gmra.mrb[2].mxu0 %v52_v27 }
  0x4d   :  { %2551 = vmatprep.mubr.msk.f32.mxu0 %vm3874_vm0, %v3875_v1  ;;  %3391 = vmatpush3.bf16.msra.mxu0 %v3390_v17 }
  0x4e   :  { %3392 = vmatprep.subr.bf16.mxu0 %v3873_v0 }
  0x50   :  { %2552 = vmatmul.mubr.f32.gmra.mrb[4].mxu0 %v53_v28  ;;  %v105_v28 = vld [vmem:[#allocation2 + $0x1b0] sm:$0xff] }
  0x51   :  { %2554 = vmatprep.mubr.msk.f32.mxu0 %vm3874_vm0, %v3875_v1 }
  0x54   :  { %2555 = vmatmul.mubr.f32.gmra.mrb[6].mxu0 %v54_v29 }
  0x55   :  { %2557 = vmatprep.mubr.msk.f32.mxu0 %vm3874_vm0, %v3875_v1 }
  0x58   :  { %2558 = vmatmul.mubr.f32.gmra.mrb[8].mxu0 %v55_v30 }
  0x59   :  { %2560 = vmatprep.mubr.msk.f32.mxu0 %vm3874_vm0, %v3875_v1 }
  0x5c   :  { %2561 = vmatmul.mubr.f32.gmra.mrb[10].mxu0 %v56_v31 }
  0x5d   :  { %2563 = vmatprep.mubr.msk.f32.mxu0 %vm3874_vm0, %v3875_v1 }
  0x60   :  { %2564 = vmatmul.mubr.f32.gmra.mrb[12].mxu0 %v57_v32  ;;  %v106_v32 = vld [vmem:[#allocation2 + $0x1b8] sm:$0xff] }
  0x61   :  { %2566 = vmatprep.mubr.msk.f32.mxu0 %vm3874_vm0, %v3875_v1 }
  0x64   :  { %2567 = vmatmul.mubr.f32.gmra.mrb[14].mxu0 %v58_v33 }
  0x65   :  { %2569 = vmatprep.mubr.msk.f32.mxu0 %vm3874_vm0, %v3875_v1 }
  0x68   :  { %2570 = vmatmul.mubr.f32.gmra.mrb[16].mxu0 %v59_v34 }
  0x69   :  { %2572 = vmatprep.mubr.msk.f32.mxu0 %vm3874_vm0, %v3875_v1 }
  0x6c   :  { %2573 = vmatmul.mubr.f32.gmra.mrb[18].mxu0 %v60_v35 }
  0x6d   :  { %2575 = vmatprep.mubr.msk.f32.mxu0 %vm3874_vm0, %v3875_v1 }
  0x70   :  { %2576 = vmatmul.mubr.f32.gmra.mrb[20].mxu0 %v61_v36  ;;  %v107_v36 = vld [vmem:[#allocation2 + $0x1c0] sm:$0xff] }
  0x71   :  { %2578 = vmatprep.mubr.msk.f32.mxu0 %vm3874_vm0, %v3875_v1 }
  0x74   :  { %2579 = vmatmul.mubr.f32.gmra.mrb[22].mxu0 %v62_v37 }
  0x75   :  { %2581 = vmatprep.mubr.msk.f32.mxu0 %vm3874_vm0, %v3875_v1 }
  0x78   :  { %2582 = vmatmul.mubr.f32.gmra.mrb[24].mxu0 %v63_v38 }
  0x79   :  { %2584 = vmatprep.mubr.msk.f32.mxu0 %vm3874_vm0, %v3875_v1 }
  0x7c   :  { %2585 = vmatmul.mubr.f32.gmra.mrb[26].mxu0 %v64_v39 }
  0x7d   :  { %2587 = vmatprep.mubr.msk.f32.mxu0 %vm3874_vm0, %v3875_v1 }
  0x80   :  { %2588 = vmatmul.mubr.f32.gmra.mrb[28].mxu0 %v65_v40  ;;  %v108_v40 = vld [vmem:[#allocation2 + $0x1c8] sm:$0xff] }
  0x81   :  { %2590 = vmatprep.mubr.msk.f32.mxu0 %vm3874_vm0, %v3875_v1 }
  0x84   :  { %2591 = vmatmul.mubr.f32.gmra.mrb[30].mxu0 %v66_v41 }
  0x85   :  { %2593 = vmatprep.mubr.msk.f32.mxu0 %vm3874_vm0, %v3875_v1 }
  0x88   :  { %2594 = vmatmul.mubr.f32.gmra.mrb[32].mxu0 %v67_v42 }
  0x89   :  { %2596 = vmatprep.mubr.msk.f32.mxu0 %vm3874_vm0, %v3875_v1 }
  0x8c   :  { %2597 = vmatmul.mubr.f32.gmra.mrb[34].mxu0 %v68_v43 }
  0x8d   :  { %2599 = vmatprep.mubr.msk.f32.mxu0 %vm3874_vm0, %v3875_v1 }
  0x90   :  { %2600 = vmatmul.mubr.f32.gmra.mrb[36].mxu0 %v69_v44 }
  0x91   :  { %2602 = vmatprep.mubr.msk.f32.mxu0 %vm3874_vm0, %v3875_v1 }
  0x94   :  { %2603 = vmatmul.mubr.f32.gmra.mrb[38].mxu0 %v70_v45 }
  0x95   :  { %2605 = vmatprep.mubr.msk.f32.mxu0 %vm3874_vm0, %v3875_v1 }
  0x98   :  { %2606 = vmatmul.mubr.f32.gmra.mrb[40].mxu0 %v71_v46 }
  0x99   :  { %2608 = vmatprep.mubr.msk.f32.mxu0 %vm3874_vm0, %v3875_v1 }
  0x9c   :  { %2609 = vmatmul.mubr.f32.gmra.mrb[42].mxu0 %v72_v47  ;;  %v109_v47 = vld [vmem:[#allocation2 + $0x1d0] sm:$0xff] }
  0x9d   :  { %2611 = vmatprep.mubr.msk.f32.mxu0 %vm3874_vm0, %v3875_v1 }
  0xa0   :  { %2612 = vmatmul.mubr.f32.gmra.mrb[44].mxu0 %v73_v48 }
  0xa1   :  { %2614 = vmatprep.mubr.msk.f32.mxu0 %vm3874_vm0, %v3875_v1 }
  0xa4   :  { %2615 = vmatmul.mubr.f32.gmra.mrb[46].mxu0 %v74_v49 }
  0xa5   :  { %2617 = vmatprep.mubr.msk.f32.mxu0 %vm3874_vm0, %v3875_v1 }
  0xa8   :  { %2618 = vmatmul.mubr.f32.gmra.mrb[48].mxu0 %v75_v50 }
  0xa9   :  { %2620 = vmatprep.mubr.msk.f32.mxu0 %vm3874_vm0, %v3875_v1 }
  0xac   :  { %2621 = vmatmul.mubr.f32.gmra.mrb[50].mxu0 %v76_v51 }
  0xad   :  { %2623 = vmatprep.mubr.msk.f32.mxu0 %vm3874_vm0, %v3875_v1 }
  0xb0   :  { %2624 = vmatmul.mubr.f32.gmra.mrb[52].mxu0 %v77_v52 }
  0xb1   :  { %2626 = vmatprep.mubr.msk.f32.mxu0 %vm3874_vm0, %v3875_v1 }
  0xb4   :  { %2627 = vmatmul.mubr.f32.gmra.mrb[54].mxu0 %v78_v53  ;;  %v110_v53 = vld [vmem:[#allocation2 + $0x1d8] sm:$0xff] }
  0xb5   :  { %2629 = vmatprep.mubr.msk.f32.mxu0 %vm3874_vm0, %v3875_v1 }
  0xb8   :  { %2630 = vmatmul.mubr.f32.gmra.mrb[56].mxu0 %v79_v54 }
  0xb9   :  { %2632 = vmatprep.mubr.msk.f32.mxu0 %vm3874_vm0, %v3875_v1 }
  0xbc   :  { %2633 = vmatmul.mubr.f32.gmra.mrb[58].mxu0 %v80_v55 }
  0xbd   :  { %2635 = vmatprep.mubr.msk.f32.mxu0 %vm3874_vm0, %v3875_v1 }
  0xc0   :  { %2636 = vmatmul.mubr.f32.gmra.mrb[60].mxu0 %v81_v56 }
  0xc1   :  { %2638 = vmatprep.mubr.msk.f32.mxu0 %vm3874_vm0, %v3875_v1 }
  0xc4   :  { %2639 = vmatmul.mubr.f32.gmra.mrb[62].mxu0 %v82_v57 }
  0xc5   :  { %2641 = vmatprep.mubr.msk.f32.mxu0 %vm3874_vm0, %v3875_v1 }
  0xc8   :  { %2642 = vmatmul.mubr.f32.gmra.mrb[64].mxu0 %v83_v61 }
  0xc9   :  { %2644 = vmatprep.mubr.msk.f32.mxu0 %vm3874_vm0, %v3875_v1 }
  0xcc   :  { %2645 = vmatmul.mubr.f32.gmra.mrb[66].mxu0 %v84_v62 }
  0xcd   :  { %2647 = vmatprep.mubr.msk.f32.mxu0 %vm3874_vm0, %v3875_v1 }
  0xd0   :  { %2648 = vmatmul.mubr.f32.gmra.mrb[68].mxu0 %v85_v63 }
  0xd1   :  { %2650 = vmatprep.mubr.msk.f32.mxu0 %vm3874_vm0, %v3875_v1 }
  0xd4   :  { %2651 = vmatmul.mubr.f32.gmra.mrb[70].mxu0 %v86_v2 }
  0xd5   :  { %2653 = vmatprep.mubr.msk.f32.mxu0 %vm3874_vm0, %v3875_v1 }
  0xd8   :  { %2654 = vmatmul.mubr.f32.gmra.mrb[72].mxu0 %v87_v3  ;;  %v112_v3 = vld [vmem:[#allocation2 + $0x1e8] sm:$0xff] }
  0xd9   :  { %2656 = vmatprep.mubr.msk.f32.mxu0 %vm3874_vm0, %v3875_v1 }
  0xdc   :  { %2657 = vmatmul.mubr.f32.gmra.mrb[74].mxu0 %v88_v4 }
  0xdd   :  { %2659 = vmatprep.mubr.msk.f32.mxu0 %vm3874_vm0, %v3875_v1 }
  0xe0   :  { %2660 = vmatmul.mubr.f32.gmra.mrb[76].mxu0 %v89_v5 }
  0xe1   :  { %2662 = vmatprep.mubr.msk.f32.mxu0 %vm3874_vm0, %v3875_v1 }
  0xe4   :  { %2663 = vmatmul.mubr.f32.gmra.mrb[78].mxu0 %v90_v6 }
  0xe5   :  { %2665 = vmatprep.mubr.msk.f32.mxu0 %vm3874_vm0, %v3875_v1 }
  0xe8   :  { %2666 = vmatmul.mubr.f32.gmra.mrb[80].mxu0 %v91_v7 }
  0xe9   :  { %2668 = vmatprep.mubr.msk.f32.mxu0 %vm3874_vm0, %v3875_v1 }
  0xec   :  { %2669 = vmatmul.mubr.f32.gmra.mrb[82].mxu0 %v92_v8 }
  0xed   :  { %2671 = vmatprep.mubr.msk.f32.mxu0 %vm3874_vm0, %v3875_v1 }
  0xf0   :  { %2672 = vmatmul.mubr.f32.gmra.mrb[84].mxu0 %v93_v9  ;;  %v113_v9 = vld [vmem:[#allocation2 + $0x1f0] sm:$0xff] }
  0xf1   :  { %2674 = vmatprep.mubr.msk.f32.mxu0 %vm3874_vm0, %v3875_v1 }
  0xf4   :  { %2675 = vmatmul.mubr.f32.gmra.mrb[86].mxu0 %v94_v10  ;;  %v1150_v10 = vld [vmem:[#allocation4 + $0x20] sm:$0xff] }
  0xf5   :  { %2677 = vmatprep.mubr.msk.f32.mxu0 %vm3874_vm0, %v3875_v1 }
  0xf8   :  { %2678 = vmatmul.mubr.f32.gmra.mrb[88].mxu0 %v95_v11  ;;  %v1151_v11 = vld [vmem:[#allocation4 + $0x28] sm:$0xff] }
  0xf9   :  { %2680 = vmatprep.mubr.msk.f32.mxu0 %vm3874_vm0, %v3875_v1 }
  0xfc   :  { %2681 = vmatmul.mubr.f32.gmra.mrb[90].mxu0 %v96_v12  ;;  %v3393_v12 = vpack.c.bf16 %v1151_v11, %v1150_v10  ;;  %v123_v11 = vld [vmem:[#allocation2 + $0x240] sm:$0xff] }
  0xfd   :  { %2683 = vmatprep.mubr.msk.f32.mxu0 %vm3874_vm0, %v3875_v1 }
  0xfe   :  { %3394 = vmatpush3.bf16.msra.mxu0 %v3393_v12 }
  0xff   :  { %3395 = vmatprep.subr.bf16.mxu0 %v3873_v0 }
 0x100   :  { %2684 = vmatmul.mubr.f32.gmra.mrb[92].mxu0 %v97_v13 }
 0x101   :  { %2686 = vmatprep.mubr.msk.f32.mxu0 %vm3874_vm0, %v3875_v1 }
 0x104   :  { %2687 = vmatmul.mubr.f32.gmra.mrb[94].mxu0 %v98_v14 }
 0x105   :  { %2689 = vmatprep.mubr.msk.f32.mxu0 %vm3874_vm0, %v3875_v1 }
 0x108   :  { %2690 = vmatmul.mubr.f32.gmra.mrb[96].mxu0 %v99_v18  ;;  %v114_v18 = vld [vmem:[#allocation2 + $0x1f8] sm:$0xff] }
 0x109   :  { %2692 = vmatprep.mubr.msk.f32.mxu0 %vm3874_vm0, %v3875_v1 }
 0x10c   :  { %2693 = vmatmul.mubr.f32.gmra.mrb[98].mxu0 %v100_v19 }
 0x10d   :  { %2695 = vmatprep.mubr.msk.f32.mxu0 %vm3874_vm0, %v3875_v1 }
 0x110   :  { %2696 = vmatmul.mubr.f32.gmra.mrb[100].mxu0 %v101_v20 }
 0x111   :  { %2698 = vmatprep.mubr.msk.f32.mxu0 %vm3874_vm0, %v3875_v1 }
 0x114   :  { %2699 = vmatmul.mubr.f32.gmra.mrb[102].mxu0 %v102_v21 }
 0x115   :  { %2701 = vmatprep.mubr.msk.f32.mxu0 %vm3874_vm0, %v3875_v1 }
 0x118   :  { %2702 = vmatmul.mubr.f32.gmra.mrb[104].mxu0 %v103_v22 }
 0x119   :  { %2704 = vmatprep.mubr.msk.f32.mxu0 %vm3874_vm0, %v3875_v1 }
 0x11b   :  { %v265_v25 = vpop.f32.mrb[0].mxu0 }
 0x11c   :  { %v2547_v26 = vpop.f32.mrb[1].mxu0  ;;  %2705 = vmatmul.mubr.f32.gmra.mrb[106].mxu0 %v104_v23  ;;  %v266_v27 = vadd.f32 %v4108_v24, %v265_v25  ;;  %v115_v25 = vld [vmem:[#allocation2 + $0x200] sm:$0xff] }
 0x11d   :  { %2707 = vmatprep.mubr.msk.f32.mxu0 %vm3874_vm0, %v3875_v1 }
 0x11e   :  { %3441 = vtanh.f32 %v266_v27 }
 0x11f   :  { %v270_v29 = vpop.f32.mrb[2].mxu0 }
 0x120   :  { %v271_v30 = vadd.f32 %v4108_v24, %v270_v29  ;;  %v2550_v31 = vpop.f32.mrb[3].mxu0  ;;  %2708 = vmatmul.mubr.f32.gmra.mrb[108].mxu0 %v105_v28 }
 0x121   :  { %2710 = vmatprep.mubr.msk.f32.mxu0 %vm3874_vm0, %v3875_v1  ;;  %v116_v31 = vld [vmem:[#allocation2 + $0x208] sm:$0xff] }
 0x122   :  { %3443 = vtanh.f32 %v271_v30 }
 0x123   :  { %v275_v33 = vpop.f32.mrb[4].mxu0 }
 0x124   :  { %v276_v34 = vadd.f32 %v4108_v24, %v275_v33  ;;  %v2553_v35 = vpop.f32.mrb[5].mxu0  ;;  %2711 = vmatmul.mubr.f32.gmra.mrb[110].mxu0 %v106_v32 }
 0x125   :  { %2713 = vmatprep.mubr.msk.f32.mxu0 %vm3874_vm0, %v3875_v1 }
 0x126   :  { %3445 = vtanh.f32 %v276_v34 }
 0x127   :  { %v280_v37 = vpop.f32.mrb[6].mxu0 }
 0x128   :  { %v281_v38 = vadd.f32 %v4108_v24, %v280_v37  ;;  %v2556_v39 = vpop.f32.mrb[7].mxu0  ;;  %2714 = vmatmul.mubr.f32.gmra.mrb[112].mxu0 %v107_v36  ;;  %v3442_v41 = vpop.eup %3441  ;;  %v117_v37 = vld [vmem:[#allocation2 + $0x210] sm:$0xff] }
 0x129   :  { %2716 = vmatprep.mubr.msk.f32.mxu0 %vm3874_vm0, %v3875_v1 }
 0x12a   :  { %3447 = vtanh.f32 %v281_v38 }
 0x12b   :  { %v285_v42 = vpop.f32.mrb[8].mxu0 }
 0x12c   :  { %v3444_v43 = vpop.eup %3443  ;;  %v286_v44 = vadd.f32 %v4108_v24, %v285_v42  ;;  %v2559_v45 = vpop.f32.mrb[9].mxu0  ;;  %2717 = vmatmul.mubr.f32.gmra.mrb[114].mxu0 %v108_v40 }
 0x12d   :  { %v1014_v46 = vadd.f32 %v3444_v43, %v3442_v41  ;;  %2719 = vmatprep.mubr.msk.f32.mxu0 %vm3874_vm0, %v3875_v1  ;;  %v118_v43 = vld [vmem:[#allocation2 + $0x218] sm:$0xff] }
 0x12e   :  { %3449 = vtanh.f32 %v286_v44 }
 0x12f   :  { %v290_v48 = vpop.f32.mrb[10].mxu0 }
 0x130   :  { %v3446_v49 = vpop.eup %3445  ;;  %v291_v50 = vadd.f32 %v4108_v24, %v290_v48  ;;  %v2562_v51 = vpop.f32.mrb[11].mxu0  ;;  %2720 = vmatmul.mubr.f32.gmra.mrb[116].mxu0 %v109_v47 }
 0x131   :  { %v1015_v52 = vadd.f32 %v3446_v49, %v1014_v46  ;;  %2722 = vmatprep.mubr.msk.f32.mxu0 %vm3874_vm0, %v3875_v1  ;;  %v119_v49 = vld [vmem:[#allocation2 + $0x220] sm:$0xff] }
 0x132   :  { %3451 = vtanh.f32 %v291_v50 }
 0x133   :  { %v295_v54 = vpop.f32.mrb[12].mxu0 }
 0x134   :  { %v3448_v55 = vpop.eup %3447  ;;  %v296_v56 = vadd.f32 %v4108_v24, %v295_v54  ;;  %v2565_v57 = vpop.f32.mrb[13].mxu0  ;;  %2723 = vmatmul.mubr.f32.gmra.mrb[118].mxu0 %v110_v53 }
 0x135   :  { %v1016_v58 = vadd.f32 %v3448_v55, %v1015_v52  ;;  %2725 = vmatprep.mubr.msk.f32.mxu0 %vm3874_vm0, %v3875_v1  ;;  %v120_v55 = vld [vmem:[#allocation2 + $0x228] sm:$0xff] }
 0x136   :  { %3453 = vtanh.f32 %v296_v56 }
 0x137   :  { %v300_v60 = vpop.f32.mrb[14].mxu0 }
 0x138   :  { %v3450_v61 = vpop.eup %3449  ;;  %v301_v62 = vadd.f32 %v4108_v24, %v300_v60  ;;  %v2568_v63 = vpop.f32.mrb[15].mxu0  ;;  %2726 = vmatmul.mubr.f32.gmra.mrb[120].mxu0 %v111_v59 }
 0x139   :  { %v1017_v2 = vadd.f32 %v3450_v61, %v1016_v58  ;;  %2728 = vmatprep.mubr.msk.f32.mxu0 %vm3874_vm0, %v3875_v1  ;;  %v121_v61 = vld [vmem:[#allocation2 + $0x230] sm:$0xff] }
 0x13a   :  { %3455 = vtanh.f32 %v301_v62 }
 0x13b   :  { %v305_v4 = vpop.f32.mrb[16].mxu0 }
 0x13c   :  { %v3452_v5 = vpop.eup %3451  ;;  %v306_v6 = vadd.f32 %v4108_v24, %v305_v4  ;;  %v2571_v7 = vpop.f32.mrb[17].mxu0  ;;  %2729 = vmatmul.mubr.f32.gmra.mrb[122].mxu0 %v112_v3 }
 0x13d   :  { %v1018_v8 = vadd.f32 %v3452_v5, %v1017_v2  ;;  %2731 = vmatprep.mubr.msk.f32.mxu0 %vm3874_vm0, %v3875_v1  ;;  %v122_v5 = vld [vmem:[#allocation2 + $0x238] sm:$0xff] }
 0x13e   :  { %3457 = vtanh.f32 %v306_v6 }
 0x13f   :  { %v310_v13 = vpop.f32.mrb[18].mxu0 }
 0x140   :  { %v3454_v14 = vpop.eup %3453  ;;  %v311_v15 = vadd.f32 %v4108_v24, %v310_v13  ;;  %v2574_v16 = vpop.f32.mrb[19].mxu0  ;;  %2732 = vmatmul.mubr.f32.gmra.mrb[124].mxu0 %v113_v9 }
 0x141   :  { %v1019_v17 = vadd.f32 %v3454_v14, %v1018_v8  ;;  %2734 = vmatprep.mubr.msk.f32.mxu0 %vm3874_vm0, %v3875_v1 }
 0x142   :  { %3459 = vtanh.f32 %v311_v15 }
 0x143   :  { %v315_v19 = vpop.f32.mrb[20].mxu0 }
 0x144   :  { %v3456_v20 = vpop.eup %3455  ;;  %v316_v21 = vadd.f32 %v4108_v24, %v315_v19  ;;  %v2577_v22 = vpop.f32.mrb[21].mxu0  ;;  %2735 = vmatmul.mubr.f32.gmra.mrb[126].mxu0 %v114_v18 }
 0x145   :  { %v1020_v23 = vadd.f32 %v3456_v20, %v1019_v17  ;;  %2737 = vmatprep.mubr.msk.f32.mxu0 %vm3874_vm0, %v3875_v1  ;;  %v124_v17 = vld [vmem:[#allocation2 + $0x248] sm:$0xff] }
 0x146   :  { %3461 = vtanh.f32 %v316_v21 }
 0x147   :  { %v320_v26 = vpop.f32.mrb[22].mxu0 }
 0x148   :  { %v3458_v27 = vpop.eup %3457  ;;  %v321_v28 = vadd.f32 %v4108_v24, %v320_v26  ;;  %v2580_v29 = vpop.f32.mrb[23].mxu0  ;;  %2738 = vmatmul.mubr.f32.gmra.mrb[128].mxu0 %v115_v25 }
 0x149   :  { %v1021_v30 = vadd.f32 %v3458_v27, %v1020_v23  ;;  %2740 = vmatprep.mubr.msk.f32.mxu0 %vm3874_vm0, %v3875_v1  ;;  %v125_v23 = vld [vmem:[#allocation2 + $0x250] sm:$0xff] }
 0x14a   :  { %3463 = vtanh.f32 %v321_v28 }
 0x14b   :  { %v325_v32 = vpop.f32.mrb[24].mxu0 }
 0x14c   :  { %v3460_v33 = vpop.eup %3459  ;;  %v326_v34 = vadd.f32 %v4108_v24, %v325_v32  ;;  %v2583_v35 = vpop.f32.mrb[25].mxu0  ;;  %2741 = vmatmul.mubr.f32.gmra.mrb[130].mxu0 %v116_v31 }
 0x14d   :  { %v1022_v36 = vadd.f32 %v3460_v33, %v1021_v30  ;;  %2743 = vmatprep.mubr.msk.f32.mxu0 %vm3874_vm0, %v3875_v1  ;;  %v126_v30 = vld [vmem:[#allocation2 + $0x258] sm:$0xff] }
 0x14e   :  { %3465 = vtanh.f32 %v326_v34 }
 0x14f   :  { %v330_v38 = vpop.f32.mrb[26].mxu0 }
 0x150   :  { %v3462_v39 = vpop.eup %3461  ;;  %v331_v40 = vadd.f32 %v4108_v24, %v330_v38  ;;  %v2586_v41 = vpop.f32.mrb[27].mxu0  ;;  %2744 = vmatmul.mubr.f32.gmra.mrb[132].mxu0 %v117_v37 }
 0x151   :  { %v1023_v42 = vadd.f32 %v3462_v39, %v1022_v36  ;;  %2746 = vmatprep.mubr.msk.f32.mxu0 %vm3874_vm0, %v3875_v1  ;;  %v127_v36 = vld [vmem:[#allocation2 + $0x260] sm:$0xff] }
 0x152   :  { %3467 = vtanh.f32 %v331_v40 }
 0x153   :  { %v335_v44 = vpop.f32.mrb[28].mxu0 }
 0x154   :  { %v3464_v45 = vpop.eup %3463  ;;  %v336_v46 = vadd.f32 %v4108_v24, %v335_v44  ;;  %v2589_v47 = vpop.f32.mrb[29].mxu0  ;;  %2747 = vmatmul.mubr.f32.gmra.mrb[134].mxu0 %v118_v43 }
 0x155   :  { %v1024_v48 = vadd.f32 %v3464_v45, %v1023_v42  ;;  %2749 = vmatprep.mubr.msk.f32.mxu0 %vm3874_vm0, %v3875_v1  ;;  %v128_v42 = vld [vmem:[#allocation2 + $0x268] sm:$0xff] }
 0x156   :  { %3469 = vtanh.f32 %v336_v46 }
 0x157   :  { %v340_v50 = vpop.f32.mrb[30].mxu0 }
 0x158   :  { %v3466_v51 = vpop.eup %3465  ;;  %v341_v52 = vadd.f32 %v4108_v24, %v340_v50  ;;  %v2592_v53 = vpop.f32.mrb[31].mxu0  ;;  %2750 = vmatmul.mubr.f32.gmra.mrb[136].mxu0 %v119_v49  ;;  %v1152_v49 = vld [vmem:[#allocation4 + $0x30] sm:$0xff]  ;;  %v1153_v50 = vld [vmem:[#allocation4 + $0x38] sm:$0xff] }
 0x159   :  { %v1025_v54 = vadd.f32 %v3466_v51, %v1024_v48  ;;  %2752 = vmatprep.mubr.msk.f32.mxu0 %vm3874_vm0, %v3875_v1  ;;  %v129_v48 = vld [vmem:[#allocation2 + $0x270] sm:$0xff]  ;;  %v3396_v51 = vpack.c.bf16 %v1153_v50, %v1152_v49  ;;  %v139_v50 = vld [vmem:[#allocation2 + $0x2c0] sm:$0xff] }
 0x15a   :  { %3471 = vtanh.f32 %v341_v52 }
 0x15b   :  { %v345_v56 = vpop.f32.mrb[32].mxu0  ;;  %3397 = vmatpush3.bf16.msra.mxu0 %v3396_v51 }
 0x15c   :  { %v3468_v57 = vpop.eup %3467  ;;  %v346_v58 = vadd.f32 %v4108_v24, %v345_v56  ;;  %v2595_v59 = vpop.f32.mrb[33].mxu0  ;;  %2753 = vmatmul.mubr.f32.gmra.mrb[138].mxu0 %v120_v55  ;;  %3398 = vmatprep.subr.bf16.mxu0 %v3873_v0 }
 0x15d   :  { %v1026_v60 = vadd.f32 %v3468_v57, %v1025_v54  ;;  %2755 = vmatprep.mubr.msk.f32.mxu0 %vm3874_vm0, %v3875_v1  ;;  %v130_v57 = vld [vmem:[#allocation2 + $0x278] sm:$0xff] }
 0x15e   :  { %3473 = vtanh.f32 %v346_v58 }
 0x15f   :  { %v350_v62 = vpop.f32.mrb[34].mxu0 }
 0x160   :  { %v3470_v63 = vpop.eup %3469  ;;  %v351_v2 = vadd.f32 %v4108_v24, %v350_v62  ;;  %v2598_v3 = vpop.f32.mrb[35].mxu0  ;;  %2756 = vmatmul.mubr.f32.gmra.mrb[140].mxu0 %v121_v61 }
 0x161   :  { %v1027_v4 = vadd.f32 %v3470_v63, %v1026_v60  ;;  %2758 = vmatprep.mubr.msk.f32.mxu0 %vm3874_vm0, %v3875_v1  ;;  %v131_v63 = vld [vmem:[#allocation2 + $0x280] sm:$0xff] }
 0x162   :  { %3475 = vtanh.f32 %v351_v2 }
 0x163   :  { %v355_v6 = vpop.f32.mrb[36].mxu0 }
 0x164   :  { %v3472_v7 = vpop.eup %3471  ;;  %v356_v8 = vadd.f32 %v4108_v24, %v355_v6  ;;  %v2601_v9 = vpop.f32.mrb[37].mxu0  ;;  %2759 = vmatmul.mubr.f32.gmra.mrb[142].mxu0 %v122_v5 }
 0x165   :  { %v1028_v10 = vadd.f32 %v3472_v7, %v1027_v4  ;;  %2761 = vmatprep.mubr.msk.f32.mxu0 %vm3874_vm0, %v3875_v1  ;;  %v132_v7 = vld [vmem:[#allocation2 + $0x288] sm:$0xff] }
 0x166   :  { %3477 = vtanh.f32 %v356_v8 }
 0x167   :  { %v360_v12 = vpop.f32.mrb[38].mxu0 }
 0x168   :  { %v3474_v13 = vpop.eup %3473  ;;  %v361_v14 = vadd.f32 %v4108_v24, %v360_v12  ;;  %v2604_v15 = vpop.f32.mrb[39].mxu0  ;;  %2762 = vmatmul.mubr.f32.gmra.mrb[144].mxu0 %v123_v11 }
 0x169   :  { %v1029_v16 = vadd.f32 %v3474_v13, %v1028_v10  ;;  %2764 = vmatprep.mubr.msk.f32.mxu0 %vm3874_vm0, %v3875_v1  ;;  %v133_v13 = vld [vmem:[#allocation2 + $0x290] sm:$0xff] }
 0x16a   :  { %3479 = vtanh.f32 %v361_v14 }
 0x16b   :  { %v365_v18 = vpop.f32.mrb[40].mxu0 }
 0x16c   :  { %v3476_v19 = vpop.eup %3475  ;;  %v366_v20 = vadd.f32 %v4108_v24, %v365_v18  ;;  %v2607_v21 = vpop.f32.mrb[41].mxu0  ;;  %2765 = vmatmul.mubr.f32.gmra.mrb[146].mxu0 %v124_v17 }
 0x16d   :  { %v1030_v22 = vadd.f32 %v3476_v19, %v1029_v16  ;;  %2767 = vmatprep.mubr.msk.f32.mxu0 %vm3874_vm0, %v3875_v1  ;;  %v134_v19 = vld [vmem:[#allocation2 + $0x298] sm:$0xff] }
 0x16e   :  { %3481 = vtanh.f32 %v366_v20 }
 0x16f   :  { %v370_v25 = vpop.f32.mrb[42].mxu0 }
 0x170   :  { %v3478_v26 = vpop.eup %3477  ;;  %v371_v27 = vadd.f32 %v4108_v24, %v370_v25  ;;  %v2610_v28 = vpop.f32.mrb[43].mxu0  ;;  %2768 = vmatmul.mubr.f32.gmra.mrb[148].mxu0 %v125_v23 }
 0x171   :  { %v1031_v29 = vadd.f32 %v3478_v26, %v1030_v22  ;;  %2770 = vmatprep.mubr.msk.f32.mxu0 %vm3874_vm0, %v3875_v1  ;;  %v135_v26 = vld [vmem:[#allocation2 + $0x2a0] sm:$0xff] }
 0x172   :  { %3483 = vtanh.f32 %v371_v27 }
 0x173   :  { %v375_v31 = vpop.f32.mrb[44].mxu0 }
 0x174   :  { %v3480_v32 = vpop.eup %3479  ;;  %v376_v33 = vadd.f32 %v4108_v24, %v375_v31  ;;  %v2613_v34 = vpop.f32.mrb[45].mxu0  ;;  %2771 = vmatmul.mubr.f32.gmra.mrb[150].mxu0 %v126_v30 }
 0x175   :  { %v1032_v35 = vadd.f32 %v3480_v32, %v1031_v29  ;;  %2773 = vmatprep.mubr.msk.f32.mxu0 %vm3874_vm0, %v3875_v1  ;;  %v136_v32 = vld [vmem:[#allocation2 + $0x2a8] sm:$0xff] }
 0x176   :  { %3485 = vtanh.f32 %v376_v33 }
 0x177   :  { %v380_v37 = vpop.f32.mrb[46].mxu0 }
 0x178   :  { %v3482_v38 = vpop.eup %3481  ;;  %v381_v39 = vadd.f32 %v4108_v24, %v380_v37  ;;  %v2616_v40 = vpop.f32.mrb[47].mxu0  ;;  %2774 = vmatmul.mubr.f32.gmra.mrb[152].mxu0 %v127_v36 }
 0x179   :  { %v1033_v41 = vadd.f32 %v3482_v38, %v1032_v35  ;;  %2776 = vmatprep.mubr.msk.f32.mxu0 %vm3874_vm0, %v3875_v1  ;;  %v137_v38 = vld [vmem:[#allocation2 + $0x2b0] sm:$0xff] }
 0x17a   :  { %3487 = vtanh.f32 %v381_v39 }
 0x17b   :  { %v385_v43 = vpop.f32.mrb[48].mxu0 }
 0x17c   :  { %v3484_v44 = vpop.eup %3483  ;;  %v386_v45 = vadd.f32 %v4108_v24, %v385_v43  ;;  %v2619_v46 = vpop.f32.mrb[49].mxu0  ;;  %2777 = vmatmul.mubr.f32.gmra.mrb[154].mxu0 %v128_v42 }
 0x17d   :  { %v1034_v47 = vadd.f32 %v3484_v44, %v1033_v41  ;;  %2779 = vmatprep.mubr.msk.f32.mxu0 %vm3874_vm0, %v3875_v1  ;;  %v138_v44 = vld [vmem:[#allocation2 + $0x2b8] sm:$0xff] }
 0x17e   :  { %3489 = vtanh.f32 %v386_v45 }
 0x17f   :  { %v390_v52 = vpop.f32.mrb[50].mxu0 }
 0x180   :  { %v3486_v53 = vpop.eup %3485  ;;  %v391_v54 = vadd.f32 %v4108_v24, %v390_v52  ;;  %v2622_v55 = vpop.f32.mrb[51].mxu0  ;;  %2780 = vmatmul.mubr.f32.gmra.mrb[156].mxu0 %v129_v48 }
 0x181   :  { %v1035_v56 = vadd.f32 %v3486_v53, %v1034_v47  ;;  %2782 = vmatprep.mubr.msk.f32.mxu0 %vm3874_vm0, %v3875_v1 }
 0x182   :  { %3491 = vtanh.f32 %v391_v54 }
 0x183   :  { %v395_v58 = vpop.f32.mrb[52].mxu0 }
 0x184   :  { %v3488_v59 = vpop.eup %3487  ;;  %v396_v60 = vadd.f32 %v4108_v24, %v395_v58  ;;  %v2625_v61 = vpop.f32.mrb[53].mxu0  ;;  %2783 = vmatmul.mubr.f32.gmra.mrb[158].mxu0 %v130_v57 }
 0x185   :  { %v1036_v62 = vadd.f32 %v3488_v59, %v1035_v56  ;;  %2785 = vmatprep.mubr.msk.f32.mxu0 %vm3874_vm0, %v3875_v1  ;;  %v140_v56 = vld [vmem:[#allocation2 + $0x2c8] sm:$0xff] }
 0x186   :  { %3493 = vtanh.f32 %v396_v60 }
 0x187   :  { %v400_v2 = vpop.f32.mrb[54].mxu0 }
 0x188   :  { %v3490_v3 = vpop.eup %3489  ;;  %v401_v4 = vadd.f32 %v4108_v24, %v400_v2  ;;  %v2628_v5 = vpop.f32.mrb[55].mxu0  ;;  %2786 = vmatmul.mubr.f32.gmra.mrb[160].mxu0 %v131_v63 }
 0x189   :  { %v1037_v6 = vadd.f32 %v3490_v3, %v1036_v62  ;;  %2788 = vmatprep.mubr.msk.f32.mxu0 %vm3874_vm0, %v3875_v1  ;;  %v141_v62 = vld [vmem:[#allocation2 + $0x2d0] sm:$0xff] }
 0x18a   :  { %3495 = vtanh.f32 %v401_v4 }
 0x18b   :  { %v405_v8 = vpop.f32.mrb[56].mxu0 }
 0x18c   :  { %v3492_v9 = vpop.eup %3491  ;;  %v406_v10 = vadd.f32 %v4108_v24, %v405_v8  ;;  %v2631_v11 = vpop.f32.mrb[57].mxu0  ;;  %2789 = vmatmul.mubr.f32.gmra.mrb[162].mxu0 %v132_v7 }
 0x18d   :  { %v1038_v12 = vadd.f32 %v3492_v9, %v1037_v6  ;;  %2791 = vmatprep.mubr.msk.f32.mxu0 %vm3874_vm0, %v3875_v1  ;;  %v142_v6 = vld [vmem:[#allocation2 + $0x2d8] sm:$0xff] }
 0x18e   :  { %3497 = vtanh.f32 %v406_v10 }
 0x18f   :  { %v410_v14 = vpop.f32.mrb[58].mxu0 }
 0x190   :  { %v3494_v15 = vpop.eup %3493  ;;  %v411_v16 = vadd.f32 %v4108_v24, %v410_v14  ;;  %v2634_v17 = vpop.f32.mrb[59].mxu0  ;;  %2792 = vmatmul.mubr.f32.gmra.mrb[164].mxu0 %v133_v13 }
 0x191   :  { %v1039_v18 = vadd.f32 %v3494_v15, %v1038_v12  ;;  %2794 = vmatprep.mubr.msk.f32.mxu0 %vm3874_vm0, %v3875_v1  ;;  %v143_v12 = vld [vmem:[#allocation2 + $0x2e0] sm:$0xff] }
 0x192   :  { %3499 = vtanh.f32 %v411_v16 }
 0x193   :  { %v415_v20 = vpop.f32.mrb[60].mxu0 }
 0x194   :  { %v3496_v21 = vpop.eup %3495  ;;  %v416_v22 = vadd.f32 %v4108_v24, %v415_v20  ;;  %v2637_v23 = vpop.f32.mrb[61].mxu0  ;;  %2795 = vmatmul.mubr.f32.gmra.mrb[166].mxu0 %v134_v19 }
 0x195   :  { %v1040_v25 = vadd.f32 %v3496_v21, %v1039_v18  ;;  %2797 = vmatprep.mubr.msk.f32.mxu0 %vm3874_vm0, %v3875_v1  ;;  %v144_v18 = vld [vmem:[#allocation2 + $0x2e8] sm:$0xff] }
 0x196   :  { %3501 = vtanh.f32 %v416_v22 }
 0x197   :  { %v420_v27 = vpop.f32.mrb[62].mxu0 }
 0x198   :  { %v3498_v28 = vpop.eup %3497  ;;  %v421_v29 = vadd.f32 %v4108_v24, %v420_v27  ;;  %v2640_v30 = vpop.f32.mrb[63].mxu0  ;;  %2798 = vmatmul.mubr.f32.gmra.mrb[168].mxu0 %v135_v26  ;;  %v1154_v26 = vld [vmem:[#allocation4 + $0x40] sm:$0xff]  ;;  %v1155_v27 = vld [vmem:[#allocation4 + $0x48] sm:$0xff] }
 0x199   :  { %v1041_v31 = vadd.f32 %v3498_v28, %v1040_v25  ;;  %2800 = vmatprep.mubr.msk.f32.mxu0 %vm3874_vm0, %v3875_v1  ;;  %v145_v25 = vld [vmem:[#allocation2 + $0x2f0] sm:$0xff]  ;;  %v3399_v28 = vpack.c.bf16 %v1155_v27, %v1154_v26  ;;  %v155_v27 = vld [vmem:[#allocation2 + $0x340] sm:$0xff] }
 0x19a   :  { %3503 = vtanh.f32 %v421_v29 }
 0x19b   :  { %v425_v33 = vpop.f32.mrb[64].mxu0  ;;  %3400 = vmatpush3.bf16.msra.mxu0 %v3399_v28 }
 0x19c   :  { %v3500_v34 = vpop.eup %3499  ;;  %v426_v35 = vadd.f32 %v4108_v24, %v425_v33  ;;  %v2643_v36 = vpop.f32.mrb[65].mxu0  ;;  %2801 = vmatmul.mubr.f32.gmra.mrb[170].mxu0 %v136_v32  ;;  %3401 = vmatprep.subr.bf16.mxu0 %v3873_v0 }
 0x19d   :  { %v1042_v37 = vadd.f32 %v3500_v34, %v1041_v31  ;;  %2803 = vmatprep.mubr.msk.f32.mxu0 %vm3874_vm0, %v3875_v1  ;;  %v146_v34 = vld [vmem:[#allocation2 + $0x2f8] sm:$0xff] }
 0x19e   :  { %3505 = vtanh.f32 %v426_v35 }
 0x19f   :  { %v430_v39 = vpop.f32.mrb[66].mxu0 }
 0x1a0   :  { %v3502_v40 = vpop.eup %3501  ;;  %v431_v41 = vadd.f32 %v4108_v24, %v430_v39  ;;  %v2646_v42 = vpop.f32.mrb[67].mxu0  ;;  %2804 = vmatmul.mubr.f32.gmra.mrb[172].mxu0 %v137_v38 }
 0x1a1   :  { %v1043_v43 = vadd.f32 %v3502_v40, %v1042_v37  ;;  %2806 = vmatprep.mubr.msk.f32.mxu0 %vm3874_vm0, %v3875_v1  ;;  %v147_v40 = vld [vmem:[#allocation2 + $0x300] sm:$0xff] }
 0x1a2   :  { %3507 = vtanh.f32 %v431_v41 }
 0x1a3   :  { %v435_v45 = vpop.f32.mrb[68].mxu0 }
 0x1a4   :  { %v3504_v46 = vpop.eup %3503  ;;  %v436_v47 = vadd.f32 %v4108_v24, %v435_v45  ;;  %v2649_v48 = vpop.f32.mrb[69].mxu0  ;;  %2807 = vmatmul.mubr.f32.gmra.mrb[174].mxu0 %v138_v44 }
 0x1a5   :  { %v1044_v49 = vadd.f32 %v3504_v46, %v1043_v43  ;;  %2809 = vmatprep.mubr.msk.f32.mxu0 %vm3874_vm0, %v3875_v1  ;;  %v148_v46 = vld [vmem:[#allocation2 + $0x308] sm:$0xff] }
 0x1a6   :  { %3509 = vtanh.f32 %v436_v47 }
 0x1a7   :  { %v440_v51 = vpop.f32.mrb[70].mxu0 }
 0x1a8   :  { %v3506_v52 = vpop.eup %3505  ;;  %v441_v53 = vadd.f32 %v4108_v24, %v440_v51  ;;  %v2652_v54 = vpop.f32.mrb[71].mxu0  ;;  %2810 = vmatmul.mubr.f32.gmra.mrb[176].mxu0 %v139_v50 }
 0x1a9   :  { %v1045_v55 = vadd.f32 %v3506_v52, %v1044_v49  ;;  %2812 = vmatprep.mubr.msk.f32.mxu0 %vm3874_vm0, %v3875_v1  ;;  %v149_v52 = vld [vmem:[#allocation2 + $0x310] sm:$0xff] }
 0x1aa   :  { %3511 = vtanh.f32 %v441_v53 }
 0x1ab   :  { %v445_v57 = vpop.f32.mrb[72].mxu0 }
 0x1ac   :  { %v3508_v58 = vpop.eup %3507  ;;  %v446_v59 = vadd.f32 %v4108_v24, %v445_v57  ;;  %v2655_v60 = vpop.f32.mrb[73].mxu0  ;;  %2813 = vmatmul.mubr.f32.gmra.mrb[178].mxu0 %v140_v56 }
 0x1ad   :  { %v1046_v61 = vadd.f32 %v3508_v58, %v1045_v55  ;;  %2815 = vmatprep.mubr.msk.f32.mxu0 %vm3874_vm0, %v3875_v1  ;;  %v150_v58 = vld [vmem:[#allocation2 + $0x318] sm:$0xff] }
 0x1ae   :  { %3513 = vtanh.f32 %v446_v59 }
 0x1af   :  { %v450_v63 = vpop.f32.mrb[74].mxu0 }
 0x1b0   :  { %v3510_v2 = vpop.eup %3509  ;;  %v451_v3 = vadd.f32 %v4108_v24, %v450_v63  ;;  %v2658_v4 = vpop.f32.mrb[75].mxu0  ;;  %2816 = vmatmul.mubr.f32.gmra.mrb[180].mxu0 %v141_v62 }
 0x1b1   :  { %v1047_v5 = vadd.f32 %v3510_v2, %v1046_v61  ;;  %2818 = vmatprep.mubr.msk.f32.mxu0 %vm3874_vm0, %v3875_v1  ;;  %v151_v2 = vld [vmem:[#allocation2 + $0x320] sm:$0xff] }
 0x1b2   :  { %3515 = vtanh.f32 %v451_v3 }
 0x1b3   :  { %v455_v7 = vpop.f32.mrb[76].mxu0 }
 0x1b4   :  { %v3512_v8 = vpop.eup %3511  ;;  %v456_v9 = vadd.f32 %v4108_v24, %v455_v7  ;;  %v2661_v10 = vpop.f32.mrb[77].mxu0  ;;  %2819 = vmatmul.mubr.f32.gmra.mrb[182].mxu0 %v142_v6 }
 0x1b5   :  { %v1048_v11 = vadd.f32 %v3512_v8, %v1047_v5  ;;  %2821 = vmatprep.mubr.msk.f32.mxu0 %vm3874_vm0, %v3875_v1  ;;  %v152_v8 = vld [vmem:[#allocation2 + $0x328] sm:$0xff] }
 0x1b6   :  { %3517 = vtanh.f32 %v456_v9 }
 0x1b7   :  { %v460_v13 = vpop.f32.mrb[78].mxu0 }
 0x1b8   :  { %v3514_v14 = vpop.eup %3513  ;;  %v461_v15 = vadd.f32 %v4108_v24, %v460_v13  ;;  %v2664_v16 = vpop.f32.mrb[79].mxu0  ;;  %2822 = vmatmul.mubr.f32.gmra.mrb[184].mxu0 %v143_v12 }
 0x1b9   :  { %v1049_v17 = vadd.f32 %v3514_v14, %v1048_v11  ;;  %2824 = vmatprep.mubr.msk.f32.mxu0 %vm3874_vm0, %v3875_v1  ;;  %v153_v14 = vld [vmem:[#allocation2 + $0x330] sm:$0xff] }
 0x1ba   :  { %3519 = vtanh.f32 %v461_v15 }
 0x1bb   :  { %v465_v19 = vpop.f32.mrb[80].mxu0 }
 0x1bc   :  { %v3516_v20 = vpop.eup %3515  ;;  %v466_v21 = vadd.f32 %v4108_v24, %v465_v19  ;;  %v2667_v22 = vpop.f32.mrb[81].mxu0  ;;  %2825 = vmatmul.mubr.f32.gmra.mrb[186].mxu0 %v144_v18 }
 0x1bd   :  { %v1050_v23 = vadd.f32 %v3516_v20, %v1049_v17  ;;  %2827 = vmatprep.mubr.msk.f32.mxu0 %vm3874_vm0, %v3875_v1  ;;  %v154_v20 = vld [vmem:[#allocation2 + $0x338] sm:$0xff] }
 0x1be   :  { %3521 = vtanh.f32 %v466_v21 }
 0x1bf   :  { %v470_v29 = vpop.f32.mrb[82].mxu0 }
 0x1c0   :  { %v3518_v30 = vpop.eup %3517  ;;  %v471_v31 = vadd.f32 %v4108_v24, %v470_v29  ;;  %v2670_v32 = vpop.f32.mrb[83].mxu0  ;;  %2828 = vmatmul.mubr.f32.gmra.mrb[188].mxu0 %v145_v25 }
 0x1c1   :  { %v1051_v33 = vadd.f32 %v3518_v30, %v1050_v23  ;;  %2830 = vmatprep.mubr.msk.f32.mxu0 %vm3874_vm0, %v3875_v1 }
 0x1c2   :  { %3523 = vtanh.f32 %v471_v31 }
 0x1c3   :  { %v475_v35 = vpop.f32.mrb[84].mxu0 }
 0x1c4   :  { %v3520_v36 = vpop.eup %3519  ;;  %v476_v37 = vadd.f32 %v4108_v24, %v475_v35  ;;  %v2673_v38 = vpop.f32.mrb[85].mxu0  ;;  %2831 = vmatmul.mubr.f32.gmra.mrb[190].mxu0 %v146_v34 }
 0x1c5   :  { %v1052_v39 = vadd.f32 %v3520_v36, %v1051_v33  ;;  %2833 = vmatprep.mubr.msk.f32.mxu0 %vm3874_vm0, %v3875_v1  ;;  %v156_v33 = vld [vmem:[#allocation2 + $0x348] sm:$0xff] }
 0x1c6   :  { %3525 = vtanh.f32 %v476_v37 }
 0x1c7   :  { %v480_v41 = vpop.f32.mrb[86].mxu0 }
 0x1c8   :  { %v3522_v42 = vpop.eup %3521  ;;  %v481_v43 = vadd.f32 %v4108_v24, %v480_v41  ;;  %v2676_v44 = vpop.f32.mrb[87].mxu0  ;;  %2834 = vmatmul.mubr.f32.gmra.mrb[192].mxu0 %v147_v40 }
 0x1c9   :  { %v1053_v45 = vadd.f32 %v3522_v42, %v1052_v39  ;;  %2836 = vmatprep.mubr.msk.f32.mxu0 %vm3874_vm0, %v3875_v1  ;;  %v157_v39 = vld [vmem:[#allocation2 + $0x350] sm:$0xff] }
 0x1ca   :  { %3527 = vtanh.f32 %v481_v43 }
 0x1cb   :  { %v485_v47 = vpop.f32.mrb[88].mxu0 }
 0x1cc   :  { %v3524_v48 = vpop.eup %3523  ;;  %v486_v49 = vadd.f32 %v4108_v24, %v485_v47  ;;  %v2679_v50 = vpop.f32.mrb[89].mxu0  ;;  %2837 = vmatmul.mubr.f32.gmra.mrb[194].mxu0 %v148_v46 }
 0x1cd   :  { %v1054_v51 = vadd.f32 %v3524_v48, %v1053_v45  ;;  %2839 = vmatprep.mubr.msk.f32.mxu0 %vm3874_vm0, %v3875_v1  ;;  %v158_v45 = vld [vmem:[#allocation2 + $0x358] sm:$0xff] }
 0x1ce   :  { %3529 = vtanh.f32 %v486_v49 }
 0x1cf   :  { %v490_v53 = vpop.f32.mrb[90].mxu0 }
 0x1d0   :  { %v3526_v54 = vpop.eup %3525  ;;  %v491_v55 = vadd.f32 %v4108_v24, %v490_v53  ;;  %v2682_v56 = vpop.f32.mrb[91].mxu0  ;;  %2840 = vmatmul.mubr.f32.gmra.mrb[196].mxu0 %v149_v52 }
 0x1d1   :  { %v1055_v57 = vadd.f32 %v3526_v54, %v1054_v51  ;;  %2842 = vmatprep.mubr.msk.f32.mxu0 %vm3874_vm0, %v3875_v1  ;;  %v159_v51 = vld [vmem:[#allocation2 + $0x360] sm:$0xff] }
 0x1d2   :  { %3531 = vtanh.f32 %v491_v55 }
 0x1d3   :  { %v495_v59 = vpop.f32.mrb[92].mxu0 }
 0x1d4   :  { %v3528_v60 = vpop.eup %3527  ;;  %v496_v61 = vadd.f32 %v4108_v24, %v495_v59  ;;  %v2685_v62 = vpop.f32.mrb[93].mxu0  ;;  %2843 = vmatmul.mubr.f32.gmra.mrb[198].mxu0 %v150_v58  ;;  %v1156_v58 = vld [vmem:[#allocation4 + $0x50] sm:$0xff]  ;;  %v1157_v59 = vld [vmem:[#allocation4 + $0x58] sm:$0xff] }
 0x1d5   :  { %v1056_v63 = vadd.f32 %v3528_v60, %v1055_v57  ;;  %2845 = vmatprep.mubr.msk.f32.mxu0 %vm3874_vm0, %v3875_v1  ;;  %v160_v57 = vld [vmem:[#allocation2 + $0x368] sm:$0xff]  ;;  %v3402_v60 = vpack.c.bf16 %v1157_v59, %v1156_v58  ;;  %v170_v59 = vld [vmem:[#allocation2 + $0x3b8] sm:$0xff] }
 0x1d6   :  { %3533 = vtanh.f32 %v496_v61 }
 0x1d7   :  { %v500_v3 = vpop.f32.mrb[94].mxu0  ;;  %3403 = vmatpush3.bf16.msra.mxu0 %v3402_v60 }
 0x1d8   :  { %v3530_v4 = vpop.eup %3529  ;;  %v501_v5 = vadd.f32 %v4108_v24, %v500_v3  ;;  %v2688_v6 = vpop.f32.mrb[95].mxu0  ;;  %2846 = vmatmul.mubr.f32.gmra.mrb[200].mxu0 %v151_v2  ;;  %3404 = vmatprep.subr.bf16.mxu0 %v3873_v0 }
 0x1d9   :  { %v1057_v7 = vadd.f32 %v3530_v4, %v1056_v63  ;;  %2848 = vmatprep.mubr.msk.f32.mxu0 %vm3874_vm0, %v3875_v1  ;;  %v4284_v63 = vld [vmem:[%s5326_s2] ss:$0 sm:$0xff]  ;;  %v161_v4 = vld [vmem:[#allocation2 + $0x370] sm:$0xff] }
 0x1da   :  { %3535 = vtanh.f32 %v501_v5 }
 0x1db   :  { %v505_v9 = vpop.f32.mrb[96].mxu0 }
 0x1dc   :  { %v3532_v10 = vpop.eup %3531  ;;  %v506_v11 = vadd.f32 %v4108_v24, %v505_v9  ;;  %v2691_v12 = vpop.f32.mrb[97].mxu0  ;;  %2849 = vmatmul.mubr.f32.gmra.mrb[202].mxu0 %v152_v8 }
 0x1dd   :  { %v1058_v13 = vadd.f32 %v3532_v10, %v1057_v7  ;;  %2851 = vmatprep.mubr.msk.f32.mxu0 %vm3874_vm0, %v3875_v1  ;;  %v162_v10 = vld [vmem:[#allocation2 + $0x378] sm:$0xff] }
 0x1de   :  { %3537 = vtanh.f32 %v506_v11 }
 0x1df   :  { %v510_v15 = vpop.f32.mrb[98].mxu0 }
 0x1e0   :  { %v3534_v16 = vpop.eup %3533  ;;  %v511_v17 = vadd.f32 %v4108_v24, %v510_v15  ;;  %v2694_v18 = vpop.f32.mrb[99].mxu0  ;;  %2852 = vmatmul.mubr.f32.gmra.mrb[204].mxu0 %v153_v14 }
 0x1e1   :  { %v1059_v19 = vadd.f32 %v3534_v16, %v1058_v13  ;;  %2854 = vmatprep.mubr.msk.f32.mxu0 %vm3874_vm0, %v3875_v1  ;;  %v163_v16 = vld [vmem:[#allocation2 + $0x380] sm:$0xff] }
 0x1e2   :  { %3539 = vtanh.f32 %v511_v17 }
 0x1e3   :  { %v515_v21 = vpop.f32.mrb[100].mxu0 }
 0x1e4   :  { %v3536_v22 = vpop.eup %3535  ;;  %v516_v23 = vadd.f32 %v4108_v24, %v515_v21  ;;  %v2697_v25 = vpop.f32.mrb[101].mxu0  ;;  %2855 = vmatmul.mubr.f32.gmra.mrb[206].mxu0 %v154_v20 }
 0x1e5   :  { %v1060_v26 = vadd.f32 %v3536_v22, %v1059_v19  ;;  %2857 = vmatprep.mubr.msk.f32.mxu0 %vm3874_vm0, %v3875_v1  ;;  %v164_v22 = vld [vmem:[#allocation2 + $0x388] sm:$0xff] }
 0x1e6   :  { %3541 = vtanh.f32 %v516_v23 }
 0x1e7   :  { %v520_v28 = vpop.f32.mrb[102].mxu0 }
 0x1e8   :  { %v3538_v29 = vpop.eup %3537  ;;  %v521_v30 = vadd.f32 %v4108_v24, %v520_v28  ;;  %v2700_v31 = vpop.f32.mrb[103].mxu0  ;;  %2858 = vmatmul.mubr.f32.gmra.mrb[208].mxu0 %v155_v27 }
 0x1e9   :  { %v1061_v32 = vadd.f32 %v3538_v29, %v1060_v26  ;;  %2860 = vmatprep.mubr.msk.f32.mxu0 %vm3874_vm0, %v3875_v1  ;;  %v165_v29 = vld [vmem:[#allocation2 + $0x390] sm:$0xff] }
 0x1ea   :  { %3543 = vtanh.f32 %v521_v30 }
 0x1eb   :  { %v525_v34 = vpop.f32.mrb[104].mxu0 }
 0x1ec   :  { %v3540_v35 = vpop.eup %3539  ;;  %v526_v36 = vadd.f32 %v4108_v24, %v525_v34  ;;  %v2703_v37 = vpop.f32.mrb[105].mxu0  ;;  %2861 = vmatmul.mubr.f32.gmra.mrb[210].mxu0 %v156_v33 }
 0x1ed   :  { %v1062_v38 = vadd.f32 %v3540_v35, %v1061_v32  ;;  %2863 = vmatprep.mubr.msk.f32.mxu0 %vm3874_vm0, %v3875_v1  ;;  %v166_v35 = vld [vmem:[#allocation2 + $0x398] sm:$0xff] }
 0x1ee   :  { %3545 = vtanh.f32 %v526_v36 }
 0x1ef   :  { %v530_v40 = vpop.f32.mrb[106].mxu0 }
 0x1f0   :  { %v3542_v41 = vpop.eup %3541  ;;  %v531_v42 = vadd.f32 %v4108_v24, %v530_v40  ;;  %v2706_v43 = vpop.f32.mrb[107].mxu0  ;;  %2864 = vmatmul.mubr.f32.gmra.mrb[212].mxu0 %v157_v39 }
 0x1f1   :  { %v1063_v44 = vadd.f32 %v3542_v41, %v1062_v38  ;;  %2866 = vmatprep.mubr.msk.f32.mxu0 %vm3874_vm0, %v3875_v1  ;;  %v167_v41 = vld [vmem:[#allocation2 + $0x3a0] sm:$0xff] }
 0x1f2   :  { %3547 = vtanh.f32 %v531_v42 }
 0x1f3   :  { %v535_v46 = vpop.f32.mrb[108].mxu0 }
 0x1f4   :  { %v3544_v47 = vpop.eup %3543  ;;  %v536_v48 = vadd.f32 %v4108_v24, %v535_v46  ;;  %v2709_v49 = vpop.f32.mrb[109].mxu0  ;;  %2867 = vmatmul.mubr.f32.gmra.mrb[214].mxu0 %v158_v45 }
 0x1f5   :  { %v1064_v50 = vadd.f32 %v3544_v47, %v1063_v44  ;;  %2869 = vmatprep.mubr.msk.f32.mxu0 %vm3874_vm0, %v3875_v1  ;;  %v168_v47 = vld [vmem:[#allocation2 + $0x3a8] sm:$0xff] }
 0x1f6   :  { %3549 = vtanh.f32 %v536_v48 }
 0x1f7   :  { %v540_v52 = vpop.f32.mrb[110].mxu0 }
 0x1f8   :  { %v3546_v53 = vpop.eup %3545  ;;  %v541_v54 = vadd.f32 %v4108_v24, %v540_v52  ;;  %v2712_v55 = vpop.f32.mrb[111].mxu0  ;;  %2870 = vmatmul.mubr.f32.gmra.mrb[216].mxu0 %v159_v51 }
 0x1f9   :  { %v1065_v56 = vadd.f32 %v3546_v53, %v1064_v50  ;;  %2872 = vmatprep.mubr.msk.f32.mxu0 %vm3874_vm0, %v3875_v1  ;;  %v169_v53 = vld [vmem:[#allocation2 + $0x3b0] sm:$0xff] }
 0x1fa   :  { %3551 = vtanh.f32 %v541_v54 }
 0x1fb   :  { %v545_v61 = vpop.f32.mrb[112].mxu0 }
 0x1fc   :  { %v3548_v62 = vpop.eup %3547  ;;  %v546_v24 = vadd.f32 %v4284_v63, %v545_v61  ;;  %v2715_v2 = vpop.f32.mrb[113].mxu0  ;;  %2873 = vmatmul.mubr.f32.gmra.mrb[218].mxu0 %v160_v57 }
 0x1fd   :  { %v1066_v3 = vadd.f32 %v3548_v62, %v1065_v56  ;;  %2875 = vmatprep.mubr.msk.f32.mxu0 %vm3874_vm0, %v3875_v1 }
 0x1fe   :  { %3553 = vtanh.f32 %v546_v24 }
 0x1ff   :  { %v550_v5 = vpop.f32.mrb[114].mxu0 }
 0x200   :  { %v3550_v6 = vpop.eup %3549  ;;  %v551_v7 = vadd.f32 %v4284_v63, %v550_v5  ;;  %v2718_v8 = vpop.f32.mrb[115].mxu0  ;;  %2876 = vmatmul.mubr.f32.gmra.mrb[220].mxu0 %v161_v4 }
 0x201   :  { %v1067_v9 = vadd.f32 %v3550_v6, %v1066_v3  ;;  %2878 = vmatprep.mubr.msk.f32.mxu0 %vm3874_vm0, %v3875_v1  ;;  %v171_v3 = vld [vmem:[#allocation2 + $0x3c0] sm:$0xff] }
 0x202   :  { %3555 = vtanh.f32 %v551_v7 }
 0x203   :  { %v555_v11 = vpop.f32.mrb[116].mxu0 }
 0x204   :  { %v3552_v12 = vpop.eup %3551  ;;  %v556_v13 = vadd.f32 %v4284_v63, %v555_v11  ;;  %v2721_v14 = vpop.f32.mrb[117].mxu0  ;;  %2879 = vmatmul.mubr.f32.gmra.mrb[222].mxu0 %v162_v10 }
 0x205   :  { %v1068_v15 = vadd.f32 %v3552_v12, %v1067_v9  ;;  %2881 = vmatprep.mubr.msk.f32.mxu0 %vm3874_vm0, %v3875_v1  ;;  %v172_v9 = vld [vmem:[#allocation2 + $0x3c8] sm:$0xff] }
 0x206   :  { %3557 = vtanh.f32 %v556_v13 }
 0x207   :  { %v560_v17 = vpop.f32.mrb[118].mxu0 }
 0x208   :  { %v3554_v18 = vpop.eup %3553  ;;  %v561_v19 = vadd.f32 %v4284_v63, %v560_v17  ;;  %v2724_v20 = vpop.f32.mrb[119].mxu0  ;;  %2882 = vmatmul.mubr.f32.gmra.mrb[224].mxu0 %v163_v16 }
 0x209   :  { %v1069_v21 = vadd.f32 %v3554_v18, %v1068_v15  ;;  %2884 = vmatprep.mubr.msk.f32.mxu0 %vm3874_vm0, %v3875_v1  ;;  %v173_v15 = vld [vmem:[#allocation2 + $0x3d0] sm:$0xff] }
 0x20a   :  { %3559 = vtanh.f32 %v561_v19 }
 0x20b   :  { %v565_v23 = vpop.f32.mrb[120].mxu0 }
 0x20c   :  { %v3556_v25 = vpop.eup %3555  ;;  %v566_v26 = vadd.f32 %v4284_v63, %v565_v23  ;;  %v2727_v27 = vpop.f32.mrb[121].mxu0  ;;  %2885 = vmatmul.mubr.f32.gmra.mrb[226].mxu0 %v164_v22 }
 0x20d   :  { %v1070_v28 = vadd.f32 %v3556_v25, %v1069_v21  ;;  %2887 = vmatprep.mubr.msk.f32.mxu0 %vm3874_vm0, %v3875_v1  ;;  %v174_v21 = vld [vmem:[#allocation2 + $0x3d8] sm:$0xff] }
 0x20e   :  { %3561 = vtanh.f32 %v566_v26 }
 0x20f   :  { %v570_v30 = vpop.f32.mrb[122].mxu0 }
 0x210   :  { %v3558_v31 = vpop.eup %3557  ;;  %v571_v32 = vadd.f32 %v4284_v63, %v570_v30  ;;  %v2730_v33 = vpop.f32.mrb[123].mxu0  ;;  %2888 = vmatmul.mubr.f32.gmra.mrb[228].mxu0 %v165_v29 }
 0x211   :  { %v1071_v34 = vadd.f32 %v3558_v31, %v1070_v28  ;;  %2890 = vmatprep.mubr.msk.f32.mxu0 %vm3874_vm0, %v3875_v1  ;;  %v175_v28 = vld [vmem:[#allocation2 + $0x3e0] sm:$0xff] }
 0x212   :  { %3563 = vtanh.f32 %v571_v32 }
 0x213   :  { %v575_v36 = vpop.f32.mrb[124].mxu0 }
 0x214   :  { %v3560_v37 = vpop.eup %3559  ;;  %v576_v38 = vadd.f32 %v4284_v63, %v575_v36  ;;  %v2733_v39 = vpop.f32.mrb[125].mxu0  ;;  %2891 = vmatmul.mubr.f32.gmra.mrb[230].mxu0 %v166_v35  ;;  %v1159_v35 = vld [vmem:[#allocation4 + $0x68] sm:$0xff] }
 0x215   :  { %v1072_v40 = vadd.f32 %v3560_v37, %v1071_v34  ;;  %2893 = vmatprep.mubr.msk.f32.mxu0 %vm3874_vm0, %v3875_v1  ;;  %v1158_v34 = vld [vmem:[#allocation4 + $0x60] sm:$0xff] }
 0x216   :  { %3565 = vtanh.f32 %v576_v38  ;;  %v3405_v36 = vpack.c.bf16 %v1159_v35, %v1158_v34 }
 0x217   :  { %v580_v42 = vpop.f32.mrb[126].mxu0 }
 0x218   :  { %v3562_v43 = vpop.eup %3561  ;;  %v581_v44 = vadd.f32 %v4284_v63, %v580_v42  ;;  %v2736_v45 = vpop.f32.mrb[127].mxu0  ;;  %2894 = vmatmul.mubr.f32.gmra.mrb[232].mxu0 %v167_v41 }
 0x219   :  { %v1073_v46 = vadd.f32 %v3562_v43, %v1072_v40  ;;  %2896 = vmatprep.mubr.msk.f32.mxu0 %vm3874_vm0, %v3875_v1  ;;  %3406 = vmatpush3.bf16.msra.mxu0 %v3405_v36 }
 0x21a   :  { %3567 = vtanh.f32 %v581_v44  ;;  %3407 = vmatprep.subr.bf16.mxu0 %v3873_v0 }
 0x21b   :  { %v585_v48 = vpop.f32.mrb[128].mxu0 }
 0x21c   :  { %v3564_v49 = vpop.eup %3563  ;;  %v586_v50 = vadd.f32 %v4284_v63, %v585_v48  ;;  %v2739_v51 = vpop.f32.mrb[129].mxu0  ;;  %2897 = vmatmul.mubr.f32.gmra.mrb[234].mxu0 %v168_v47 }
 0x21d   :  { %v1074_v52 = vadd.f32 %v3564_v49, %v1073_v46  ;;  %2899 = vmatprep.mubr.msk.f32.mxu0 %vm3874_vm0, %v3875_v1 }
 0x21e   :  { %3569 = vtanh.f32 %v586_v50 }
 0x21f   :  { %v590_v54 = vpop.f32.mrb[130].mxu0 }
 0x220   :  { %v3566_v55 = vpop.eup %3565  ;;  %v591_v56 = vadd.f32 %v4284_v63, %v590_v54  ;;  %v2742_v57 = vpop.f32.mrb[131].mxu0  ;;  %2900 = vmatmul.mubr.f32.gmra.mrb[236].mxu0 %v169_v53 }
 0x221   :  { %v1075_v58 = vadd.f32 %v3566_v55, %v1074_v52  ;;  %2902 = vmatprep.mubr.msk.f32.mxu0 %vm3874_vm0, %v3875_v1 }
 0x222   :  { %3571 = vtanh.f32 %v591_v56 }
 0x223   :  { %v595_v60 = vpop.f32.mrb[132].mxu0 }
 0x224   :  { %v3568_v61 = vpop.eup %3567  ;;  %v596_v62 = vadd.f32 %v4284_v63, %v595_v60  ;;  %v2745_v24 = vpop.f32.mrb[133].mxu0  ;;  %2903 = vmatmul.mubr.f32.gmra.mrb[238].mxu0 %v170_v59 }
 0x225   :  { %v1076_v2 = vadd.f32 %v3568_v61, %v1075_v58  ;;  %2905 = vmatprep.mubr.msk.f32.mxu0 %vm3874_vm0, %v3875_v1 }
 0x226   :  { %3573 = vtanh.f32 %v596_v62 }
 0x227   :  { %v600_v4 = vpop.f32.mrb[134].mxu0 }
 0x228   :  { %v3570_v5 = vpop.eup %3569  ;;  %v601_v6 = vadd.f32 %v4284_v63, %v600_v4  ;;  %v2748_v7 = vpop.f32.mrb[135].mxu0  ;;  %2906 = vmatmul.mubr.f32.gmra.mrb[240].mxu0 %v171_v3 }
 0x229   :  { %v1077_v8 = vadd.f32 %v3570_v5, %v1076_v2  ;;  %2908 = vmatprep.mubr.msk.f32.mxu0 %vm3874_vm0, %v3875_v1 }
 0x22a   :  { %3575 = vtanh.f32 %v601_v6 }
 0x22b   :  { %v605_v10 = vpop.f32.mrb[136].mxu0 }
 0x22c   :  { %v3572_v11 = vpop.eup %3571  ;;  %v606_v12 = vadd.f32 %v4284_v63, %v605_v10  ;;  %v2751_v13 = vpop.f32.mrb[137].mxu0  ;;  %2909 = vmatmul.mubr.f32.gmra.mrb[242].mxu0 %v172_v9 }
 0x22d   :  { %v1078_v14 = vadd.f32 %v3572_v11, %v1077_v8  ;;  %2911 = vmatprep.mubr.msk.f32.mxu0 %vm3874_vm0, %v3875_v1 }
 0x22e   :  { %3577 = vtanh.f32 %v606_v12 }
 0x22f   :  { %v610_v16 = vpop.f32.mrb[138].mxu0 }
 0x230   :  { %v3574_v17 = vpop.eup %3573  ;;  %v611_v18 = vadd.f32 %v4284_v63, %v610_v16  ;;  %v2754_v19 = vpop.f32.mrb[139].mxu0  ;;  %2912 = vmatmul.mubr.f32.gmra.mrb[244].mxu0 %v173_v15 }
 0x231   :  { %v1079_v20 = vadd.f32 %v3574_v17, %v1078_v14  ;;  %2914 = vmatprep.mubr.msk.f32.mxu0 %vm3874_vm0, %v3875_v1 }
 0x232   :  { %3579 = vtanh.f32 %v611_v18 }
 0x233   :  { %v615_v22 = vpop.f32.mrb[140].mxu0 }
 0x234   :  { %v3576_v23 = vpop.eup %3575  ;;  %v616_v25 = vadd.f32 %v4284_v63, %v615_v22  ;;  %v2757_v26 = vpop.f32.mrb[141].mxu0  ;;  %2915 = vmatmul.mubr.f32.gmra.mrb[246].mxu0 %v174_v21 }
 0x235   :  { %v1080_v27 = vadd.f32 %v3576_v23, %v1079_v20  ;;  %2917 = vmatprep.mubr.msk.f32.mxu0 %vm3874_vm0, %v3875_v1 }
 0x236   :  { %3581 = vtanh.f32 %v616_v25 }
 0x237   :  { %v620_v29 = vpop.f32.mrb[142].mxu0 }
 0x238   :  { %v3578_v30 = vpop.eup %3577  ;;  %v621_v31 = vadd.f32 %v4284_v63, %v620_v29  ;;  %v2760_v32 = vpop.f32.mrb[143].mxu0  ;;  %2918 = vmatmul.mubr.f32.gmra.mrb[248].mxu0 %v175_v28 }
 0x239   :  { %v1081_v33 = vadd.f32 %v3578_v30, %v1080_v27  ;;  %2952 = vmatprep.mubr.msk.f32.mxu0 %vm3874_vm0, %v3875_v1 }
 0x23a   :  { %3583 = vtanh.f32 %v621_v31 }
 0x23b   :  { %v625_v37 = vpop.f32.mrb[144].mxu0 }
 0x23c   :  { %v3580_v38 = vpop.eup %3579  ;;  %v626_v39 = vadd.f32 %v4284_v63, %v625_v37  ;;  %v2763_v40 = vpop.f32.mrb[145].mxu0 }
 0x23d   :  { %v1082_v41 = vadd.f32 %v3580_v38, %v1081_v33 }
 0x23e   :  { %3585 = vtanh.f32 %v626_v39 }
 0x23f   :  { %v630_v42 = vpop.f32.mrb[146].mxu0 }
 0x240   :  { %v3582_v43 = vpop.eup %3581  ;;  %v631_v44 = vadd.f32 %v4284_v63, %v630_v42  ;;  %v2766_v45 = vpop.f32.mrb[147].mxu0 }
 0x241   :  { %v1083_v46 = vadd.f32 %v3582_v43, %v1082_v41 }
 0x242   :  { %3587 = vtanh.f32 %v631_v44 }
 0x243   :  { %v635_v47 = vpop.f32.mrb[148].mxu0 }
 0x244   :  { %v3584_v48 = vpop.eup %3583  ;;  %v636_v49 = vadd.f32 %v4284_v63, %v635_v47  ;;  %v2769_v50 = vpop.f32.mrb[149].mxu0 }
 0x245   :  { %v1084_v51 = vadd.f32 %v3584_v48, %v1083_v46 }
 0x246   :  { %3589 = vtanh.f32 %v636_v49 }
 0x247   :  { %v640_v52 = vpop.f32.mrb[150].mxu0 }
 0x248   :  { %v3586_v53 = vpop.eup %3585  ;;  %v641_v54 = vadd.f32 %v4284_v63, %v640_v52  ;;  %v2772_v55 = vpop.f32.mrb[151].mxu0 }
 0x249   :  { %v1085_v56 = vadd.f32 %v3586_v53, %v1084_v51 }
 0x24a   :  { %3591 = vtanh.f32 %v641_v54 }
 0x24b   :  { %v645_v57 = vpop.f32.mrb[152].mxu0 }
 0x24c   :  { %v3588_v58 = vpop.eup %3587  ;;  %v646_v59 = vadd.f32 %v4284_v63, %v645_v57  ;;  %v2775_v60 = vpop.f32.mrb[153].mxu0  ;;  %v1161_v57 = vld [vmem:[#allocation4 + $0x78] sm:$0xff] }
 0x24d   :  { %v1086_v61 = vadd.f32 %v3588_v58, %v1085_v56  ;;  %v1160_v56 = vld [vmem:[#allocation4 + $0x70] sm:$0xff] }
 0x24e   :  { %3593 = vtanh.f32 %v646_v59  ;;  %v3408_v58 = vpack.c.bf16 %v1161_v57, %v1160_v56 }
 0x24f   :  { %v650_v62 = vpop.f32.mrb[154].mxu0 }
 0x250   :  { %v3590_v24 = vpop.eup %3589  ;;  %v651_v2 = vadd.f32 %v4284_v63, %v650_v62  ;;  %v2778_v3 = vpop.f32.mrb[155].mxu0  ;;  %3409 = vmatpush3.bf16.msra.mxu0 %v3408_v58 }
 0x251   :  { %v1087_v4 = vadd.f32 %v3590_v24, %v1086_v61 }
 0x252   :  { %3595 = vtanh.f32 %v651_v2 }
 0x253   :  { %v655_v5 = vpop.f32.mrb[156].mxu0 }
 0x254   :  { %v3592_v6 = vpop.eup %3591  ;;  %v656_v7 = vadd.f32 %v4284_v63, %v655_v5  ;;  %v2781_v8 = vpop.f32.mrb[157].mxu0 }
 0x255   :  { %v1088_v9 = vadd.f32 %v3592_v6, %v1087_v4 }
 0x256   :  { %3597 = vtanh.f32 %v656_v7 }
 0x257   :  { %v660_v10 = vpop.f32.mrb[158].mxu0 }
 0x258   :  { %v3594_v11 = vpop.eup %3593  ;;  %v661_v12 = vadd.f32 %v4284_v63, %v660_v10  ;;  %v2784_v13 = vpop.f32.mrb[159].mxu0 }
 0x259   :  { %v1089_v14 = vadd.f32 %v3594_v11, %v1088_v9 }
 0x25a   :  { %3599 = vtanh.f32 %v661_v12 }
 0x25b   :  { %v665_v15 = vpop.f32.mrb[160].mxu0 }
 0x25c   :  { %v3596_v16 = vpop.eup %3595  ;;  %v666_v17 = vadd.f32 %v4284_v63, %v665_v15  ;;  %v2787_v18 = vpop.f32.mrb[161].mxu0 }
 0x25d   :  { %v1090_v19 = vadd.f32 %v3596_v16, %v1089_v14 }
 0x25e   :  { %3601 = vtanh.f32 %v666_v17 }
 0x25f   :  { %v670_v20 = vpop.f32.mrb[162].mxu0 }
 0x260   :  { %v3598_v21 = vpop.eup %3597  ;;  %v671_v22 = vadd.f32 %v4284_v63, %v670_v20  ;;  %v2790_v23 = vpop.f32.mrb[163].mxu0 }
 0x261   :  { %v1091_v25 = vadd.f32 %v3598_v21, %v1090_v19 }
 0x262   :  { %3603 = vtanh.f32 %v671_v22 }
 0x263   :  { %v675_v26 = vpop.f32.mrb[164].mxu0 }
 0x264   :  { %v3600_v27 = vpop.eup %3599  ;;  %v676_v28 = vadd.f32 %v4284_v63, %v675_v26  ;;  %v2793_v29 = vpop.f32.mrb[165].mxu0 }
 0x265   :  { %v1092_v30 = vadd.f32 %v3600_v27, %v1091_v25 }
 0x266   :  { %3605 = vtanh.f32 %v676_v28 }
 0x267   :  { %v680_v31 = vpop.f32.mrb[166].mxu0 }
 0x268   :  { %v3602_v32 = vpop.eup %3601  ;;  %v681_v33 = vadd.f32 %v4284_v63, %v680_v31  ;;  %v2796_v34 = vpop.f32.mrb[167].mxu0 }
 0x269   :  { %v1093_v35 = vadd.f32 %v3602_v32, %v1092_v30 }
 0x26a   :  { %3607 = vtanh.f32 %v681_v33 }
 0x26b   :  { %v685_v36 = vpop.f32.mrb[168].mxu0 }
 0x26c   :  { %v3604_v37 = vpop.eup %3603  ;;  %v686_v38 = vadd.f32 %v4284_v63, %v685_v36  ;;  %v2799_v39 = vpop.f32.mrb[169].mxu0 }
 0x26d   :  { %v1094_v40 = vadd.f32 %v3604_v37, %v1093_v35 }
 0x26e   :  { %3609 = vtanh.f32 %v686_v38 }
 0x26f   :  { %v690_v41 = vpop.f32.mrb[170].mxu0 }
 0x270   :  { %v3606_v42 = vpop.eup %3605  ;;  %v691_v43 = vadd.f32 %v4284_v63, %v690_v41  ;;  %v2802_v44 = vpop.f32.mrb[171].mxu0 }
 0x271   :  { %v1095_v45 = vadd.f32 %v3606_v42, %v1094_v40 }
 0x272   :  { %3611 = vtanh.f32 %v691_v43 }
 0x273   :  { %v695_v46 = vpop.f32.mrb[172].mxu0 }
 0x274   :  { %v3608_v47 = vpop.eup %3607  ;;  %v696_v48 = vadd.f32 %v4284_v63, %v695_v46  ;;  %v2805_v49 = vpop.f32.mrb[173].mxu0 }
 0x275   :  { %v1096_v50 = vadd.f32 %v3608_v47, %v1095_v45 }
 0x276   :  { %3613 = vtanh.f32 %v696_v48 }
 0x277   :  { %v700_v51 = vpop.f32.mrb[174].mxu0 }
 0x278   :  { %v3610_v52 = vpop.eup %3609  ;;  %v701_v53 = vadd.f32 %v4284_v63, %v700_v51  ;;  %v2808_v54 = vpop.f32.mrb[175].mxu0 }
 0x279   :  { %v1097_v55 = vadd.f32 %v3610_v52, %v1096_v50 }
 0x27a   :  { %3615 = vtanh.f32 %v701_v53 }
 0x27b   :  { %v705_v59 = vpop.f32.mrb[176].mxu0 }
 0x27c   :  { %v3612_v60 = vpop.eup %3611  ;;  %v706_v61 = vadd.f32 %v4284_v63, %v705_v59  ;;  %v2811_v62 = vpop.f32.mrb[177].mxu0 }
 0x27d   :  { %v1098_v24 = vadd.f32 %v3612_v60, %v1097_v55 }
 0x27e   :  { %3617 = vtanh.f32 %v706_v61 }
 0x27f   :  { %v710_v2 = vpop.f32.mrb[178].mxu0 }
 0x280   :  { %v3614_v3 = vpop.eup %3613  ;;  %v711_v4 = vadd.f32 %v4284_v63, %v710_v2  ;;  %v2814_v5 = vpop.f32.mrb[179].mxu0 }
 0x281   :  { %v1099_v6 = vadd.f32 %v3614_v3, %v1098_v24 }
 0x282   :  { %3619 = vtanh.f32 %v711_v4 }
 0x283   :  { %v715_v7 = vpop.f32.mrb[180].mxu0 }
 0x284   :  { %v3616_v8 = vpop.eup %3615  ;;  %v716_v9 = vadd.f32 %v4284_v63, %v715_v7  ;;  %v2817_v10 = vpop.f32.mrb[181].mxu0 }
 0x285   :  { %v1100_v11 = vadd.f32 %v3616_v8, %v1099_v6 }
 0x286   :  { %3621 = vtanh.f32 %v716_v9 }
 0x287   :  { %v720_v12 = vpop.f32.mrb[182].mxu0 }
 0x288   :  { %v3618_v13 = vpop.eup %3617  ;;  %v721_v14 = vadd.f32 %v4284_v63, %v720_v12  ;;  %v2820_v15 = vpop.f32.mrb[183].mxu0 }
 0x289   :  { %v1101_v16 = vadd.f32 %v3618_v13, %v1100_v11 }
 0x28a   :  { %3623 = vtanh.f32 %v721_v14 }
 0x28b   :  { %v725_v17 = vpop.f32.mrb[184].mxu0 }
 0x28c   :  { %v3620_v18 = vpop.eup %3619  ;;  %v726_v19 = vadd.f32 %v4284_v63, %v725_v17  ;;  %v2823_v20 = vpop.f32.mrb[185].mxu0 }
 0x28d   :  { %v1102_v21 = vadd.f32 %v3620_v18, %v1101_v16 }
 0x28e   :  { %3625 = vtanh.f32 %v726_v19 }
 0x28f   :  { %v730_v22 = vpop.f32.mrb[186].mxu0 }
 0x290   :  { %v3622_v23 = vpop.eup %3621  ;;  %v731_v25 = vadd.f32 %v4284_v63, %v730_v22  ;;  %v2826_v26 = vpop.f32.mrb[187].mxu0 }
 0x291   :  { %v1103_v27 = vadd.f32 %v3622_v23, %v1102_v21 }
 0x292   :  { %3627 = vtanh.f32 %v731_v25 }
 0x293   :  { %v735_v28 = vpop.f32.mrb[188].mxu0 }
 0x294   :  { %v3624_v29 = vpop.eup %3623  ;;  %v736_v30 = vadd.f32 %v4284_v63, %v735_v28  ;;  %v2829_v31 = vpop.f32.mrb[189].mxu0 }
 0x295   :  { %v1104_v32 = vadd.f32 %v3624_v29, %v1103_v27 }
 0x296   :  { %3629 = vtanh.f32 %v736_v30 }
 0x297   :  { %v740_v33 = vpop.f32.mrb[190].mxu0 }
 0x298   :  { %v3626_v34 = vpop.eup %3625  ;;  %v741_v35 = vadd.f32 %v4284_v63, %v740_v33  ;;  %v2832_v36 = vpop.f32.mrb[191].mxu0 }
 0x299   :  { %v1105_v37 = vadd.f32 %v3626_v34, %v1104_v32 }
 0x29a   :  { %3631 = vtanh.f32 %v741_v35 }
 0x29b   :  { %v745_v38 = vpop.f32.mrb[192].mxu0 }
 0x29c   :  { %v3628_v39 = vpop.eup %3627  ;;  %v746_v40 = vadd.f32 %v4284_v63, %v745_v38  ;;  %v2835_v41 = vpop.f32.mrb[193].mxu0 }
 0x29d   :  { %v1106_v42 = vadd.f32 %v3628_v39, %v1105_v37 }
 0x29e   :  { %3633 = vtanh.f32 %v746_v40 }
 0x29f   :  { %v750_v43 = vpop.f32.mrb[194].mxu0 }
 0x2a0   :  { %v3630_v44 = vpop.eup %3629  ;;  %v751_v45 = vadd.f32 %v4284_v63, %v750_v43  ;;  %v2838_v46 = vpop.f32.mrb[195].mxu0 }
 0x2a1   :  { %v1107_v47 = vadd.f32 %v3630_v44, %v1106_v42 }
 0x2a2   :  { %3635 = vtanh.f32 %v751_v45 }
 0x2a3   :  { %v755_v48 = vpop.f32.mrb[196].mxu0 }
 0x2a4   :  { %v3632_v49 = vpop.eup %3631  ;;  %v756_v50 = vadd.f32 %v4284_v63, %v755_v48  ;;  %v2841_v51 = vpop.f32.mrb[197].mxu0 }
 0x2a5   :  { %v1108_v52 = vadd.f32 %v3632_v49, %v1107_v47 }
 0x2a6   :  { %3637 = vtanh.f32 %v756_v50 }
 0x2a7   :  { %v760_v53 = vpop.f32.mrb[198].mxu0 }
 0x2a8   :  { %v3634_v54 = vpop.eup %3633  ;;  %v761_v55 = vadd.f32 %v4284_v63, %v760_v53  ;;  %v2844_v56 = vpop.f32.mrb[199].mxu0 }
 0x2a9   :  { %v1109_v57 = vadd.f32 %v3634_v54, %v1108_v52 }
 0x2aa   :  { %3639 = vtanh.f32 %v761_v55 }
 0x2ab   :  { %v765_v58 = vpop.f32.mrb[200].mxu0 }
 0x2ac   :  { %v3636_v59 = vpop.eup %3635  ;;  %v766_v60 = vadd.f32 %v4284_v63, %v765_v58  ;;  %v2847_v61 = vpop.f32.mrb[201].mxu0 }
 0x2ad   :  { %v1110_v62 = vadd.f32 %v3636_v59, %v1109_v57 }
 0x2ae   :  { %3641 = vtanh.f32 %v766_v60 }
 0x2af   :  { %v770_v24 = vpop.f32.mrb[202].mxu0 }
 0x2b0   :  { %v3638_v2 = vpop.eup %3637  ;;  %v771_v3 = vadd.f32 %v4284_v63, %v770_v24  ;;  %v2850_v4 = vpop.f32.mrb[203].mxu0 }
 0x2b1   :  { %v1111_v5 = vadd.f32 %v3638_v2, %v1110_v62 }
 0x2b2   :  { %3643 = vtanh.f32 %v771_v3 }
 0x2b3   :  { %v775_v6 = vpop.f32.mrb[204].mxu0 }
 0x2b4   :  { %v3640_v7 = vpop.eup %3639  ;;  %v776_v8 = vadd.f32 %v4284_v63, %v775_v6  ;;  %v2853_v9 = vpop.f32.mrb[205].mxu0 }
 0x2b5   :  { %v1112_v10 = vadd.f32 %v3640_v7, %v1111_v5 }
 0x2b6   :  { %3645 = vtanh.f32 %v776_v8 }
 0x2b7   :  { %v780_v11 = vpop.f32.mrb[206].mxu0 }
 0x2b8   :  { %v3642_v12 = vpop.eup %3641  ;;  %v781_v13 = vadd.f32 %v4284_v63, %v780_v11  ;;  %v2856_v14 = vpop.f32.mrb[207].mxu0 }
 0x2b9   :  { %v1113_v15 = vadd.f32 %v3642_v12, %v1112_v10 }
 0x2ba   :  { %3647 = vtanh.f32 %v781_v13 }
 0x2bb   :  { %v785_v16 = vpop.f32.mrb[208].mxu0 }
 0x2bc   :  { %v3644_v17 = vpop.eup %3643  ;;  %v786_v18 = vadd.f32 %v4284_v63, %v785_v16  ;;  %v2859_v19 = vpop.f32.mrb[209].mxu0 }
 0x2bd   :  { %v1114_v20 = vadd.f32 %v3644_v17, %v1113_v15 }
 0x2be   :  { %3649 = vtanh.f32 %v786_v18 }
 0x2bf   :  { %v790_v21 = vpop.f32.mrb[210].mxu0 }
 0x2c0   :  { %v3646_v22 = vpop.eup %3645  ;;  %v791_v23 = vadd.f32 %v4284_v63, %v790_v21  ;;  %v2862_v25 = vpop.f32.mrb[211].mxu0 }
 0x2c1   :  { %v1115_v26 = vadd.f32 %v3646_v22, %v1114_v20 }
 0x2c2   :  { %3651 = vtanh.f32 %v791_v23 }
 0x2c3   :  { %v795_v27 = vpop.f32.mrb[212].mxu0 }
 0x2c4   :  { %v3648_v28 = vpop.eup %3647  ;;  %v796_v29 = vadd.f32 %v4284_v63, %v795_v27  ;;  %v2865_v30 = vpop.f32.mrb[213].mxu0 }
 0x2c5   :  { %v1116_v31 = vadd.f32 %v3648_v28, %v1115_v26 }
 0x2c6   :  { %3653 = vtanh.f32 %v796_v29 }
 0x2c7   :  { %v800_v32 = vpop.f32.mrb[214].mxu0 }
 0x2c8   :  { %v3650_v33 = vpop.eup %3649  ;;  %v801_v34 = vadd.f32 %v4284_v63, %v800_v32  ;;  %v2868_v35 = vpop.f32.mrb[215].mxu0 }
 0x2c9   :  { %v1117_v36 = vadd.f32 %v3650_v33, %v1116_v31 }
 0x2ca   :  { %3655 = vtanh.f32 %v801_v34 }
 0x2cb   :  { %v805_v37 = vpop.f32.mrb[216].mxu0 }
 0x2cc   :  { %v3652_v38 = vpop.eup %3651  ;;  %v806_v39 = vadd.f32 %v4284_v63, %v805_v37  ;;  %v2871_v40 = vpop.f32.mrb[217].mxu0 }
 0x2cd   :  { %v1118_v41 = vadd.f32 %v3652_v38, %v1117_v36 }
 0x2ce   :  { %3657 = vtanh.f32 %v806_v39 }
 0x2cf   :  { %v810_v42 = vpop.f32.mrb[218].mxu0 }
 0x2d0   :  { %v3654_v43 = vpop.eup %3653  ;;  %v811_v44 = vadd.f32 %v4284_v63, %v810_v42  ;;  %v2874_v45 = vpop.f32.mrb[219].mxu0 }
 0x2d1   :  { %v1119_v46 = vadd.f32 %v3654_v43, %v1118_v41 }
 0x2d2   :  { %3659 = vtanh.f32 %v811_v44 }
 0x2d3   :  { %v815_v47 = vpop.f32.mrb[220].mxu0 }
 0x2d4   :  { %v3656_v48 = vpop.eup %3655  ;;  %v816_v49 = vadd.f32 %v4284_v63, %v815_v47  ;;  %v2877_v50 = vpop.f32.mrb[221].mxu0 }
 0x2d5   :  { %v1120_v51 = vadd.f32 %v3656_v48, %v1119_v46 }
 0x2d6   :  { %3661 = vtanh.f32 %v816_v49 }
 0x2d7   :  { %v820_v52 = vpop.f32.mrb[222].mxu0 }
 0x2d8   :  { %v3658_v53 = vpop.eup %3657  ;;  %v821_v54 = vadd.f32 %v4284_v63, %v820_v52  ;;  %v2880_v55 = vpop.f32.mrb[223].mxu0 }
 0x2d9   :  { %v1121_v56 = vadd.f32 %v3658_v53, %v1120_v51 }
 0x2da   :  { %3663 = vtanh.f32 %v821_v54 }
 0x2db   :  { %v825_v57 = vpop.f32.mrb[224].mxu0 }
 0x2dc   :  { %v3660_v58 = vpop.eup %3659  ;;  %v826_v59 = vadd.f32 %v4284_v63, %v825_v57  ;;  %v2883_v60 = vpop.f32.mrb[225].mxu0 }
 0x2dd   :  { %v1122_v61 = vadd.f32 %v3660_v58, %v1121_v56 }
 0x2de   :  { %3665 = vtanh.f32 %v826_v59 }
 0x2df   :  { %v830_v62 = vpop.f32.mrb[226].mxu0 }
 0x2e0   :  { %v3662_v24 = vpop.eup %3661  ;;  %v831_v2 = vadd.f32 %v4284_v63, %v830_v62  ;;  %v2886_v3 = vpop.f32.mrb[227].mxu0 }
 0x2e1   :  { %v1123_v4 = vadd.f32 %v3662_v24, %v1122_v61 }
 0x2e2   :  { %3667 = vtanh.f32 %v831_v2 }
 0x2e3   :  { %v835_v5 = vpop.f32.mrb[228].mxu0 }
 0x2e4   :  { %v3664_v6 = vpop.eup %3663  ;;  %v836_v7 = vadd.f32 %v4284_v63, %v835_v5  ;;  %v2889_v8 = vpop.f32.mrb[229].mxu0 }
 0x2e5   :  { %v1124_v9 = vadd.f32 %v3664_v6, %v1123_v4 }
 0x2e6   :  { %3669 = vtanh.f32 %v836_v7 }
 0x2e7   :  { %v840_v10 = vpop.f32.mrb[230].mxu0 }
 0x2e8   :  { %v3666_v11 = vpop.eup %3665  ;;  %v841_v12 = vadd.f32 %v4284_v63, %v840_v10  ;;  %v2892_v13 = vpop.f32.mrb[231].mxu0  ;;  %v1144_v10 = vld [vmem:[%s5328_s4] sm:$0x1] }
 0x2e9   :  { %v1125_v14 = vadd.f32 %v3666_v11, %v1124_v9 }
 0x2ea   :  { %3671 = vtanh.f32 %v841_v12 }
 0x2eb   :  { %v845_v15 = vpop.f32.mrb[232].mxu0 }
 0x2ec   :  { %v3668_v16 = vpop.eup %3667  ;;  %v846_v17 = vadd.f32 %v4284_v63, %v845_v15  ;;  %v2895_v18 = vpop.f32.mrb[233].mxu0 }
 0x2ed   :  { %v1126_v19 = vadd.f32 %v3668_v16, %v1125_v14  ;;  %v1375_v16 = vld [vmem:[%s5329_s5] sm:$0xff]  ;;  %v1377_v18 = vld [vmem:[%s5329_s5 + $0x10] sm:$0xff] }
 0x2ee   :  { %3673 = vtanh.f32 %v846_v17  ;;  %v1376_v17 = vld [vmem:[%s5329_s5 + $0x8] sm:$0xff] }
 0x2ef   :  { %v850_v20 = vpop.f32.mrb[234].mxu0 }
 0x2f0   :  { %v3670_v21 = vpop.eup %3669  ;;  %v851_v22 = vadd.f32 %v4284_v63, %v850_v20  ;;  %v2898_v23 = vpop.f32.mrb[235].mxu0  ;;  %v1378_v20 = vld [vmem:[%s5329_s5 + $0x18] sm:$0xff] }
 0x2f1   :  { %v1127_v25 = vadd.f32 %v3670_v21, %v1126_v19  ;;  %v3411_v19 = vpack.c.bf16 %v1376_v17, %v1375_v16  ;;  %v3414_v21 = vpack.c.bf16 %v1378_v20, %v1377_v18  ;;  %v1380_v23 = vld [vmem:[%s5329_s5 + $0x28] sm:$0xff]  ;;  %v3710_v18 = vld [vmem:[#allocation2 + $0x70] sm:$0xff]  ;;  %v3711_v20 = vld [vmem:[#allocation2 + $0x78] sm:$0xff] }
 0x2f2   :  { %3675 = vtanh.f32 %v851_v22  ;;  %v1379_v22 = vld [vmem:[%s5329_s5 + $0x20] sm:$0xff]  ;;  %v3709_v16 = vld [vmem:[#allocation2 + $0x68] sm:$0xff] }
 0x2f3   :  { %v855_v26 = vpop.f32.mrb[236].mxu0  ;;  %3412 = vmatpush3.bf16.msra.mxu1 %v3411_v19 }
 0x2f4   :  { %v3672_v27 = vpop.eup %3671  ;;  %v856_v28 = vadd.f32 %v4284_v63, %v855_v26  ;;  %v2901_v29 = vpop.f32.mrb[237].mxu0  ;;  %3413 = vmatprep.subr.bf16.mxu1 %v3873_v0 }
 0x2f5   :  { %v1128_v30 = vadd.f32 %v3672_v27, %v1127_v25  ;;  %v3417_v25 = vpack.c.bf16 %v1380_v23, %v1379_v22  ;;  %v3712_v22 = vld [vmem:[#allocation2 + $0x80] sm:$0xff] }
 0x2f6   :  { %3677 = vtanh.f32 %v856_v28 }
 0x2f7   :  { %v860_v31 = vpop.f32.mrb[238].mxu0  ;;  %3415 = vmatpush3.bf16.msra.mxu1 %v3414_v21 }
 0x2f8   :  { %v3674_v32 = vpop.eup %3673  ;;  %v861_v33 = vadd.f32 %v4284_v63, %v860_v31  ;;  %v2904_v34 = vpop.f32.mrb[239].mxu0  ;;  %3416 = vmatprep.subr.bf16.mxu1 %v3873_v0  ;;  %v1381_v31 = vld [vmem:[%s5329_s5 + $0x30] sm:$0xff] }
 0x2f9   :  { %v1129_v35 = vadd.f32 %v3674_v32, %v1128_v30  ;;  %v1382_v32 = vld [vmem:[%s5329_s5 + $0x38] sm:$0xff]  ;;  %v1383_v34 = vld [vmem:[%s5329_s5 + $0x40] sm:$0xff] }
 0x2fa   :  { %3679 = vtanh.f32 %v861_v33  ;;  %v3420_v33 = vpack.c.bf16 %v1382_v32, %v1381_v31  ;;  %v3716_v31 = vld [vmem:[#allocation2 + $0xa0] sm:$0xff] }
 0x2fb   :  { %v865_v36 = vpop.f32.mrb[240].mxu0  ;;  %3418 = vmatpush3.bf16.msra.mxu1 %v3417_v25  ;;  %v3713_v25 = vld [vmem:[#allocation2 + $0x88] sm:$0xff] }
 0x2fc   :  { %v3676_v37 = vpop.eup %3675  ;;  %v866_v38 = vadd.f32 %v4284_v63, %v865_v36  ;;  %v2907_v39 = vpop.f32.mrb[241].mxu0  ;;  %3419 = vmatprep.subr.bf16.mxu1 %v3873_v0 }
 0x2fd   :  { %v1130_v40 = vadd.f32 %v3676_v37, %v1129_v35  ;;  %v1384_v35 = vld [vmem:[%s5329_s5 + $0x48] sm:$0xff]  ;;  %v1385_v37 = vld [vmem:[%s5329_s5 + $0x50] sm:$0xff] }
 0x2fe   :  { %3681 = vtanh.f32 %v866_v38  ;;  %v3423_v36 = vpack.c.bf16 %v1384_v35, %v1383_v34  ;;  %v1386_v38 = vld [vmem:[%s5329_s5 + $0x58] sm:$0xff]  ;;  %v3718_v35 = vld [vmem:[#allocation2 + $0xb0] sm:$0xff] }
 0x2ff   :  { %v870_v41 = vpop.f32.mrb[242].mxu0  ;;  %3421 = vmatpush3.bf16.msra.mxu1 %v3420_v33  ;;  %v3426_v39 = vpack.c.bf16 %v1386_v38, %v1385_v37  ;;  %v3717_v33 = vld [vmem:[#allocation2 + $0xa8] sm:$0xff]  ;;  %v3719_v37 = vld [vmem:[#allocation2 + $0xb8] sm:$0xff] }
 0x300   :  { %v3678_v42 = vpop.eup %3677  ;;  %v871_v43 = vadd.f32 %v4284_v63, %v870_v41  ;;  %v2910_v44 = vpop.f32.mrb[243].mxu0  ;;  %3422 = vmatprep.subr.bf16.mxu1 %v3873_v0  ;;  %v1388_v41 = vld [vmem:[%s5329_s5 + $0x68] sm:$0xff] }
 0x301   :  { %v1131_v45 = vadd.f32 %v3678_v42, %v1130_v40  ;;  %v1387_v40 = vld [vmem:[%s5329_s5 + $0x60] sm:$0xff]  ;;  %v1390_v44 = vld [vmem:[%s5329_s5 + $0x78] sm:$0xff] }
 0x302   :  { %3683 = vtanh.f32 %v871_v43  ;;  %v3429_v42 = vpack.c.bf16 %v1388_v41, %v1387_v40  ;;  %v1389_v43 = vld [vmem:[%s5329_s5 + $0x70] sm:$0xff]  ;;  %v3721_v41 = vld [vmem:[#allocation2 + $0xc8] sm:$0xff] }
 0x303   :  { %v875_v46 = vpop.f32.mrb[244].mxu0  ;;  %3424 = vmatpush3.bf16.msra.mxu1 %v3423_v36 }
 0x304   :  { %v3680_v47 = vpop.eup %3679  ;;  %v876_v48 = vadd.f32 %v4284_v63, %v875_v46  ;;  %v2913_v49 = vpop.f32.mrb[245].mxu0  ;;  %3425 = vmatprep.subr.bf16.mxu1 %v3873_v0 }
 0x305   :  { %v1132_v50 = vadd.f32 %v3680_v47, %v1131_v45  ;;  %v3432_v45 = vpack.c.bf16 %v1390_v44, %v1389_v43  ;;  %v1246_v47 = vlaneseq  ;;  %v3722_v43 = vld [vmem:[#allocation2 + $0xd0] sm:$0xff] }
 0x306   :  { %3685 = vtanh.f32 %v876_v48 }
 0x307   :  { %v880_v51 = vpop.f32.mrb[246].mxu0  ;;  %3427 = vmatpush3.bf16.msra.mxu1 %v3426_v39  ;;  %v1247_v48 = vshrl.u32 %v1246_v47, 7  ;;  %v3720_v39 = vld [vmem:[#allocation2 + $0xc0] sm:$0xff] }
 0x308   :  { %v3682_v52 = vpop.eup %3681  ;;  %v881_v53 = vadd.f32 %v4284_v63, %v880_v51  ;;  %v2916_v54 = vpop.f32.mrb[247].mxu0  ;;  %3428 = vmatprep.subr.bf16.mxu1 %v3873_v0  ;;  %v3724_v47 = vld [vmem:[#allocation2 + $0xe0] sm:$0xff] }
 0x309   :  { %v1133_v55 = vadd.f32 %v3682_v52, %v1132_v50  ;;  %v1248_v50 = vsub.s32 0, %v1247_v48 }
 0x30a   :  { %3687 = vtanh.f32 %v881_v53 }
 0x30b   :  { %v885_v56 = vpop.f32.mrb[248].mxu0  ;;  %3430 = vmatpush3.bf16.msra.mxu1 %v3429_v42 }
 0x30c   :  { %v3684_v57 = vpop.eup %3683  ;;  %v886_v58 = vadd.f32 %v4284_v63, %v885_v56  ;;  %v2919_v59 = vpop.f32.mrb[249].mxu0  ;;  %3431 = vmatprep.subr.bf16.mxu1 %v3873_v0  ;;  %v3696_v0 = vld [vmem:[#allocation2] sm:$0xff] }
 0x30d   :  { %v1134_v60 = vadd.f32 %v3684_v57, %v1133_v55  ;;  %v3697_v55 = vld [vmem:[#allocation2 + $0x8] sm:$0xff]  ;;  %v3698_v57 = vld [vmem:[#allocation2 + $0x10] sm:$0xff]  ;;  %v3699_v59 = vld [vmem:[#allocation2 + $0x18] sm:$0xff] }
 0x30e   :  { %3689 = vtanh.f32 %v886_v58 }
 0x30f   :  { %3433 = vmatpush3.bf16.msra.mxu1 %v3432_v45  ;;  %v3723_v45 = vld [vmem:[#allocation2 + $0xd8] sm:$0xff] }
 0x310   :  { %v3686_v61 = vpop.eup %3685 }
 0x311   :  { %v1135_v62 = vadd.f32 %v3686_v61, %v1134_v60  ;;  %v3700_v61 = vld [vmem:[#allocation2 + $0x20] sm:$0xff] }
 0x314   :  { %v3688_v24 = vpop.eup %3687 }
 0x315   :  { %v1136_v2 = vadd.f32 %v3688_v24, %v1135_v62  ;;  %v3701_v24 = vld [vmem:[#allocation2 + $0x28] sm:$0xff] }
 0x318   :  { %v3690_v3 = vpop.eup %3689 }
 0x319   :  { %v1137_v4 = vadd.f32 %v3690_v3, %v1136_v2  ;;  %v3702_v3 = vld [vmem:[#allocation2 + $0x30] sm:$0xff] }
 0x31b   :  { %v1138_v5 = vrot.slane %v1137_v4, 4 }
 0x31d   :  { %v1139_v6 = vadd.f32 %v1138_v5, %v1137_v4  ;;  %v3703_v5 = vld [vmem:[#allocation2 + $0x38] sm:$0xff] }
 0x31f   :  { %v1140_v7 = vrot.slane %v1139_v6, 2 }
 0x321   :  { %v1141_v8 = vadd.f32 %v1140_v7, %v1139_v6  ;;  %v3704_v7 = vld [vmem:[#allocation2 + $0x40] sm:$0xff] }
 0x323   :  { %v1142_v9 = vrot.slane %v1141_v8, 1 }
 0x325   :  { %v1143_v11 = vadd.f32 %v1142_v9, %v1141_v8  ;;  %v3705_v9 = vld [vmem:[#allocation2 + $0x48] sm:$0xff] }
 0x327   :  { %v1145_v63 = vsub.f32 %v1143_v11, %v1144_v10  ;;  %v3706_v11 = vld [vmem:[#allocation2 + $0x50] sm:$0xff] }
 0x329   :  { %2953 = vmatmul.mubr.f32.vlgmr.msra.gmra.mrb[250].mxu0 %v1145_v63 }
 0x3fc   :  { %v1228_v12 = vpop.f32.mrb[250].mxu0 }
 0x3fd   :  { %v1232_v13 = vmul.f32 0.001, %v1228_v12  ;;  %v2954_v14 = vpop.f32.mrb[251].mxu0  ;;  %v3707_v12 = vld [vmem:[#allocation2 + $0x58] sm:$0xff] }
 0x3fe   :  { %v3708_v14 = vld [vmem:[#allocation2 + $0x60] sm:$0xff] }
 0x3ff   :  { %v1234_v15 = vsel %vm1233_vm1, %v1232_v13, -inf }
 0x400   :  { %1235 = vmax.xlane.f32.xlu0 %v1234_v15 }
 0x48d   :  { %v1236_v26 = vpop.xlane.xlu0 %1235 }
 0x48e   :  { %v1237_v27 = vsub.f32 %v1232_v13, %v1236_v26 }
 0x490   :  { %v1238_v28 = vmul.f32 1.442695, %v1237_v27  ;;  %v3714_v27 = vld [vmem:[#allocation2 + $0x90] sm:$0xff] }
 0x492   :  { %3691 = vpow2.f32 %v1238_v28 }
 0x49c   :  { %v3692_v29 = vpop.eup %3691 }
 0x49d   :  { %v1240_v30 = vsel %vm1233_vm1, %v3692_v29, 0.0 }
 0x49e   :  { %1241 = vadd.xlane.f32.xlu0 %v1240_v30 }
 0x52b   :  { %v1242_v46 = vpop.xlane.xlu0 %1241 }
 0x52c   :  { %3693 = vrcp.f32 %v1242_v46 }
 0x536   :  { %v3694_v49 = vpop.eup %3693 }
 0x537   :  { %v1244_v51 = vmul.f32 32.0, %v3694_v49  ;;  %v3725_v49 = vld [vmem:[#allocation2 + $0xe8] sm:$0xff] }
 0x539   :  { %v1245_v52 = vmul.f32 %v3692_v29, %v1244_v51  ;;  %v3715_v29 = vld [vmem:[#allocation2 + $0x98] sm:$0xff]  ;;  %v3726_v51 = vld [vmem:[#allocation2 + $0xf0] sm:$0xff] }
 0x53b   :  { %v4449_v53 = vrot.slane %v1245_v52, %v1248_v50 }
 0x53d   :  { %v1250_v54 = vmul.f32 %v3696_v0, %v4449_v53  ;;  %v1251_v56 = vmul.f32 %v3697_v55, %v4449_v53  ;;  %v1252_v58 = vmul.f32 %v3698_v57, %v4449_v53  ;;  %v1253_v60 = vmul.f32 %v3699_v59, %v4449_v53  ;;  %v3727_v0 = vld [vmem:[#allocation2 + $0xf8] sm:$0xff]  ;;  %v3728_v55 = vld [vmem:[#allocation2 + $0x100] sm:$0xff]  ;;  %v3729_v57 = vld [vmem:[#allocation2 + $0x108] sm:$0xff] }
 0x53e   :  { %v1254_v62 = vmul.f32 %v3700_v61, %v4449_v53  ;;  %v1255_v2 = vmul.f32 %v3701_v24, %v4449_v53  ;;  %v1256_v4 = vmul.f32 %v3702_v3, %v4449_v53  ;;  %v1257_v6 = vmul.f32 %v3703_v5, %v4449_v53  ;;  %v3730_v59 = vld [vmem:[#allocation2 + $0x110] sm:$0xff]  ;;  %v3731_v61 = vld [vmem:[#allocation2 + $0x118] sm:$0xff]  ;;  %v3732_v24 = vld [vmem:[#allocation2 + $0x120] sm:$0xff] }
 0x53f   :  { %2988 = vmatmul.mubr.f32.vlgmr.msra.gmra.mrb[0].mxu1 %v1250_v54  ;;  %v1258_v8 = vmul.f32 %v3704_v7, %v4449_v53  ;;  %v1259_v10 = vmul.f32 %v3705_v9, %v4449_v53  ;;  %v1260_v63 = vmul.f32 %v3706_v11, %v4449_v53  ;;  %v1261_v13 = vmul.f32 %v3707_v12, %v4449_v53  ;;  %v3733_v3 = vld [vmem:[#allocation2 + $0x128] sm:$0xff]  ;;  %v3734_v5 = vld [vmem:[#allocation2 + $0x130] sm:$0xff]  ;;  %v3735_v7 = vld [vmem:[#allocation2 + $0x138] sm:$0xff] }
 0x540   :  { %2990 = vmatprep.mubr.msk.f32.mxu1 %vm3874_vm0, %v3875_v1  ;;  %v1262_v15 = vmul.f32 %v3708_v14, %v4449_v53  ;;  %v1263_v17 = vmul.f32 %v3709_v16, %v4449_v53  ;;  %v1264_v19 = vmul.f32 %v3710_v18, %v4449_v53  ;;  %v1265_v21 = vmul.f32 %v3711_v20, %v4449_v53  ;;  %v3736_v9 = vld [vmem:[#allocation2 + $0x140] sm:$0xff]  ;;  %v3737_v11 = vld [vmem:[#allocation2 + $0x148] sm:$0xff]  ;;  %v3738_v12 = vld [vmem:[#allocation2 + $0x150] sm:$0xff] }
 0x541   :  { %v1266_v23 = vmul.f32 %v3712_v22, %v4449_v53  ;;  %v1267_v26 = vmul.f32 %v3713_v25, %v4449_v53  ;;  %v1268_v28 = vmul.f32 %v3714_v27, %v4449_v53  ;;  %v1269_v30 = vmul.f32 %v3715_v29, %v4449_v53  ;;  %v3739_v14 = vld [vmem:[#allocation2 + $0x158] sm:$0xff]  ;;  %v3740_v16 = vld [vmem:[#allocation2 + $0x160] sm:$0xff]  ;;  %v3741_v18 = vld [vmem:[#allocation2 + $0x168] sm:$0xff] }
 0x542   :  { %v1270_v32 = vmul.f32 %v3716_v31, %v4449_v53  ;;  %v1271_v34 = vmul.f32 %v3717_v33, %v4449_v53  ;;  %v1272_v36 = vmul.f32 %v3718_v35, %v4449_v53  ;;  %v1273_v38 = vmul.f32 %v3719_v37, %v4449_v53  ;;  %v3742_v20 = vld [vmem:[#allocation2 + $0x170] sm:$0xff]  ;;  %v3743_v22 = vld [vmem:[#allocation2 + $0x178] sm:$0xff]  ;;  %v3744_v25 = vld [vmem:[#allocation2 + $0x180] sm:$0xff] }
 0x543   :  { %2991 = vmatmul.mubr.f32.gmra.mrb[2].mxu1 %v1251_v56  ;;  %v1274_v40 = vmul.f32 %v3720_v39, %v4449_v53  ;;  %v1275_v42 = vmul.f32 %v3721_v41, %v4449_v53  ;;  %v1276_v44 = vmul.f32 %v3722_v43, %v4449_v53  ;;  %v1277_v46 = vmul.f32 %v3723_v45, %v4449_v53  ;;  %v3745_v27 = vld [vmem:[#allocation2 + $0x188] sm:$0xff]  ;;  %v3746_v29 = vld [vmem:[#allocation2 + $0x190] sm:$0xff]  ;;  %v3747_v31 = vld [vmem:[#allocation2 + $0x198] sm:$0xff] }
 0x544   :  { %2993 = vmatprep.mubr.msk.f32.mxu1 %vm3874_vm0, %v3875_v1  ;;  %v1278_v48 = vmul.f32 %v3724_v47, %v4449_v53  ;;  %v1279_v50 = vmul.f32 %v3725_v49, %v4449_v53  ;;  %v1280_v52 = vmul.f32 %v3726_v51, %v4449_v53  ;;  %v1281_v54 = vmul.f32 %v3727_v0, %v4449_v53  ;;  %v3748_v33 = vld [vmem:[#allocation2 + $0x1a0] sm:$0xff]  ;;  %v3749_v35 = vld [vmem:[#allocation2 + $0x1a8] sm:$0xff]  ;;  %v3750_v39 = vld [vmem:[#allocation2 + $0x1b0] sm:$0xff] }
 0x545   :  { %v1282_v56 = vmul.f32 %v3728_v55, %v4449_v53  ;;  %v3751_v43 = vld [vmem:[#allocation2 + $0x1b8] sm:$0xff]  ;;  %v3752_v47 = vld [vmem:[#allocation2 + $0x1c0] sm:$0xff]  ;;  %v3753_v51 = vld [vmem:[#allocation2 + $0x1c8] sm:$0xff] }
 0x546   :  { %v3754_v55 = vld [vmem:[#allocation2 + $0x1d0] sm:$0xff] }
 0x547   :  { %2994 = vmatmul.mubr.f32.gmra.mrb[4].mxu1 %v1252_v58  ;;  %v1283_v58 = vmul.f32 %v3729_v57, %v4449_v53 }
 0x548   :  { %2996 = vmatprep.mubr.msk.f32.mxu1 %vm3874_vm0, %v3875_v1 }
 0x54b   :  { %2997 = vmatmul.mubr.f32.gmra.mrb[6].mxu1 %v1253_v60  ;;  %v1284_v60 = vmul.f32 %v3730_v59, %v4449_v53  ;;  %v3755_v59 = vld [vmem:[#allocation2 + $0x1d8] sm:$0xff] }
 0x54c   :  { %2999 = vmatprep.mubr.msk.f32.mxu1 %vm3874_vm0, %v3875_v1 }
 0x54f   :  { %3000 = vmatmul.mubr.f32.gmra.mrb[8].mxu1 %v1254_v62  ;;  %v1285_v62 = vmul.f32 %v3731_v61, %v4449_v53 }
 0x550   :  { %3002 = vmatprep.mubr.msk.f32.mxu1 %vm3874_vm0, %v3875_v1 }
 0x553   :  { %3003 = vmatmul.mubr.f32.gmra.mrb[10].mxu1 %v1255_v2  ;;  %v1286_v2 = vmul.f32 %v3732_v24, %v4449_v53  ;;  %v3756_v24 = vld [vmem:[#allocation2 + $0x1e0] sm:$0xff] }
 0x554   :  { %3005 = vmatprep.mubr.msk.f32.mxu1 %vm3874_vm0, %v3875_v1 }
 0x557   :  { %3006 = vmatmul.mubr.f32.gmra.mrb[12].mxu1 %v1256_v4  ;;  %v1287_v4 = vmul.f32 %v3733_v3, %v4449_v53 }
 0x558   :  { %3008 = vmatprep.mubr.msk.f32.mxu1 %vm3874_vm0, %v3875_v1 }
 0x55b   :  { %3009 = vmatmul.mubr.f32.gmra.mrb[14].mxu1 %v1257_v6  ;;  %v1288_v6 = vmul.f32 %v3734_v5, %v4449_v53  ;;  %v3757_v5 = vld [vmem:[#allocation2 + $0x1e8] sm:$0xff] }
 0x55c   :  { %3011 = vmatprep.mubr.msk.f32.mxu1 %vm3874_vm0, %v3875_v1 }
 0x55f   :  { %3012 = vmatmul.mubr.f32.gmra.mrb[16].mxu1 %v1258_v8  ;;  %v1289_v8 = vmul.f32 %v3735_v7, %v4449_v53 }
 0x560   :  { %3014 = vmatprep.mubr.msk.f32.mxu1 %vm3874_vm0, %v3875_v1 }
 0x563   :  { %3015 = vmatmul.mubr.f32.gmra.mrb[18].mxu1 %v1259_v10  ;;  %v1290_v10 = vmul.f32 %v3736_v9, %v4449_v53  ;;  %v3758_v9 = vld [vmem:[#allocation2 + $0x1f0] sm:$0xff] }
 0x564   :  { %3017 = vmatprep.mubr.msk.f32.mxu1 %vm3874_vm0, %v3875_v1 }
 0x567   :  { %3018 = vmatmul.mubr.f32.gmra.mrb[20].mxu1 %v1260_v63  ;;  %v1291_v63 = vmul.f32 %v3737_v11, %v4449_v53 }
 0x568   :  { %3020 = vmatprep.mubr.msk.f32.mxu1 %vm3874_vm0, %v3875_v1 }
 0x56b   :  { %3021 = vmatmul.mubr.f32.gmra.mrb[22].mxu1 %v1261_v13  ;;  %v1292_v13 = vmul.f32 %v3738_v12, %v4449_v53  ;;  %v3759_v12 = vld [vmem:[#allocation2 + $0x1f8] sm:$0xff] }
 0x56c   :  { %3023 = vmatprep.mubr.msk.f32.mxu1 %vm3874_vm0, %v3875_v1 }
 0x56f   :  { %3024 = vmatmul.mubr.f32.gmra.mrb[24].mxu1 %v1262_v15  ;;  %v1293_v15 = vmul.f32 %v3739_v14, %v4449_v53 }
 0x570   :  { %3026 = vmatprep.mubr.msk.f32.mxu1 %vm3874_vm0, %v3875_v1 }
 0x573   :  { %3027 = vmatmul.mubr.f32.gmra.mrb[26].mxu1 %v1263_v17  ;;  %v1294_v17 = vmul.f32 %v3740_v16, %v4449_v53  ;;  %v3760_v16 = vld [vmem:[#allocation2 + $0x200] sm:$0xff] }
 0x574   :  { %3029 = vmatprep.mubr.msk.f32.mxu1 %vm3874_vm0, %v3875_v1 }
 0x577   :  { %3030 = vmatmul.mubr.f32.gmra.mrb[28].mxu1 %v1264_v19  ;;  %v1295_v19 = vmul.f32 %v3741_v18, %v4449_v53 }
 0x578   :  { %3032 = vmatprep.mubr.msk.f32.mxu1 %vm3874_vm0, %v3875_v1 }
 0x57b   :  { %3033 = vmatmul.mubr.f32.gmra.mrb[30].mxu1 %v1265_v21  ;;  %v1296_v21 = vmul.f32 %v3742_v20, %v4449_v53  ;;  %v3761_v20 = vld [vmem:[#allocation2 + $0x208] sm:$0xff] }
 0x57c   :  { %3035 = vmatprep.mubr.msk.f32.mxu1 %vm3874_vm0, %v3875_v1 }
 0x57f   :  { %3036 = vmatmul.mubr.f32.gmra.mrb[32].mxu1 %v1266_v23  ;;  %v1297_v23 = vmul.f32 %v3743_v22, %v4449_v53 }
 0x580   :  { %3038 = vmatprep.mubr.msk.f32.mxu1 %vm3874_vm0, %v3875_v1 }
 0x583   :  { %3039 = vmatmul.mubr.f32.gmra.mrb[34].mxu1 %v1267_v26  ;;  %v1298_v26 = vmul.f32 %v3744_v25, %v4449_v53  ;;  %v3762_v25 = vld [vmem:[#allocation2 + $0x210] sm:$0xff] }
 0x584   :  { %3041 = vmatprep.mubr.msk.f32.mxu1 %vm3874_vm0, %v3875_v1 }
 0x587   :  { %3042 = vmatmul.mubr.f32.gmra.mrb[36].mxu1 %v1268_v28  ;;  %v1299_v28 = vmul.f32 %v3745_v27, %v4449_v53 }
 0x588   :  { %3044 = vmatprep.mubr.msk.f32.mxu1 %vm3874_vm0, %v3875_v1 }
 0x58b   :  { %3045 = vmatmul.mubr.f32.gmra.mrb[38].mxu1 %v1269_v30  ;;  %v1300_v30 = vmul.f32 %v3746_v29, %v4449_v53  ;;  %v3763_v29 = vld [vmem:[#allocation2 + $0x218] sm:$0xff] }
 0x58c   :  { %3047 = vmatprep.mubr.msk.f32.mxu1 %vm3874_vm0, %v3875_v1 }
 0x58f   :  { %3048 = vmatmul.mubr.f32.gmra.mrb[40].mxu1 %v1270_v32  ;;  %v1301_v32 = vmul.f32 %v3747_v31, %v4449_v53 }
 0x590   :  { %3050 = vmatprep.mubr.msk.f32.mxu1 %vm3874_vm0, %v3875_v1 }
 0x593   :  { %3051 = vmatmul.mubr.f32.gmra.mrb[42].mxu1 %v1271_v34  ;;  %v1302_v34 = vmul.f32 %v3748_v33, %v4449_v53  ;;  %v3764_v33 = vld [vmem:[#allocation2 + $0x220] sm:$0xff] }
 0x594   :  { %3053 = vmatprep.mubr.msk.f32.mxu1 %vm3874_vm0, %v3875_v1 }
 0x597   :  { %3054 = vmatmul.mubr.f32.gmra.mrb[44].mxu1 %v1272_v36  ;;  %v1303_v36 = vmul.f32 %v3749_v35, %v4449_v53 }
 0x598   :  { %3056 = vmatprep.mubr.msk.f32.mxu1 %vm3874_vm0, %v3875_v1 }
 0x59b   :  { %3057 = vmatmul.mubr.f32.gmra.mrb[46].mxu1 %v1273_v38 }
 0x59c   :  { %3059 = vmatprep.mubr.msk.f32.mxu1 %vm3874_vm0, %v3875_v1 }
 0x59f   :  { %3060 = vmatmul.mubr.f32.gmra.mrb[48].mxu1 %v1274_v40  ;;  %v1304_v40 = vmul.f32 %v3750_v39, %v4449_v53 }
 0x5a0   :  { %3062 = vmatprep.mubr.msk.f32.mxu1 %vm3874_vm0, %v3875_v1 }
 0x5a3   :  { %3063 = vmatmul.mubr.f32.gmra.mrb[50].mxu1 %v1275_v42 }
 0x5a4   :  { %3065 = vmatprep.mubr.msk.f32.mxu1 %vm3874_vm0, %v3875_v1 }
 0x5a7   :  { %3066 = vmatmul.mubr.f32.gmra.mrb[52].mxu1 %v1276_v44  ;;  %v1305_v44 = vmul.f32 %v3751_v43, %v4449_v53 }
 0x5a8   :  { %3068 = vmatprep.mubr.msk.f32.mxu1 %vm3874_vm0, %v3875_v1 }
 0x5ab   :  { %3069 = vmatmul.mubr.f32.gmra.mrb[54].mxu1 %v1277_v46 }
 0x5ac   :  { %3071 = vmatprep.mubr.msk.f32.mxu1 %vm3874_vm0, %v3875_v1 }
 0x5af   :  { %3072 = vmatmul.mubr.f32.gmra.mrb[56].mxu1 %v1278_v48  ;;  %v1306_v48 = vmul.f32 %v3752_v47, %v4449_v53 }
 0x5b0   :  { %3074 = vmatprep.mubr.msk.f32.mxu1 %vm3874_vm0, %v3875_v1 }
 0x5b3   :  { %3075 = vmatmul.mubr.f32.gmra.mrb[58].mxu1 %v1279_v50 }
 0x5b4   :  { %3077 = vmatprep.mubr.msk.f32.mxu1 %vm3874_vm0, %v3875_v1 }
 0x5b7   :  { %3078 = vmatmul.mubr.f32.gmra.mrb[60].mxu1 %v1280_v52  ;;  %v1307_v52 = vmul.f32 %v3753_v51, %v4449_v53 }
 0x5b8   :  { %3080 = vmatprep.mubr.msk.f32.mxu1 %vm3874_vm0, %v3875_v1 }
 0x5bb   :  { %3081 = vmatmul.mubr.f32.gmra.mrb[62].mxu1 %v1281_v54 }
 0x5bc   :  { %3083 = vmatprep.mubr.msk.f32.mxu1 %vm3874_vm0, %v3875_v1 }
 0x5bf   :  { %3084 = vmatmul.mubr.f32.gmra.mrb[64].mxu1 %v1282_v56  ;;  %v1308_v56 = vmul.f32 %v3754_v55, %v4449_v53 }
 0x5c0   :  { %3086 = vmatprep.mubr.msk.f32.mxu1 %vm3874_vm0, %v3875_v1 }
 0x5c3   :  { %3087 = vmatmul.mubr.f32.gmra.mrb[66].mxu1 %v1283_v58 }
 0x5c4   :  { %3089 = vmatprep.mubr.msk.f32.mxu1 %vm3874_vm0, %v3875_v1 }
 0x5c7   :  { %3090 = vmatmul.mubr.f32.gmra.mrb[68].mxu1 %v1284_v60  ;;  %v1309_v60 = vmul.f32 %v3755_v59, %v4449_v53 }
 0x5c8   :  { %3092 = vmatprep.mubr.msk.f32.mxu1 %vm3874_vm0, %v3875_v1 }
 0x5cb   :  { %3093 = vmatmul.mubr.f32.gmra.mrb[70].mxu1 %v1285_v62 }
 0x5cc   :  { %3095 = vmatprep.mubr.msk.f32.mxu1 %vm3874_vm0, %v3875_v1 }
 0x5cf   :  { %3096 = vmatmul.mubr.f32.gmra.mrb[72].mxu1 %v1286_v2  ;;  %v1310_v2 = vmul.f32 %v3756_v24, %v4449_v53 }
 0x5d0   :  { %3098 = vmatprep.mubr.msk.f32.mxu1 %vm3874_vm0, %v3875_v1 }
 0x5d3   :  { %3099 = vmatmul.mubr.f32.gmra.mrb[74].mxu1 %v1287_v4 }
 0x5d4   :  { %3101 = vmatprep.mubr.msk.f32.mxu1 %vm3874_vm0, %v3875_v1 }
 0x5d7   :  { %3102 = vmatmul.mubr.f32.gmra.mrb[76].mxu1 %v1288_v6  ;;  %v1311_v6 = vmul.f32 %v3757_v5, %v4449_v53 }
 0x5d8   :  { %3104 = vmatprep.mubr.msk.f32.mxu1 %vm3874_vm0, %v3875_v1 }
 0x5db   :  { %3105 = vmatmul.mubr.f32.gmra.mrb[78].mxu1 %v1289_v8 }
 0x5dc   :  { %3107 = vmatprep.mubr.msk.f32.mxu1 %vm3874_vm0, %v3875_v1 }
 0x5df   :  { %3108 = vmatmul.mubr.f32.gmra.mrb[80].mxu1 %v1290_v10  ;;  %v1312_v10 = vmul.f32 %v3758_v9, %v4449_v53 }
 0x5e0   :  { %3110 = vmatprep.mubr.msk.f32.mxu1 %vm3874_vm0, %v3875_v1 }
 0x5e3   :  { %3111 = vmatmul.mubr.f32.gmra.mrb[82].mxu1 %v1291_v63 }
 0x5e4   :  { %3113 = vmatprep.mubr.msk.f32.mxu1 %vm3874_vm0, %v3875_v1 }
 0x5e7   :  { %3114 = vmatmul.mubr.f32.gmra.mrb[84].mxu1 %v1292_v13  ;;  %v1313_v13 = vmul.f32 %v3759_v12, %v4449_v53 }
 0x5e8   :  { %3116 = vmatprep.mubr.msk.f32.mxu1 %vm3874_vm0, %v3875_v1 }
 0x5eb   :  { %3117 = vmatmul.mubr.f32.gmra.mrb[86].mxu1 %v1293_v15 }
 0x5ec   :  { %3119 = vmatprep.mubr.msk.f32.mxu1 %vm3874_vm0, %v3875_v1 }
 0x5ef   :  { %3120 = vmatmul.mubr.f32.gmra.mrb[88].mxu1 %v1294_v17  ;;  %v1314_v17 = vmul.f32 %v3760_v16, %v4449_v53 }
 0x5f0   :  { %3122 = vmatprep.mubr.msk.f32.mxu1 %vm3874_vm0, %v3875_v1 }
 0x5f3   :  { %3123 = vmatmul.mubr.f32.gmra.mrb[90].mxu1 %v1295_v19 }
 0x5f4   :  { %3125 = vmatprep.mubr.msk.f32.mxu1 %vm3874_vm0, %v3875_v1 }
 0x5f7   :  { %3126 = vmatmul.mubr.f32.gmra.mrb[92].mxu1 %v1296_v21  ;;  %v1315_v21 = vmul.f32 %v3761_v20, %v4449_v53 }
 0x5f8   :  { %3128 = vmatprep.mubr.msk.f32.mxu1 %vm3874_vm0, %v3875_v1 }
 0x5fb   :  { %3129 = vmatmul.mubr.f32.gmra.mrb[94].mxu1 %v1297_v23 }
 0x5fc   :  { %3131 = vmatprep.mubr.msk.f32.mxu1 %vm3874_vm0, %v3875_v1 }
 0x5ff   :  { %3132 = vmatmul.mubr.f32.gmra.mrb[96].mxu1 %v1298_v26  ;;  %v1316_v26 = vmul.f32 %v3762_v25, %v4449_v53 }
 0x600   :  { %3134 = vmatprep.mubr.msk.f32.mxu1 %vm3874_vm0, %v3875_v1 }
 0x603   :  { %3135 = vmatmul.mubr.f32.gmra.mrb[98].mxu1 %v1299_v28 }
 0x604   :  { %3137 = vmatprep.mubr.msk.f32.mxu1 %vm3874_vm0, %v3875_v1 }
 0x607   :  { %3138 = vmatmul.mubr.f32.gmra.mrb[100].mxu1 %v1300_v30  ;;  %v1317_v30 = vmul.f32 %v3763_v29, %v4449_v53 }
 0x608   :  { %3140 = vmatprep.mubr.msk.f32.mxu1 %vm3874_vm0, %v3875_v1 }
 0x60b   :  { %3141 = vmatmul.mubr.f32.gmra.mrb[102].mxu1 %v1301_v32 }
 0x60c   :  { %3143 = vmatprep.mubr.msk.f32.mxu1 %vm3874_vm0, %v3875_v1 }
 0x60f   :  { %3144 = vmatmul.mubr.f32.gmra.mrb[104].mxu1 %v1302_v34  ;;  %v1318_v34 = vmul.f32 %v3764_v33, %v4449_v53 }
 0x610   :  { %3146 = vmatprep.mubr.msk.f32.mxu1 %vm3874_vm0, %v3875_v1 }
 0x612   :  { %v1457_v37 = vpop.f32.mrb[0].mxu1 }
 0x613   :  { %2082 = vst.msk [vmem:[%s5330_s6] sm:$0xff] %vm2081_vm2, %v1457_v37  ;;  %v2989_v38 = vpop.f32.mrb[1].mxu1  ;;  %3147 = vmatmul.mubr.f32.gmra.mrb[106].mxu1 %v1303_v36  ;;  %v3765_v37 = vld [vmem:[#allocation2 + $0x228] sm:$0xff] }
 0x614   :  { %3149 = vmatprep.mubr.msk.f32.mxu1 %vm3874_vm0, %v3875_v1  ;;  %v1319_v38 = vmul.f32 %v3765_v37, %v4449_v53 }
 0x616   :  { %v1462_v41 = vpop.f32.mrb[2].mxu1 }
 0x617   :  { %2083 = vst.msk [vmem:[%s5330_s6 + $0x8] sm:$0xff] %vm2081_vm2, %v1462_v41  ;;  %v2992_v42 = vpop.f32.mrb[3].mxu1  ;;  %3150 = vmatmul.mubr.f32.gmra.mrb[108].mxu1 %v1304_v40  ;;  %v3766_v41 = vld [vmem:[#allocation2 + $0x230] sm:$0xff] }
 0x618   :  { %3152 = vmatprep.mubr.msk.f32.mxu1 %vm3874_vm0, %v3875_v1  ;;  %v1320_v42 = vmul.f32 %v3766_v41, %v4449_v53 }
 0x61a   :  { %v1467_v45 = vpop.f32.mrb[4].mxu1 }
 0x61b   :  { %2084 = vst.msk [vmem:[%s5330_s6 + $0x10] sm:$0xff] %vm2081_vm2, %v1467_v45  ;;  %v2995_v46 = vpop.f32.mrb[5].mxu1  ;;  %3153 = vmatmul.mubr.f32.gmra.mrb[110].mxu1 %v1305_v44  ;;  %v3767_v45 = vld [vmem:[#allocation2 + $0x238] sm:$0xff] }
 0x61c   :  { %3155 = vmatprep.mubr.msk.f32.mxu1 %vm3874_vm0, %v3875_v1  ;;  %v1321_v46 = vmul.f32 %v3767_v45, %v4449_v53 }
 0x61e   :  { %v1472_v49 = vpop.f32.mrb[6].mxu1 }
 0x61f   :  { %2085 = vst.msk [vmem:[%s5330_s6 + $0x18] sm:$0xff] %vm2081_vm2, %v1472_v49  ;;  %v2998_v50 = vpop.f32.mrb[7].mxu1  ;;  %3156 = vmatmul.mubr.f32.gmra.mrb[112].mxu1 %v1306_v48  ;;  %v3768_v49 = vld [vmem:[#allocation2 + $0x240] sm:$0xff] }
 0x620   :  { %3158 = vmatprep.mubr.msk.f32.mxu1 %vm3874_vm0, %v3875_v1  ;;  %v1322_v50 = vmul.f32 %v3768_v49, %v4449_v53 }
 0x622   :  { %v1477_v0 = vpop.f32.mrb[8].mxu1 }
 0x623   :  { %2086 = vst.msk [vmem:[%s5330_s6 + $0x20] sm:$0xff] %vm2081_vm2, %v1477_v0  ;;  %v3001_v54 = vpop.f32.mrb[9].mxu1  ;;  %3159 = vmatmul.mubr.f32.gmra.mrb[114].mxu1 %v1307_v52  ;;  %v3769_v0 = vld [vmem:[#allocation2 + $0x248] sm:$0xff] }
 0x624   :  { %3161 = vmatprep.mubr.msk.f32.mxu1 %vm3874_vm0, %v3875_v1  ;;  %v1323_v54 = vmul.f32 %v3769_v0, %v4449_v53 }
 0x626   :  { %v1482_v57 = vpop.f32.mrb[10].mxu1 }
 0x627   :  { %2087 = vst.msk [vmem:[%s5330_s6 + $0x28] sm:$0xff] %vm2081_vm2, %v1482_v57  ;;  %v3004_v58 = vpop.f32.mrb[11].mxu1  ;;  %3162 = vmatmul.mubr.f32.gmra.mrb[116].mxu1 %v1308_v56  ;;  %v3770_v57 = vld [vmem:[#allocation2 + $0x250] sm:$0xff] }
 0x628   :  { %3164 = vmatprep.mubr.msk.f32.mxu1 %vm3874_vm0, %v3875_v1  ;;  %v1324_v58 = vmul.f32 %v3770_v57, %v4449_v53 }
 0x62a   :  { %v1487_v61 = vpop.f32.mrb[12].mxu1 }
 0x62b   :  { %2088 = vst.msk [vmem:[%s5330_s6 + $0x30] sm:$0xff] %vm2081_vm2, %v1487_v61  ;;  %v3007_v62 = vpop.f32.mrb[13].mxu1  ;;  %3165 = vmatmul.mubr.f32.gmra.mrb[118].mxu1 %v1309_v60  ;;  %v3771_v61 = vld [vmem:[#allocation2 + $0x258] sm:$0xff] }
 0x62c   :  { %3167 = vmatprep.mubr.msk.f32.mxu1 %vm3874_vm0, %v3875_v1  ;;  %v1325_v62 = vmul.f32 %v3771_v61, %v4449_v53 }
 0x62e   :  { %v1492_v3 = vpop.f32.mrb[14].mxu1 }
 0x62f   :  { %2089 = vst.msk [vmem:[%s5330_s6 + $0x38] sm:$0xff] %vm2081_vm2, %v1492_v3  ;;  %v3010_v4 = vpop.f32.mrb[15].mxu1  ;;  %3168 = vmatmul.mubr.f32.gmra.mrb[120].mxu1 %v1310_v2  ;;  %v3772_v3 = vld [vmem:[#allocation2 + $0x260] sm:$0xff] }
 0x630   :  { %3170 = vmatprep.mubr.msk.f32.mxu1 %vm3874_vm0, %v3875_v1  ;;  %v1326_v4 = vmul.f32 %v3772_v3, %v4449_v53 }
 0x632   :  { %v1497_v7 = vpop.f32.mrb[16].mxu1 }
 0x633   :  { %2090 = vst.msk [vmem:[%s5330_s6 + $0x40] sm:$0xff] %vm2081_vm2, %v1497_v7  ;;  %v3013_v8 = vpop.f32.mrb[17].mxu1  ;;  %3171 = vmatmul.mubr.f32.gmra.mrb[122].mxu1 %v1311_v6  ;;  %v3773_v7 = vld [vmem:[#allocation2 + $0x268] sm:$0xff] }
 0x634   :  { %3173 = vmatprep.mubr.msk.f32.mxu1 %vm3874_vm0, %v3875_v1  ;;  %v1327_v8 = vmul.f32 %v3773_v7, %v4449_v53 }
 0x636   :  { %v1502_v11 = vpop.f32.mrb[18].mxu1 }
 0x637   :  { %2091 = vst.msk [vmem:[%s5330_s6 + $0x48] sm:$0xff] %vm2081_vm2, %v1502_v11  ;;  %v3016_v63 = vpop.f32.mrb[19].mxu1  ;;  %3174 = vmatmul.mubr.f32.gmra.mrb[124].mxu1 %v1312_v10  ;;  %v3774_v11 = vld [vmem:[#allocation2 + $0x270] sm:$0xff] }
 0x638   :  { %3176 = vmatprep.mubr.msk.f32.mxu1 %vm3874_vm0, %v3875_v1  ;;  %v1328_v63 = vmul.f32 %v3774_v11, %v4449_v53 }
 0x63a   :  { %v1507_v14 = vpop.f32.mrb[20].mxu1 }
 0x63b   :  { %2092 = vst.msk [vmem:[%s5330_s6 + $0x50] sm:$0xff] %vm2081_vm2, %v1507_v14  ;;  %v3019_v15 = vpop.f32.mrb[21].mxu1  ;;  %3177 = vmatmul.mubr.f32.gmra.mrb[126].mxu1 %v1313_v13  ;;  %v3775_v14 = vld [vmem:[#allocation2 + $0x278] sm:$0xff] }
 0x63c   :  { %3179 = vmatprep.mubr.msk.f32.mxu1 %vm3874_vm0, %v3875_v1  ;;  %v1329_v15 = vmul.f32 %v3775_v14, %v4449_v53 }
 0x63e   :  { %v1512_v18 = vpop.f32.mrb[22].mxu1 }
 0x63f   :  { %2093 = vst.msk [vmem:[%s5330_s6 + $0x58] sm:$0xff] %vm2081_vm2, %v1512_v18  ;;  %v3022_v19 = vpop.f32.mrb[23].mxu1  ;;  %3180 = vmatmul.mubr.f32.gmra.mrb[128].mxu1 %v1314_v17  ;;  %v3776_v18 = vld [vmem:[#allocation2 + $0x280] sm:$0xff] }
 0x640   :  { %3182 = vmatprep.mubr.msk.f32.mxu1 %vm3874_vm0, %v3875_v1  ;;  %v1330_v19 = vmul.f32 %v3776_v18, %v4449_v53 }
 0x642   :  { %v1517_v22 = vpop.f32.mrb[24].mxu1 }
 0x643   :  { %2094 = vst.msk [vmem:[%s5330_s6 + $0x60] sm:$0xff] %vm2081_vm2, %v1517_v22  ;;  %v3025_v23 = vpop.f32.mrb[25].mxu1  ;;  %3183 = vmatmul.mubr.f32.gmra.mrb[130].mxu1 %v1315_v21  ;;  %v3777_v22 = vld [vmem:[#allocation2 + $0x288] sm:$0xff] }
 0x644   :  { %3185 = vmatprep.mubr.msk.f32.mxu1 %vm3874_vm0, %v3875_v1  ;;  %v1331_v23 = vmul.f32 %v3777_v22, %v4449_v53 }
 0x646   :  { %v1522_v27 = vpop.f32.mrb[26].mxu1 }
 0x647   :  { %2095 = vst.msk [vmem:[%s5330_s6 + $0x68] sm:$0xff] %vm2081_vm2, %v1522_v27  ;;  %v3028_v28 = vpop.f32.mrb[27].mxu1  ;;  %3186 = vmatmul.mubr.f32.gmra.mrb[132].mxu1 %v1316_v26  ;;  %v3778_v27 = vld [vmem:[#allocation2 + $0x290] sm:$0xff] }
 0x648   :  { %3188 = vmatprep.mubr.msk.f32.mxu1 %vm3874_vm0, %v3875_v1  ;;  %v1332_v28 = vmul.f32 %v3778_v27, %v4449_v53 }
 0x64a   :  { %v1527_v31 = vpop.f32.mrb[28].mxu1 }
 0x64b   :  { %2096 = vst.msk [vmem:[%s5330_s6 + $0x70] sm:$0xff] %vm2081_vm2, %v1527_v31  ;;  %v3031_v32 = vpop.f32.mrb[29].mxu1  ;;  %3189 = vmatmul.mubr.f32.gmra.mrb[134].mxu1 %v1317_v30  ;;  %v3779_v31 = vld [vmem:[#allocation2 + $0x298] sm:$0xff] }
 0x64c   :  { %3191 = vmatprep.mubr.msk.f32.mxu1 %vm3874_vm0, %v3875_v1  ;;  %v1333_v32 = vmul.f32 %v3779_v31, %v4449_v53 }
 0x64e   :  { %v1532_v35 = vpop.f32.mrb[30].mxu1 }
 0x64f   :  { %2097 = vst.msk [vmem:[%s5330_s6 + $0x78] sm:$0xff] %vm2081_vm2, %v1532_v35  ;;  %v3034_v36 = vpop.f32.mrb[31].mxu1  ;;  %3192 = vmatmul.mubr.f32.gmra.mrb[136].mxu1 %v1318_v34  ;;  %v3780_v35 = vld [vmem:[#allocation2 + $0x2a0] sm:$0xff] }
 0x650   :  { %3194 = vmatprep.mubr.msk.f32.mxu1 %vm3874_vm0, %v3875_v1  ;;  %v1334_v36 = vmul.f32 %v3780_v35, %v4449_v53 }
 0x652   :  { %v1537_v39 = vpop.f32.mrb[32].mxu1 }
 0x653   :  { %2098 = vst.msk [vmem:[%s5330_s6 + $0x80] sm:$0xff] %vm2081_vm2, %v1537_v39  ;;  %v3037_v40 = vpop.f32.mrb[33].mxu1  ;;  %3195 = vmatmul.mubr.f32.gmra.mrb[138].mxu1 %v1319_v38  ;;  %v3781_v39 = vld [vmem:[#allocation2 + $0x2a8] sm:$0xff] }
 0x654   :  { %3197 = vmatprep.mubr.msk.f32.mxu1 %vm3874_vm0, %v3875_v1  ;;  %v1335_v40 = vmul.f32 %v3781_v39, %v4449_v53 }
 0x656   :  { %v1542_v43 = vpop.f32.mrb[34].mxu1 }
 0x657   :  { %2099 = vst.msk [vmem:[%s5330_s6 + $0x88] sm:$0xff] %vm2081_vm2, %v1542_v43  ;;  %v3040_v44 = vpop.f32.mrb[35].mxu1  ;;  %3198 = vmatmul.mubr.f32.gmra.mrb[140].mxu1 %v1320_v42  ;;  %v3782_v43 = vld [vmem:[#allocation2 + $0x2b0] sm:$0xff] }
 0x658   :  { %3200 = vmatprep.mubr.msk.f32.mxu1 %vm3874_vm0, %v3875_v1  ;;  %v1336_v44 = vmul.f32 %v3782_v43, %v4449_v53 }
 0x65a   :  { %v1547_v47 = vpop.f32.mrb[36].mxu1 }
 0x65b   :  { %2100 = vst.msk [vmem:[%s5330_s6 + $0x90] sm:$0xff] %vm2081_vm2, %v1547_v47  ;;  %v3043_v48 = vpop.f32.mrb[37].mxu1  ;;  %3201 = vmatmul.mubr.f32.gmra.mrb[142].mxu1 %v1321_v46  ;;  %v3783_v47 = vld [vmem:[#allocation2 + $0x2b8] sm:$0xff] }
 0x65c   :  { %3203 = vmatprep.mubr.msk.f32.mxu1 %vm3874_vm0, %v3875_v1  ;;  %v1337_v48 = vmul.f32 %v3783_v47, %v4449_v53 }
 0x65e   :  { %v1552_v51 = vpop.f32.mrb[38].mxu1 }
 0x65f   :  { %2101 = vst.msk [vmem:[%s5330_s6 + $0x98] sm:$0xff] %vm2081_vm2, %v1552_v51  ;;  %v3046_v52 = vpop.f32.mrb[39].mxu1  ;;  %3204 = vmatmul.mubr.f32.gmra.mrb[144].mxu1 %v1322_v50  ;;  %v3784_v51 = vld [vmem:[#allocation2 + $0x2c0] sm:$0xff] }
 0x660   :  { %3206 = vmatprep.mubr.msk.f32.mxu1 %vm3874_vm0, %v3875_v1  ;;  %v1338_v52 = vmul.f32 %v3784_v51, %v4449_v53 }
 0x662   :  { %v1557_v55 = vpop.f32.mrb[40].mxu1 }
 0x663   :  { %2102 = vst.msk [vmem:[%s5330_s6 + $0xa0] sm:$0xff] %vm2081_vm2, %v1557_v55  ;;  %v3049_v56 = vpop.f32.mrb[41].mxu1  ;;  %3207 = vmatmul.mubr.f32.gmra.mrb[146].mxu1 %v1323_v54  ;;  %v3785_v55 = vld [vmem:[#allocation2 + $0x2c8] sm:$0xff] }
 0x664   :  { %3209 = vmatprep.mubr.msk.f32.mxu1 %vm3874_vm0, %v3875_v1  ;;  %v1339_v56 = vmul.f32 %v3785_v55, %v4449_v53 }
 0x666   :  { %v1562_v59 = vpop.f32.mrb[42].mxu1 }
 0x667   :  { %2103 = vst.msk [vmem:[%s5330_s6 + $0xa8] sm:$0xff] %vm2081_vm2, %v1562_v59  ;;  %v3052_v60 = vpop.f32.mrb[43].mxu1  ;;  %3210 = vmatmul.mubr.f32.gmra.mrb[148].mxu1 %v1324_v58  ;;  %v3786_v59 = vld [vmem:[#allocation2 + $0x2d0] sm:$0xff] }
 0x668   :  { %3212 = vmatprep.mubr.msk.f32.mxu1 %vm3874_vm0, %v3875_v1  ;;  %v1340_v60 = vmul.f32 %v3786_v59, %v4449_v53 }
 0x66a   :  { %v1567_v24 = vpop.f32.mrb[44].mxu1 }
 0x66b   :  { %2104 = vst.msk [vmem:[%s5330_s6 + $0xb0] sm:$0xff] %vm2081_vm2, %v1567_v24  ;;  %v3055_v2 = vpop.f32.mrb[45].mxu1  ;;  %3213 = vmatmul.mubr.f32.gmra.mrb[150].mxu1 %v1325_v62  ;;  %v3787_v24 = vld [vmem:[#allocation2 + $0x2d8] sm:$0xff] }
 0x66c   :  { %3215 = vmatprep.mubr.msk.f32.mxu1 %vm3874_vm0, %v3875_v1  ;;  %v1341_v2 = vmul.f32 %v3787_v24, %v4449_v53 }
 0x66e   :  { %v1572_v5 = vpop.f32.mrb[46].mxu1 }
 0x66f   :  { %2105 = vst.msk [vmem:[%s5330_s6 + $0xb8] sm:$0xff] %vm2081_vm2, %v1572_v5  ;;  %v3058_v6 = vpop.f32.mrb[47].mxu1  ;;  %3216 = vmatmul.mubr.f32.gmra.mrb[152].mxu1 %v1326_v4  ;;  %v3788_v5 = vld [vmem:[#allocation2 + $0x2e0] sm:$0xff] }
 0x670   :  { %3218 = vmatprep.mubr.msk.f32.mxu1 %vm3874_vm0, %v3875_v1  ;;  %v1342_v6 = vmul.f32 %v3788_v5, %v4449_v53 }
 0x672   :  { %v1577_v9 = vpop.f32.mrb[48].mxu1 }
 0x673   :  { %2106 = vst.msk [vmem:[%s5330_s6 + $0xc0] sm:$0xff] %vm2081_vm2, %v1577_v9  ;;  %v3061_v10 = vpop.f32.mrb[49].mxu1  ;;  %3219 = vmatmul.mubr.f32.gmra.mrb[154].mxu1 %v1327_v8  ;;  %v3789_v9 = vld [vmem:[#allocation2 + $0x2e8] sm:$0xff] }
 0x674   :  { %3221 = vmatprep.mubr.msk.f32.mxu1 %vm3874_vm0, %v3875_v1  ;;  %v1343_v10 = vmul.f32 %v3789_v9, %v4449_v53 }
 0x676   :  { %v1582_v12 = vpop.f32.mrb[50].mxu1 }
 0x677   :  { %2107 = vst.msk [vmem:[%s5330_s6 + $0xc8] sm:$0xff] %vm2081_vm2, %v1582_v12  ;;  %v3064_v13 = vpop.f32.mrb[51].mxu1  ;;  %3222 = vmatmul.mubr.f32.gmra.mrb[156].mxu1 %v1328_v63  ;;  %v3790_v12 = vld [vmem:[#allocation2 + $0x2f0] sm:$0xff] }
 0x678   :  { %3224 = vmatprep.mubr.msk.f32.mxu1 %vm3874_vm0, %v3875_v1  ;;  %v1344_v13 = vmul.f32 %v3790_v12, %v4449_v53 }
 0x67a   :  { %v1587_v16 = vpop.f32.mrb[52].mxu1 }
 0x67b   :  { %2108 = vst.msk [vmem:[%s5330_s6 + $0xd0] sm:$0xff] %vm2081_vm2, %v1587_v16  ;;  %v3067_v17 = vpop.f32.mrb[53].mxu1  ;;  %3225 = vmatmul.mubr.f32.gmra.mrb[158].mxu1 %v1329_v15  ;;  %v3791_v16 = vld [vmem:[#allocation2 + $0x2f8] sm:$0xff] }
 0x67c   :  { %3227 = vmatprep.mubr.msk.f32.mxu1 %vm3874_vm0, %v3875_v1  ;;  %v1345_v17 = vmul.f32 %v3791_v16, %v4449_v53 }
 0x67e   :  { %v1592_v20 = vpop.f32.mrb[54].mxu1 }
 0x67f   :  { %2109 = vst.msk [vmem:[%s5330_s6 + $0xd8] sm:$0xff] %vm2081_vm2, %v1592_v20  ;;  %v3070_v21 = vpop.f32.mrb[55].mxu1  ;;  %3228 = vmatmul.mubr.f32.gmra.mrb[160].mxu1 %v1330_v19  ;;  %v3792_v20 = vld [vmem:[#allocation2 + $0x300] sm:$0xff] }
 0x680   :  { %3230 = vmatprep.mubr.msk.f32.mxu1 %vm3874_vm0, %v3875_v1  ;;  %v1346_v21 = vmul.f32 %v3792_v20, %v4449_v53 }
 0x682   :  { %v1597_v25 = vpop.f32.mrb[56].mxu1 }
 0x683   :  { %2110 = vst.msk [vmem:[%s5330_s6 + $0xe0] sm:$0xff] %vm2081_vm2, %v1597_v25  ;;  %v3073_v26 = vpop.f32.mrb[57].mxu1  ;;  %3231 = vmatmul.mubr.f32.gmra.mrb[162].mxu1 %v1331_v23  ;;  %v3793_v25 = vld [vmem:[#allocation2 + $0x308] sm:$0xff] }
 0x684   :  { %3233 = vmatprep.mubr.msk.f32.mxu1 %vm3874_vm0, %v3875_v1  ;;  %v1347_v26 = vmul.f32 %v3793_v25, %v4449_v53 }
 0x686   :  { %v1602_v29 = vpop.f32.mrb[58].mxu1 }
 0x687   :  { %2111 = vst.msk [vmem:[%s5330_s6 + $0xe8] sm:$0xff] %vm2081_vm2, %v1602_v29  ;;  %v3076_v30 = vpop.f32.mrb[59].mxu1  ;;  %3234 = vmatmul.mubr.f32.gmra.mrb[164].mxu1 %v1332_v28  ;;  %v3794_v29 = vld [vmem:[#allocation2 + $0x310] sm:$0xff] }
 0x688   :  { %3236 = vmatprep.mubr.msk.f32.mxu1 %vm3874_vm0, %v3875_v1  ;;  %v1348_v30 = vmul.f32 %v3794_v29, %v4449_v53 }
 0x68a   :  { %v1607_v33 = vpop.f32.mrb[60].mxu1 }
 0x68b   :  { %2112 = vst.msk [vmem:[%s5330_s6 + $0xf0] sm:$0xff] %vm2081_vm2, %v1607_v33  ;;  %v3079_v34 = vpop.f32.mrb[61].mxu1  ;;  %3237 = vmatmul.mubr.f32.gmra.mrb[166].mxu1 %v1333_v32  ;;  %v3795_v33 = vld [vmem:[#allocation2 + $0x318] sm:$0xff] }
 0x68c   :  { %3239 = vmatprep.mubr.msk.f32.mxu1 %vm3874_vm0, %v3875_v1  ;;  %v1349_v34 = vmul.f32 %v3795_v33, %v4449_v53 }
 0x68e   :  { %v1612_v37 = vpop.f32.mrb[62].mxu1 }
 0x68f   :  { %2113 = vst.msk [vmem:[%s5330_s6 + $0xf8] sm:$0xff] %vm2081_vm2, %v1612_v37  ;;  %v3082_v38 = vpop.f32.mrb[63].mxu1  ;;  %3240 = vmatmul.mubr.f32.gmra.mrb[168].mxu1 %v1334_v36  ;;  %v3796_v37 = vld [vmem:[#allocation2 + $0x320] sm:$0xff] }
 0x690   :  { %3242 = vmatprep.mubr.msk.f32.mxu1 %vm3874_vm0, %v3875_v1  ;;  %v1350_v38 = vmul.f32 %v3796_v37, %v4449_v53 }
 0x692   :  { %v1617_v41 = vpop.f32.mrb[64].mxu1 }
 0x693   :  { %2114 = vst.msk [vmem:[%s5330_s6 + $0x100] sm:$0xff] %vm2081_vm2, %v1617_v41  ;;  %v3085_v42 = vpop.f32.mrb[65].mxu1  ;;  %3243 = vmatmul.mubr.f32.gmra.mrb[170].mxu1 %v1335_v40  ;;  %v3797_v41 = vld [vmem:[#allocation2 + $0x328] sm:$0xff] }
 0x694   :  { %3245 = vmatprep.mubr.msk.f32.mxu1 %vm3874_vm0, %v3875_v1  ;;  %v1351_v42 = vmul.f32 %v3797_v41, %v4449_v53 }
 0x696   :  { %v1622_v45 = vpop.f32.mrb[66].mxu1 }
 0x697   :  { %2115 = vst.msk [vmem:[%s5330_s6 + $0x108] sm:$0xff] %vm2081_vm2, %v1622_v45  ;;  %v3088_v46 = vpop.f32.mrb[67].mxu1  ;;  %3246 = vmatmul.mubr.f32.gmra.mrb[172].mxu1 %v1336_v44  ;;  %v3798_v45 = vld [vmem:[#allocation2 + $0x330] sm:$0xff] }
 0x698   :  { %3248 = vmatprep.mubr.msk.f32.mxu1 %vm3874_vm0, %v3875_v1  ;;  %v1352_v46 = vmul.f32 %v3798_v45, %v4449_v53 }
 0x69a   :  { %v1627_v49 = vpop.f32.mrb[68].mxu1 }
 0x69b   :  { %2116 = vst.msk [vmem:[%s5330_s6 + $0x110] sm:$0xff] %vm2081_vm2, %v1627_v49  ;;  %v3091_v50 = vpop.f32.mrb[69].mxu1  ;;  %3249 = vmatmul.mubr.f32.gmra.mrb[174].mxu1 %v1337_v48  ;;  %v3799_v49 = vld [vmem:[#allocation2 + $0x338] sm:$0xff] }
 0x69c   :  { %3251 = vmatprep.mubr.msk.f32.mxu1 %vm3874_vm0, %v3875_v1  ;;  %v1353_v50 = vmul.f32 %v3799_v49, %v4449_v53 }
 0x69e   :  { %v1632_v0 = vpop.f32.mrb[70].mxu1 }
 0x69f   :  { %2117 = vst.msk [vmem:[%s5330_s6 + $0x118] sm:$0xff] %vm2081_vm2, %v1632_v0  ;;  %v3094_v54 = vpop.f32.mrb[71].mxu1  ;;  %3252 = vmatmul.mubr.f32.gmra.mrb[176].mxu1 %v1338_v52  ;;  %v3800_v0 = vld [vmem:[#allocation2 + $0x340] sm:$0xff] }
 0x6a0   :  { %3254 = vmatprep.mubr.msk.f32.mxu1 %vm3874_vm0, %v3875_v1  ;;  %v1354_v54 = vmul.f32 %v3800_v0, %v4449_v53 }
 0x6a2   :  { %v1637_v57 = vpop.f32.mrb[72].mxu1 }
 0x6a3   :  { %2118 = vst.msk [vmem:[%s5330_s6 + $0x120] sm:$0xff] %vm2081_vm2, %v1637_v57  ;;  %v3097_v58 = vpop.f32.mrb[73].mxu1  ;;  %3255 = vmatmul.mubr.f32.gmra.mrb[178].mxu1 %v1339_v56  ;;  %v3801_v57 = vld [vmem:[#allocation2 + $0x348] sm:$0xff] }
 0x6a4   :  { %3257 = vmatprep.mubr.msk.f32.mxu1 %vm3874_vm0, %v3875_v1  ;;  %v1355_v58 = vmul.f32 %v3801_v57, %v4449_v53 }
 0x6a6   :  { %v1642_v61 = vpop.f32.mrb[74].mxu1 }
 0x6a7   :  { %2119 = vst.msk [vmem:[%s5330_s6 + $0x128] sm:$0xff] %vm2081_vm2, %v1642_v61  ;;  %v3100_v62 = vpop.f32.mrb[75].mxu1  ;;  %3258 = vmatmul.mubr.f32.gmra.mrb[180].mxu1 %v1340_v60  ;;  %v3802_v61 = vld [vmem:[#allocation2 + $0x350] sm:$0xff] }
 0x6a8   :  { %3260 = vmatprep.mubr.msk.f32.mxu1 %vm3874_vm0, %v3875_v1  ;;  %v1356_v62 = vmul.f32 %v3802_v61, %v4449_v53 }
 0x6aa   :  { %v1647_v3 = vpop.f32.mrb[76].mxu1 }
 0x6ab   :  { %2120 = vst.msk [vmem:[%s5330_s6 + $0x130] sm:$0xff] %vm2081_vm2, %v1647_v3  ;;  %v3103_v4 = vpop.f32.mrb[77].mxu1  ;;  %3261 = vmatmul.mubr.f32.gmra.mrb[182].mxu1 %v1341_v2  ;;  %v3803_v3 = vld [vmem:[#allocation2 + $0x358] sm:$0xff] }
 0x6ac   :  { %3263 = vmatprep.mubr.msk.f32.mxu1 %vm3874_vm0, %v3875_v1  ;;  %v1357_v4 = vmul.f32 %v3803_v3, %v4449_v53 }
 0x6ae   :  { %v1652_v7 = vpop.f32.mrb[78].mxu1 }
 0x6af   :  { %2121 = vst.msk [vmem:[%s5330_s6 + $0x138] sm:$0xff] %vm2081_vm2, %v1652_v7  ;;  %v3106_v8 = vpop.f32.mrb[79].mxu1  ;;  %3264 = vmatmul.mubr.f32.gmra.mrb[184].mxu1 %v1342_v6  ;;  %v3804_v7 = vld [vmem:[#allocation2 + $0x360] sm:$0xff] }
 0x6b0   :  { %3266 = vmatprep.mubr.msk.f32.mxu1 %vm3874_vm0, %v3875_v1  ;;  %v1358_v8 = vmul.f32 %v3804_v7, %v4449_v53 }
 0x6b2   :  { %v1657_v11 = vpop.f32.mrb[80].mxu1 }
 0x6b3   :  { %2122 = vst.msk [vmem:[%s5330_s6 + $0x140] sm:$0xff] %vm2081_vm2, %v1657_v11  ;;  %v3109_v63 = vpop.f32.mrb[81].mxu1  ;;  %3267 = vmatmul.mubr.f32.gmra.mrb[186].mxu1 %v1343_v10  ;;  %v3805_v11 = vld [vmem:[#allocation2 + $0x368] sm:$0xff] }
 0x6b4   :  { %3269 = vmatprep.mubr.msk.f32.mxu1 %vm3874_vm0, %v3875_v1  ;;  %v1359_v63 = vmul.f32 %v3805_v11, %v4449_v53 }
 0x6b6   :  { %v1662_v14 = vpop.f32.mrb[82].mxu1 }
 0x6b7   :  { %2123 = vst.msk [vmem:[%s5330_s6 + $0x148] sm:$0xff] %vm2081_vm2, %v1662_v14  ;;  %v3112_v15 = vpop.f32.mrb[83].mxu1  ;;  %3270 = vmatmul.mubr.f32.gmra.mrb[188].mxu1 %v1344_v13  ;;  %v3806_v14 = vld [vmem:[#allocation2 + $0x370] sm:$0xff] }
 0x6b8   :  { %3272 = vmatprep.mubr.msk.f32.mxu1 %vm3874_vm0, %v3875_v1  ;;  %v1360_v15 = vmul.f32 %v3806_v14, %v4449_v53 }
 0x6ba   :  { %v1667_v18 = vpop.f32.mrb[84].mxu1 }
 0x6bb   :  { %2124 = vst.msk [vmem:[%s5330_s6 + $0x150] sm:$0xff] %vm2081_vm2, %v1667_v18  ;;  %v3115_v19 = vpop.f32.mrb[85].mxu1  ;;  %3273 = vmatmul.mubr.f32.gmra.mrb[190].mxu1 %v1345_v17  ;;  %v3807_v18 = vld [vmem:[#allocation2 + $0x378] sm:$0xff] }
 0x6bc   :  { %3275 = vmatprep.mubr.msk.f32.mxu1 %vm3874_vm0, %v3875_v1  ;;  %v1361_v19 = vmul.f32 %v3807_v18, %v4449_v53 }
 0x6be   :  { %v1672_v22 = vpop.f32.mrb[86].mxu1 }
 0x6bf   :  { %2125 = vst.msk [vmem:[%s5330_s6 + $0x158] sm:$0xff] %vm2081_vm2, %v1672_v22  ;;  %v3118_v23 = vpop.f32.mrb[87].mxu1  ;;  %3276 = vmatmul.mubr.f32.gmra.mrb[192].mxu1 %v1346_v21  ;;  %v3808_v22 = vld [vmem:[#allocation2 + $0x380] sm:$0xff] }
 0x6c0   :  { %3278 = vmatprep.mubr.msk.f32.mxu1 %vm3874_vm0, %v3875_v1  ;;  %v1362_v23 = vmul.f32 %v3808_v22, %v4449_v53 }
 0x6c2   :  { %v1677_v27 = vpop.f32.mrb[88].mxu1 }
 0x6c3   :  { %2126 = vst.msk [vmem:[%s5330_s6 + $0x160] sm:$0xff] %vm2081_vm2, %v1677_v27  ;;  %v3121_v28 = vpop.f32.mrb[89].mxu1  ;;  %3279 = vmatmul.mubr.f32.gmra.mrb[194].mxu1 %v1347_v26  ;;  %v3809_v27 = vld [vmem:[#allocation2 + $0x388] sm:$0xff] }
 0x6c4   :  { %3281 = vmatprep.mubr.msk.f32.mxu1 %vm3874_vm0, %v3875_v1  ;;  %v1363_v28 = vmul.f32 %v3809_v27, %v4449_v53 }
 0x6c6   :  { %v1682_v31 = vpop.f32.mrb[90].mxu1 }
 0x6c7   :  { %2127 = vst.msk [vmem:[%s5330_s6 + $0x168] sm:$0xff] %vm2081_vm2, %v1682_v31  ;;  %v3124_v32 = vpop.f32.mrb[91].mxu1  ;;  %3282 = vmatmul.mubr.f32.gmra.mrb[196].mxu1 %v1348_v30  ;;  %v3810_v31 = vld [vmem:[#allocation2 + $0x390] sm:$0xff] }
 0x6c8   :  { %3284 = vmatprep.mubr.msk.f32.mxu1 %vm3874_vm0, %v3875_v1  ;;  %v1364_v32 = vmul.f32 %v3810_v31, %v4449_v53 }
 0x6ca   :  { %v1687_v35 = vpop.f32.mrb[92].mxu1 }
 0x6cb   :  { %2128 = vst.msk [vmem:[%s5330_s6 + $0x170] sm:$0xff] %vm2081_vm2, %v1687_v35  ;;  %v3127_v36 = vpop.f32.mrb[93].mxu1  ;;  %3285 = vmatmul.mubr.f32.gmra.mrb[198].mxu1 %v1349_v34  ;;  %v3811_v35 = vld [vmem:[#allocation2 + $0x398] sm:$0xff] }
 0x6cc   :  { %3287 = vmatprep.mubr.msk.f32.mxu1 %vm3874_vm0, %v3875_v1  ;;  %v1365_v36 = vmul.f32 %v3811_v35, %v4449_v53 }
 0x6ce   :  { %v1692_v39 = vpop.f32.mrb[94].mxu1 }
 0x6cf   :  { %2129 = vst.msk [vmem:[%s5330_s6 + $0x178] sm:$0xff] %vm2081_vm2, %v1692_v39  ;;  %v3130_v40 = vpop.f32.mrb[95].mxu1  ;;  %3288 = vmatmul.mubr.f32.gmra.mrb[200].mxu1 %v1350_v38  ;;  %v3812_v39 = vld [vmem:[#allocation2 + $0x3a0] sm:$0xff] }
 0x6d0   :  { %3290 = vmatprep.mubr.msk.f32.mxu1 %vm3874_vm0, %v3875_v1  ;;  %v1366_v40 = vmul.f32 %v3812_v39, %v4449_v53 }
 0x6d2   :  { %v1697_v43 = vpop.f32.mrb[96].mxu1 }
 0x6d3   :  { %2130 = vst.msk [vmem:[%s5330_s6 + $0x180] sm:$0xff] %vm2081_vm2, %v1697_v43  ;;  %v3133_v44 = vpop.f32.mrb[97].mxu1  ;;  %3291 = vmatmul.mubr.f32.gmra.mrb[202].mxu1 %v1351_v42  ;;  %v3813_v43 = vld [vmem:[#allocation2 + $0x3a8] sm:$0xff] }
 0x6d4   :  { %3293 = vmatprep.mubr.msk.f32.mxu1 %vm3874_vm0, %v3875_v1  ;;  %v1367_v44 = vmul.f32 %v3813_v43, %v4449_v53 }
 0x6d6   :  { %v1702_v47 = vpop.f32.mrb[98].mxu1 }
 0x6d7   :  { %2131 = vst.msk [vmem:[%s5330_s6 + $0x188] sm:$0xff] %vm2081_vm2, %v1702_v47  ;;  %v3136_v48 = vpop.f32.mrb[99].mxu1  ;;  %3294 = vmatmul.mubr.f32.gmra.mrb[204].mxu1 %v1352_v46  ;;  %v3814_v47 = vld [vmem:[#allocation2 + $0x3b0] sm:$0xff] }
 0x6d8   :  { %3296 = vmatprep.mubr.msk.f32.mxu1 %vm3874_vm0, %v3875_v1  ;;  %v1368_v48 = vmul.f32 %v3814_v47, %v4449_v53 }
 0x6da   :  { %v1707_v51 = vpop.f32.mrb[100].mxu1 }
 0x6db   :  { %2132 = vst.msk [vmem:[%s5330_s6 + $0x190] sm:$0xff] %vm2081_vm2, %v1707_v51  ;;  %v3139_v52 = vpop.f32.mrb[101].mxu1  ;;  %3297 = vmatmul.mubr.f32.gmra.mrb[206].mxu1 %v1353_v50  ;;  %v3815_v51 = vld [vmem:[#allocation2 + $0x3b8] sm:$0xff] }
 0x6dc   :  { %3299 = vmatprep.mubr.msk.f32.mxu1 %vm3874_vm0, %v3875_v1  ;;  %v1369_v52 = vmul.f32 %v3815_v51, %v4449_v53 }
 0x6de   :  { %v1712_v55 = vpop.f32.mrb[102].mxu1 }
 0x6df   :  { %2133 = vst.msk [vmem:[%s5330_s6 + $0x198] sm:$0xff] %vm2081_vm2, %v1712_v55  ;;  %v3142_v56 = vpop.f32.mrb[103].mxu1  ;;  %3300 = vmatmul.mubr.f32.gmra.mrb[208].mxu1 %v1354_v54  ;;  %v3816_v55 = vld [vmem:[#allocation2 + $0x3c0] sm:$0xff] }
 0x6e0   :  { %3302 = vmatprep.mubr.msk.f32.mxu1 %vm3874_vm0, %v3875_v1  ;;  %v1370_v56 = vmul.f32 %v3816_v55, %v4449_v53 }
 0x6e2   :  { %v1717_v59 = vpop.f32.mrb[104].mxu1 }
 0x6e3   :  { %2134 = vst.msk [vmem:[%s5330_s6 + $0x1a0] sm:$0xff] %vm2081_vm2, %v1717_v59  ;;  %v3145_v60 = vpop.f32.mrb[105].mxu1  ;;  %3303 = vmatmul.mubr.f32.gmra.mrb[210].mxu1 %v1355_v58  ;;  %v3817_v59 = vld [vmem:[#allocation2 + $0x3c8] sm:$0xff] }
 0x6e4   :  { %3305 = vmatprep.mubr.msk.f32.mxu1 %vm3874_vm0, %v3875_v1  ;;  %v1371_v60 = vmul.f32 %v3817_v59, %v4449_v53 }
 0x6e6   :  { %v1722_v24 = vpop.f32.mrb[106].mxu1 }
 0x6e7   :  { %2135 = vst.msk [vmem:[%s5330_s6 + $0x1a8] sm:$0xff] %vm2081_vm2, %v1722_v24  ;;  %v3148_v2 = vpop.f32.mrb[107].mxu1  ;;  %3306 = vmatmul.mubr.f32.gmra.mrb[212].mxu1 %v1356_v62  ;;  %v3818_v24 = vld [vmem:[#allocation2 + $0x3d0] sm:$0xff] }
 0x6e8   :  { %3308 = vmatprep.mubr.msk.f32.mxu1 %vm3874_vm0, %v3875_v1  ;;  %v1372_v2 = vmul.f32 %v3818_v24, %v4449_v53 }
 0x6ea   :  { %v1727_v5 = vpop.f32.mrb[108].mxu1 }
 0x6eb   :  { %2136 = vst.msk [vmem:[%s5330_s6 + $0x1b0] sm:$0xff] %vm2081_vm2, %v1727_v5  ;;  %v3151_v6 = vpop.f32.mrb[109].mxu1  ;;  %3309 = vmatmul.mubr.f32.gmra.mrb[214].mxu1 %v1357_v4  ;;  %v3819_v5 = vld [vmem:[#allocation2 + $0x3d8] sm:$0xff] }
 0x6ec   :  { %3311 = vmatprep.mubr.msk.f32.mxu1 %vm3874_vm0, %v3875_v1  ;;  %v1373_v6 = vmul.f32 %v3819_v5, %v4449_v53 }
 0x6ee   :  { %v1732_v9 = vpop.f32.mrb[110].mxu1 }
 0x6ef   :  { %2137 = vst.msk [vmem:[%s5330_s6 + $0x1b8] sm:$0xff] %vm2081_vm2, %v1732_v9  ;;  %v3154_v10 = vpop.f32.mrb[111].mxu1  ;;  %3312 = vmatmul.mubr.f32.gmra.mrb[216].mxu1 %v1358_v8  ;;  %v3820_v9 = vld [vmem:[#allocation2 + $0x3e0] sm:$0xff] }
 0x6f0   :  { %3314 = vmatprep.mubr.msk.f32.mxu1 %vm3874_vm0, %v3875_v1  ;;  %v1374_v10 = vmul.f32 %v3820_v9, %v4449_v53 }
 0x6f2   :  { %v1737_v12 = vpop.f32.mrb[112].mxu1 }
 0x6f3   :  { %2138 = vst.msk [vmem:[%s5330_s6 + $0x1c0] sm:$0xff] %vm2081_vm2, %v1737_v12  ;;  %v3157_v13 = vpop.f32.mrb[113].mxu1  ;;  %3315 = vmatmul.mubr.f32.gmra.mrb[218].mxu1 %v1359_v63 }
 0x6f4   :  { %3317 = vmatprep.mubr.msk.f32.mxu1 %vm3874_vm0, %v3875_v1 }
 0x6f6   :  { %v1742_v16 = vpop.f32.mrb[114].mxu1 }
 0x6f7   :  { %2139 = vst.msk [vmem:[%s5330_s6 + $0x1c8] sm:$0xff] %vm2081_vm2, %v1742_v16  ;;  %v3160_v17 = vpop.f32.mrb[115].mxu1  ;;  %3318 = vmatmul.mubr.f32.gmra.mrb[220].mxu1 %v1360_v15 }
 0x6f8   :  { %3320 = vmatprep.mubr.msk.f32.mxu1 %vm3874_vm0, %v3875_v1 }
 0x6fa   :  { %v1747_v20 = vpop.f32.mrb[116].mxu1 }
 0x6fb   :  { %2140 = vst.msk [vmem:[%s5330_s6 + $0x1d0] sm:$0xff] %vm2081_vm2, %v1747_v20  ;;  %v3163_v21 = vpop.f32.mrb[117].mxu1  ;;  %3321 = vmatmul.mubr.f32.gmra.mrb[222].mxu1 %v1361_v19 }
 0x6fc   :  { %3323 = vmatprep.mubr.msk.f32.mxu1 %vm3874_vm0, %v3875_v1 }
 0x6fe   :  { %v1752_v25 = vpop.f32.mrb[118].mxu1 }
 0x6ff   :  { %2141 = vst.msk [vmem:[%s5330_s6 + $0x1d8] sm:$0xff] %vm2081_vm2, %v1752_v25  ;;  %v3166_v26 = vpop.f32.mrb[119].mxu1  ;;  %3324 = vmatmul.mubr.f32.gmra.mrb[224].mxu1 %v1362_v23 }
 0x700   :  { %3326 = vmatprep.mubr.msk.f32.mxu1 %vm3874_vm0, %v3875_v1 }
 0x702   :  { %v1757_v29 = vpop.f32.mrb[120].mxu1 }
 0x703   :  { %2142 = vst.msk [vmem:[%s5330_s6 + $0x1e0] sm:$0xff] %vm2081_vm2, %v1757_v29  ;;  %v3169_v30 = vpop.f32.mrb[121].mxu1  ;;  %3327 = vmatmul.mubr.f32.gmra.mrb[226].mxu1 %v1363_v28 }
 0x704   :  { %3329 = vmatprep.mubr.msk.f32.mxu1 %vm3874_vm0, %v3875_v1 }
 0x706   :  { %v1762_v33 = vpop.f32.mrb[122].mxu1 }
 0x707   :  { %2143 = vst.msk [vmem:[%s5330_s6 + $0x1e8] sm:$0xff] %vm2081_vm2, %v1762_v33  ;;  %v3172_v34 = vpop.f32.mrb[123].mxu1  ;;  %3330 = vmatmul.mubr.f32.gmra.mrb[228].mxu1 %v1364_v32 }
 0x708   :  { %3332 = vmatprep.mubr.msk.f32.mxu1 %vm3874_vm0, %v3875_v1 }
 0x70a   :  { %v1767_v37 = vpop.f32.mrb[124].mxu1 }
 0x70b   :  { %2144 = vst.msk [vmem:[%s5330_s6 + $0x1f0] sm:$0xff] %vm2081_vm2, %v1767_v37  ;;  %v3175_v38 = vpop.f32.mrb[125].mxu1  ;;  %3333 = vmatmul.mubr.f32.gmra.mrb[230].mxu1 %v1365_v36 }
 0x70c   :  { %3335 = vmatprep.mubr.msk.f32.mxu1 %vm3874_vm0, %v3875_v1 }
 0x70e   :  { %v1772_v41 = vpop.f32.mrb[126].mxu1 }
 0x70f   :  { %2145 = vst.msk [vmem:[%s5330_s6 + $0x1f8] sm:$0xff] %vm2081_vm2, %v1772_v41  ;;  %v3178_v42 = vpop.f32.mrb[127].mxu1  ;;  %3336 = vmatmul.mubr.f32.gmra.mrb[232].mxu1 %v1366_v40 }
 0x710   :  { %3338 = vmatprep.mubr.msk.f32.mxu1 %vm3874_vm0, %v3875_v1 }
 0x712   :  { %v1777_v45 = vpop.f32.mrb[128].mxu1 }
 0x713   :  { %2146 = vst.msk [vmem:[%s5330_s6 + $0x200] sm:$0xff] %vm2081_vm2, %v1777_v45  ;;  %v3181_v46 = vpop.f32.mrb[129].mxu1  ;;  %3339 = vmatmul.mubr.f32.gmra.mrb[234].mxu1 %v1367_v44 }
 0x714   :  { %3341 = vmatprep.mubr.msk.f32.mxu1 %vm3874_vm0, %v3875_v1 }
 0x716   :  { %v1782_v49 = vpop.f32.mrb[130].mxu1 }
 0x717   :  { %2147 = vst.msk [vmem:[%s5330_s6 + $0x208] sm:$0xff] %vm2081_vm2, %v1782_v49  ;;  %v3184_v50 = vpop.f32.mrb[131].mxu1  ;;  %3342 = vmatmul.mubr.f32.gmra.mrb[236].mxu1 %v1368_v48 }
 0x718   :  { %3344 = vmatprep.mubr.msk.f32.mxu1 %vm3874_vm0, %v3875_v1 }
 0x71a   :  { %v1787_v0 = vpop.f32.mrb[132].mxu1 }
 0x71b   :  { %2148 = vst.msk [vmem:[%s5330_s6 + $0x210] sm:$0xff] %vm2081_vm2, %v1787_v0  ;;  %v3187_v54 = vpop.f32.mrb[133].mxu1  ;;  %3345 = vmatmul.mubr.f32.gmra.mrb[238].mxu1 %v1369_v52 }
 0x71c   :  { %3347 = vmatprep.mubr.msk.f32.mxu1 %vm3874_vm0, %v3875_v1 }
 0x71e   :  { %v1792_v57 = vpop.f32.mrb[134].mxu1 }
 0x71f   :  { %2149 = vst.msk [vmem:[%s5330_s6 + $0x218] sm:$0xff] %vm2081_vm2, %v1792_v57  ;;  %v3190_v58 = vpop.f32.mrb[135].mxu1  ;;  %3348 = vmatmul.mubr.f32.gmra.mrb[240].mxu1 %v1370_v56 }
 0x720   :  { %3350 = vmatprep.mubr.msk.f32.mxu1 %vm3874_vm0, %v3875_v1 }
 0x722   :  { %v1797_v61 = vpop.f32.mrb[136].mxu1 }
 0x723   :  { %2150 = vst.msk [vmem:[%s5330_s6 + $0x220] sm:$0xff] %vm2081_vm2, %v1797_v61  ;;  %v3193_v62 = vpop.f32.mrb[137].mxu1  ;;  %3351 = vmatmul.mubr.f32.gmra.mrb[242].mxu1 %v1371_v60 }
 0x724   :  { %3353 = vmatprep.mubr.msk.f32.mxu1 %vm3874_vm0, %v3875_v1 }
 0x726   :  { %v1802_v3 = vpop.f32.mrb[138].mxu1 }
 0x727   :  { %2151 = vst.msk [vmem:[%s5330_s6 + $0x228] sm:$0xff] %vm2081_vm2, %v1802_v3  ;;  %v3196_v4 = vpop.f32.mrb[139].mxu1  ;;  %3354 = vmatmul.mubr.f32.gmra.mrb[244].mxu1 %v1372_v2 }
 0x728   :  { %3356 = vmatprep.mubr.msk.f32.mxu1 %vm3874_vm0, %v3875_v1 }
 0x72a   :  { %v1807_v7 = vpop.f32.mrb[140].mxu1 }
 0x72b   :  { %2152 = vst.msk [vmem:[%s5330_s6 + $0x230] sm:$0xff] %vm2081_vm2, %v1807_v7  ;;  %v3199_v8 = vpop.f32.mrb[141].mxu1  ;;  %3357 = vmatmul.mubr.f32.gmra.mrb[246].mxu1 %v1373_v6 }
 0x72c   :  { %3359 = vmatprep.mubr.msk.f32.mxu1 %vm3874_vm0, %v3875_v1 }
 0x72e   :  { %v1812_v11 = vpop.f32.mrb[142].mxu1 }
 0x72f   :  { %2153 = vst.msk [vmem:[%s5330_s6 + $0x238] sm:$0xff] %vm2081_vm2, %v1812_v11  ;;  %v3202_v63 = vpop.f32.mrb[143].mxu1  ;;  %3360 = vmatmul.mubr.f32.gmra.mrb[248].mxu1 %v1374_v10 }
 0x732   :  { %v1817_v12 = vpop.f32.mrb[144].mxu1 }
 0x733   :  { %2154 = vst.msk [vmem:[%s5330_s6 + $0x240] sm:$0xff] %vm2081_vm2, %v1817_v12  ;;  %v3205_v13 = vpop.f32.mrb[145].mxu1 }
 0x736   :  { %v1822_v14 = vpop.f32.mrb[146].mxu1 }
 0x737   :  { %2155 = vst.msk [vmem:[%s5330_s6 + $0x248] sm:$0xff] %vm2081_vm2, %v1822_v14  ;;  %v3208_v1 = vpop.f32.mrb[147].mxu1 }
 0x73a   :  { %v1827_v53 = vpop.f32.mrb[148].mxu1 }
 0x73b   :  { %2156 = vst.msk [vmem:[%s5330_s6 + $0x250] sm:$0xff] %vm2081_vm2, %v1827_v53  ;;  %v3211_v15 = vpop.f32.mrb[149].mxu1 }
 0x73e   :  { %v1832_v16 = vpop.f32.mrb[150].mxu1 }
 0x73f   :  { %2157 = vst.msk [vmem:[%s5330_s6 + $0x258] sm:$0xff] %vm2081_vm2, %v1832_v16  ;;  %v3214_v17 = vpop.f32.mrb[151].mxu1 }
 0x742   :  { %v1837_v18 = vpop.f32.mrb[152].mxu1 }
 0x743   :  { %2158 = vst.msk [vmem:[%s5330_s6 + $0x260] sm:$0xff] %vm2081_vm2, %v1837_v18  ;;  %v3217_v19 = vpop.f32.mrb[153].mxu1 }
 0x746   :  { %v1842_v20 = vpop.f32.mrb[154].mxu1 }
 0x747   :  { %2159 = vst.msk [vmem:[%s5330_s6 + $0x268] sm:$0xff] %vm2081_vm2, %v1842_v20  ;;  %v3220_v21 = vpop.f32.mrb[155].mxu1 }
 0x74a   :  { %v1847_v22 = vpop.f32.mrb[156].mxu1 }
 0x74b   :  { %2160 = vst.msk [vmem:[%s5330_s6 + $0x270] sm:$0xff] %vm2081_vm2, %v1847_v22  ;;  %v3223_v23 = vpop.f32.mrb[157].mxu1 }
 0x74e   :  { %v1852_v25 = vpop.f32.mrb[158].mxu1 }
 0x74f   :  { %2161 = vst.msk [vmem:[%s5330_s6 + $0x278] sm:$0xff] %vm2081_vm2, %v1852_v25  ;;  %v3226_v26 = vpop.f32.mrb[159].mxu1 }
 0x752   :  { %v1857_v27 = vpop.f32.mrb[160].mxu1 }
 0x753   :  { %2162 = vst.msk [vmem:[%s5330_s6 + $0x280] sm:$0xff] %vm2081_vm2, %v1857_v27  ;;  %v3229_v28 = vpop.f32.mrb[161].mxu1 }
 0x756   :  { %v1862_v29 = vpop.f32.mrb[162].mxu1 }
 0x757   :  { %2163 = vst.msk [vmem:[%s5330_s6 + $0x288] sm:$0xff] %vm2081_vm2, %v1862_v29  ;;  %v3232_v30 = vpop.f32.mrb[163].mxu1 }
 0x75a   :  { %v1867_v31 = vpop.f32.mrb[164].mxu1 }
 0x75b   :  { %2164 = vst.msk [vmem:[%s5330_s6 + $0x290] sm:$0xff] %vm2081_vm2, %v1867_v31  ;;  %v3235_v32 = vpop.f32.mrb[165].mxu1 }
 0x75e   :  { %v1872_v33 = vpop.f32.mrb[166].mxu1 }
 0x75f   :  { %2165 = vst.msk [vmem:[%s5330_s6 + $0x298] sm:$0xff] %vm2081_vm2, %v1872_v33  ;;  %v3238_v34 = vpop.f32.mrb[167].mxu1 }
 0x762   :  { %v1877_v35 = vpop.f32.mrb[168].mxu1 }
 0x763   :  { %2166 = vst.msk [vmem:[%s5330_s6 + $0x2a0] sm:$0xff] %vm2081_vm2, %v1877_v35  ;;  %v3241_v36 = vpop.f32.mrb[169].mxu1 }
 0x766   :  { %v1882_v37 = vpop.f32.mrb[170].mxu1 }
 0x767   :  { %2167 = vst.msk [vmem:[%s5330_s6 + $0x2a8] sm:$0xff] %vm2081_vm2, %v1882_v37  ;;  %v3244_v38 = vpop.f32.mrb[171].mxu1 }
 0x76a   :  { %v1887_v39 = vpop.f32.mrb[172].mxu1 }
 0x76b   :  { %2168 = vst.msk [vmem:[%s5330_s6 + $0x2b0] sm:$0xff] %vm2081_vm2, %v1887_v39  ;;  %v3247_v40 = vpop.f32.mrb[173].mxu1 }
 0x76e   :  { %v1892_v41 = vpop.f32.mrb[174].mxu1 }
 0x76f   :  { %2169 = vst.msk [vmem:[%s5330_s6 + $0x2b8] sm:$0xff] %vm2081_vm2, %v1892_v41  ;;  %v3250_v42 = vpop.f32.mrb[175].mxu1 }
 0x772   :  { %v1897_v43 = vpop.f32.mrb[176].mxu1 }
 0x773   :  { %2170 = vst.msk [vmem:[%s5330_s6 + $0x2c0] sm:$0xff] %vm2081_vm2, %v1897_v43  ;;  %v3253_v44 = vpop.f32.mrb[177].mxu1 }
 0x776   :  { %v1902_v45 = vpop.f32.mrb[178].mxu1 }
 0x777   :  { %2171 = vst.msk [vmem:[%s5330_s6 + $0x2c8] sm:$0xff] %vm2081_vm2, %v1902_v45  ;;  %v3256_v46 = vpop.f32.mrb[179].mxu1 }
 0x77a   :  { %v1907_v47 = vpop.f32.mrb[180].mxu1 }
 0x77b   :  { %2172 = vst.msk [vmem:[%s5330_s6 + $0x2d0] sm:$0xff] %vm2081_vm2, %v1907_v47  ;;  %v3259_v48 = vpop.f32.mrb[181].mxu1 }
 0x77e   :  { %v1912_v49 = vpop.f32.mrb[182].mxu1 }
 0x77f   :  { %2173 = vst.msk [vmem:[%s5330_s6 + $0x2d8] sm:$0xff] %vm2081_vm2, %v1912_v49  ;;  %v3262_v50 = vpop.f32.mrb[183].mxu1 }
 0x782   :  { %v1917_v51 = vpop.f32.mrb[184].mxu1 }
 0x783   :  { %2174 = vst.msk [vmem:[%s5330_s6 + $0x2e0] sm:$0xff] %vm2081_vm2, %v1917_v51  ;;  %v3265_v52 = vpop.f32.mrb[185].mxu1 }
 0x786   :  { %v1922_v0 = vpop.f32.mrb[186].mxu1 }
 0x787   :  { %2175 = vst.msk [vmem:[%s5330_s6 + $0x2e8] sm:$0xff] %vm2081_vm2, %v1922_v0  ;;  %v3268_v54 = vpop.f32.mrb[187].mxu1 }
 0x78a   :  { %v1927_v55 = vpop.f32.mrb[188].mxu1 }
 0x78b   :  { %2176 = vst.msk [vmem:[%s5330_s6 + $0x2f0] sm:$0xff] %vm2081_vm2, %v1927_v55  ;;  %v3271_v56 = vpop.f32.mrb[189].mxu1 }
 0x78e   :  { %v1932_v57 = vpop.f32.mrb[190].mxu1 }
 0x78f   :  { %2177 = vst.msk [vmem:[%s5330_s6 + $0x2f8] sm:$0xff] %vm2081_vm2, %v1932_v57  ;;  %v3274_v58 = vpop.f32.mrb[191].mxu1 }
 0x792   :  { %v1937_v59 = vpop.f32.mrb[192].mxu1 }
 0x793   :  { %2178 = vst.msk [vmem:[%s5330_s6 + $0x300] sm:$0xff] %vm2081_vm2, %v1937_v59  ;;  %v3277_v60 = vpop.f32.mrb[193].mxu1 }
 0x796   :  { %v1942_v61 = vpop.f32.mrb[194].mxu1 }
 0x797   :  { %2179 = vst.msk [vmem:[%s5330_s6 + $0x308] sm:$0xff] %vm2081_vm2, %v1942_v61  ;;  %v3280_v62 = vpop.f32.mrb[195].mxu1 }
 0x79a   :  { %v1947_v24 = vpop.f32.mrb[196].mxu1 }
 0x79b   :  { %2180 = vst.msk [vmem:[%s5330_s6 + $0x310] sm:$0xff] %vm2081_vm2, %v1947_v24  ;;  %v3283_v2 = vpop.f32.mrb[197].mxu1 }
 0x79e   :  { %v1952_v3 = vpop.f32.mrb[198].mxu1 }
 0x79f   :  { %2181 = vst.msk [vmem:[%s5330_s6 + $0x318] sm:$0xff] %vm2081_vm2, %v1952_v3  ;;  %v3286_v4 = vpop.f32.mrb[199].mxu1 }
 0x7a2   :  { %v1957_v5 = vpop.f32.mrb[200].mxu1 }
 0x7a3   :  { %2182 = vst.msk [vmem:[%s5330_s6 + $0x320] sm:$0xff] %vm2081_vm2, %v1957_v5  ;;  %v3289_v6 = vpop.f32.mrb[201].mxu1 }
 0x7a6   :  { %v1962_v7 = vpop.f32.mrb[202].mxu1 }
 0x7a7   :  { %2183 = vst.msk [vmem:[%s5330_s6 + $0x328] sm:$0xff] %vm2081_vm2, %v1962_v7  ;;  %v3292_v8 = vpop.f32.mrb[203].mxu1 }
 0x7aa   :  { %v1967_v9 = vpop.f32.mrb[204].mxu1 }
 0x7ab   :  { %2184 = vst.msk [vmem:[%s5330_s6 + $0x330] sm:$0xff] %vm2081_vm2, %v1967_v9  ;;  %v3295_v10 = vpop.f32.mrb[205].mxu1 }
 0x7ae   :  { %v1972_v11 = vpop.f32.mrb[206].mxu1 }
 0x7af   :  { %2185 = vst.msk [vmem:[%s5330_s6 + $0x338] sm:$0xff] %vm2081_vm2, %v1972_v11  ;;  %v3298_v63 = vpop.f32.mrb[207].mxu1 }
 0x7b2   :  { %v1977_v12 = vpop.f32.mrb[208].mxu1 }
 0x7b3   :  { %2186 = vst.msk [vmem:[%s5330_s6 + $0x340] sm:$0xff] %vm2081_vm2, %v1977_v12  ;;  %v3301_v13 = vpop.f32.mrb[209].mxu1 }
 0x7b6   :  { %v1982_v14 = vpop.f32.mrb[210].mxu1 }
 0x7b7   :  { %2187 = vst.msk [vmem:[%s5330_s6 + $0x348] sm:$0xff] %vm2081_vm2, %v1982_v14  ;;  %v3304_v1 = vpop.f32.mrb[211].mxu1 }
 0x7ba   :  { %v1987_v53 = vpop.f32.mrb[212].mxu1 }
 0x7bb   :  { %2188 = vst.msk [vmem:[%s5330_s6 + $0x350] sm:$0xff] %vm2081_vm2, %v1987_v53  ;;  %v3307_v15 = vpop.f32.mrb[213].mxu1 }
 0x7be   :  { %v1992_v16 = vpop.f32.mrb[214].mxu1 }
 0x7bf   :  { %2189 = vst.msk [vmem:[%s5330_s6 + $0x358] sm:$0xff] %vm2081_vm2, %v1992_v16  ;;  %v3310_v17 = vpop.f32.mrb[215].mxu1 }
 0x7c2   :  { %v1997_v18 = vpop.f32.mrb[216].mxu1 }
 0x7c3   :  { %2190 = vst.msk [vmem:[%s5330_s6 + $0x360] sm:$0xff] %vm2081_vm2, %v1997_v18  ;;  %v3313_v19 = vpop.f32.mrb[217].mxu1 }
 0x7c6   :  { %v2002_v20 = vpop.f32.mrb[218].mxu1 }
 0x7c7   :  { %2191 = vst.msk [vmem:[%s5330_s6 + $0x368] sm:$0xff] %vm2081_vm2, %v2002_v20  ;;  %v3316_v21 = vpop.f32.mrb[219].mxu1 }
 0x7ca   :  { %v2007_v22 = vpop.f32.mrb[220].mxu1 }
 0x7cb   :  { %2192 = vst.msk [vmem:[%s5330_s6 + $0x370] sm:$0xff] %vm2081_vm2, %v2007_v22  ;;  %v3319_v23 = vpop.f32.mrb[221].mxu1 }
 0x7ce   :  { %v2012_v25 = vpop.f32.mrb[222].mxu1 }
 0x7cf   :  { %2193 = vst.msk [vmem:[%s5330_s6 + $0x378] sm:$0xff] %vm2081_vm2, %v2012_v25  ;;  %v3322_v26 = vpop.f32.mrb[223].mxu1 }
 0x7d2   :  { %v2017_v27 = vpop.f32.mrb[224].mxu1 }
 0x7d3   :  { %2194 = vst.msk [vmem:[%s5330_s6 + $0x380] sm:$0xff] %vm2081_vm2, %v2017_v27  ;;  %v3325_v28 = vpop.f32.mrb[225].mxu1 }
 0x7d6   :  { %v2022_v29 = vpop.f32.mrb[226].mxu1 }
 0x7d7   :  { %2195 = vst.msk [vmem:[%s5330_s6 + $0x388] sm:$0xff] %vm2081_vm2, %v2022_v29  ;;  %v3328_v30 = vpop.f32.mrb[227].mxu1 }
 0x7da   :  { %v2027_v31 = vpop.f32.mrb[228].mxu1 }
 0x7db   :  { %2196 = vst.msk [vmem:[%s5330_s6 + $0x390] sm:$0xff] %vm2081_vm2, %v2027_v31  ;;  %v3331_v32 = vpop.f32.mrb[229].mxu1 }
 0x7de   :  { %v2032_v33 = vpop.f32.mrb[230].mxu1 }
 0x7df   :  { %2197 = vst.msk [vmem:[%s5330_s6 + $0x398] sm:$0xff] %vm2081_vm2, %v2032_v33  ;;  %v3334_v34 = vpop.f32.mrb[231].mxu1 }
 0x7e2   :  { %v2037_v35 = vpop.f32.mrb[232].mxu1 }
 0x7e3   :  { %2198 = vst.msk [vmem:[%s5330_s6 + $0x3a0] sm:$0xff] %vm2081_vm2, %v2037_v35  ;;  %v3337_v36 = vpop.f32.mrb[233].mxu1 }
 0x7e6   :  { %v2042_v37 = vpop.f32.mrb[234].mxu1 }
 0x7e7   :  { %2199 = vst.msk [vmem:[%s5330_s6 + $0x3a8] sm:$0xff] %vm2081_vm2, %v2042_v37  ;;  %v3340_v38 = vpop.f32.mrb[235].mxu1 }
 0x7ea   :  { %v2047_v39 = vpop.f32.mrb[236].mxu1 }
 0x7eb   :  { %2200 = vst.msk [vmem:[%s5330_s6 + $0x3b0] sm:$0xff] %vm2081_vm2, %v2047_v39  ;;  %v3343_v40 = vpop.f32.mrb[237].mxu1 }
 0x7ee   :  { %v2052_v41 = vpop.f32.mrb[238].mxu1 }
 0x7ef   :  { %2201 = vst.msk [vmem:[%s5330_s6 + $0x3b8] sm:$0xff] %vm2081_vm2, %v2052_v41  ;;  %v3346_v42 = vpop.f32.mrb[239].mxu1 }
 0x7f2   :  { %v2057_v43 = vpop.f32.mrb[240].mxu1 }
 0x7f3   :  { %2202 = vst.msk [vmem:[%s5330_s6 + $0x3c0] sm:$0xff] %vm2081_vm2, %v2057_v43  ;;  %v3349_v44 = vpop.f32.mrb[241].mxu1 }
 0x7f6   :  { %v2062_v45 = vpop.f32.mrb[242].mxu1 }
 0x7f7   :  { %2203 = vst.msk [vmem:[%s5330_s6 + $0x3c8] sm:$0xff] %vm2081_vm2, %v2062_v45  ;;  %v3352_v46 = vpop.f32.mrb[243].mxu1 }
 0x7fa   :  { %v2067_v47 = vpop.f32.mrb[244].mxu1 }
 0x7fb   :  { %2204 = vst.msk [vmem:[%s5330_s6 + $0x3d0] sm:$0xff] %vm2081_vm2, %v2067_v47  ;;  %v3355_v48 = vpop.f32.mrb[245].mxu1 }
 0x7fe   :  { %v2072_v49 = vpop.f32.mrb[246].mxu1 }
 0x7ff   :  { %2205 = vst.msk [vmem:[%s5330_s6 + $0x3d8] sm:$0xff] %vm2081_vm2, %v2072_v49  ;;  %v3358_v50 = vpop.f32.mrb[247].mxu1 }
 0x802   :  { %v2077_v51 = vpop.f32.mrb[248].mxu1 }
 0x803   :  { %2206 = vst.msk [vmem:[%s5330_s6 + $0x3e0] sm:$0xff] %vm2081_vm2, %v2077_v51  ;;  %v3361_v52 = vpop.f32.mrb[249].mxu1 }
 0x804   :  { %2211 = vsyncpa [#allocation3], 1 }
 0x805   :  { %2212 = vsyncpa [#allocation5], 1 }

</bundles_post_ra>
